<compile_context>
chip_gen: v6e
topology: v6e:2x2x1
jax: 0.10.0
libtpu: 0.0.40
codegen_flags: <defaults>
</compile_context>

<pallas_src>
import functools
import math

import jax
import jax.numpy as jnp
from jax.experimental import pallas as pl
from jax.experimental.pallas import tpu as pltpu


_VMEM_LIMIT = 32 * 1024 * 1024  # safe on v5e/v6e/v7x; raises v5e's 16 MiB default


def _tile(dim, target):
    """Largest clean tile: `target` if it divides `dim`, else the full dim."""
    if dim <= target:
        return dim
    if dim % target == 0:
        return target
    return dim


# ----------------------------------------------------------------------------
# Generic tiled linear: y = x @ w.T + b (PyTorch nn.Linear layout w = (N, K)).
# Grid (M/tm, N/tn, K/tk), f32 accumulator scratch, no in-kernel transpose.
# ----------------------------------------------------------------------------
def _linear_kernel(x_ref, w_ref, b_ref, o_ref, acc_ref, *, activation):
    @pl.when(pl.program_id(2) == 0)
    def _():
        acc_ref[...] = jnp.zeros_like(acc_ref)

    acc_ref[...] += jax.lax.dot_general(
        x_ref[...], w_ref[...],
        dimension_numbers=(((1,), (1,)), ((), ())),
        preferred_element_type=jnp.float32)

    @pl.when(pl.program_id(2) == pl.num_programs(2) - 1)
    def _():
        y = acc_ref[...] + b_ref[...]
        if activation == "relu":
            y = jnp.maximum(y, 0.0)
        o_ref[...] = y.astype(o_ref.dtype)


def linear(x, w, b, activation=None, out_dtype=None, tm=256, tn=256, tk=512):
    """x: (M, K); w: (N, K); b: (N,) f32.  Returns (M, N)."""
    M, K = x.shape
    N = w.shape[0]
    out_dtype = out_dtype or x.dtype
    tm, tn, tk = _tile(M, tm), _tile(N, tn), _tile(K, tk)
    kernel = functools.partial(_linear_kernel, activation=activation)
    return pl.pallas_call(
        kernel,
        out_shape=jax.ShapeDtypeStruct((M, N), out_dtype),
        grid=(M // tm, N // tn, K // tk),
        in_specs=[
            pl.BlockSpec((tm, tk), lambda i, j, k: (i, k)),
            pl.BlockSpec((tn, tk), lambda i, j, k: (j, k)),
            pl.BlockSpec((1, tn), lambda i, j, k: (0, j)),
        ],
        out_specs=pl.BlockSpec((tm, tn), lambda i, j, k: (i, j)),
        scratch_shapes=[pltpu.VMEM((tm, tn), jnp.float32)],
        compiler_params=pltpu.CompilerParams(
            dimension_semantics=("parallel", "parallel", "arbitrary"),
            vmem_limit_bytes=_VMEM_LIMIT),
    )(x, w, b.reshape(1, N))


# ----------------------------------------------------------------------------
# Fused multi-output projection: one matmul kernel producing n_out lane-dense
# (M, E) outputs (Q/K/V fused, or Q-only / KV for cross-attention).
# ----------------------------------------------------------------------------
def _multi_proj_kernel(x_ref, w_ref, b_ref, *o_refs):
    x = x_ref[...]
    E = o_refs[0].shape[-1]
    for i, o_ref in enumerate(o_refs):
        w_i = w_ref[i * E:(i + 1) * E, :]                 # (E, K), contiguous rows
        y = jax.lax.dot_general(x, w_i, (((1,), (1,)), ((), ())),
                                preferred_element_type=jnp.float32)
        y = y + b_ref[:, i * E:(i + 1) * E]
        o_ref[...] = y.astype(o_ref.dtype)


def multi_proj(x, w, b, n_out, out_dtype=None, tm=256):
    """x: (M, K); w: (n_out*E, K); b: (n_out*E,) f32 -> n_out arrays (M, E)."""
    M, K = x.shape
    NE = w.shape[0]
    E = NE // n_out
    out_dtype = out_dtype or x.dtype
    tm = _tile(M, tm)
    res = pl.pallas_call(
        _multi_proj_kernel,
        out_shape=tuple(jax.ShapeDtypeStruct((M, E), out_dtype) for _ in range(n_out)),
        grid=(M // tm,),
        in_specs=[
            pl.BlockSpec((tm, K), lambda i: (i, 0)),
            pl.BlockSpec((NE, K), lambda i: (0, 0)),
            pl.BlockSpec((1, NE), lambda i: (0, 0)),
        ],
        out_specs=tuple(pl.BlockSpec((tm, E), lambda i: (i, 0)) for _ in range(n_out)),
        compiler_params=pltpu.CompilerParams(
            dimension_semantics=("parallel",), vmem_limit_bytes=_VMEM_LIMIT),
    )(x, w, b.reshape(1, NE))
    if not isinstance(res, (list, tuple)):
        res = (res,)
    return tuple(res)


# ----------------------------------------------------------------------------
# Fused attention block: per-batch multi-head attention + out_proj + residual
# add + LayerNorm.  All heads handled inside one grid step (grid over B).
# ----------------------------------------------------------------------------
def _attn_block_kernel(q_ref, k_ref, v_ref, r_ref, wo_ref, bo_ref, g_ref, bln_ref,
                       o_ref, *, nheads, scale, eps):
    q = q_ref[...]                     # (Lq, E)
    k = k_ref[...]                     # (Lk, E)
    v = v_ref[...]                     # (Lk, E)
    Lq, E = q.shape
    dh = E // nheads
    y = jnp.zeros((Lq, E), jnp.float32)
    for h in range(nheads):            # static unroll; heads are lane slices
        sl = slice(h * dh, (h + 1) * dh)
        q_h, k_h, v_h = q[:, sl], k[:, sl], v[:, sl]
        s = jax.lax.dot_general(q_h, k_h, (((1,), (1,)), ((), ())),
                                preferred_element_type=jnp.float32) * scale
        m = jnp.max(s, axis=-1, keepdims=True)
        p = jnp.exp(s - m)
        inv = pl.reciprocal(jnp.sum(p, axis=-1, keepdims=True), approx=True)
        p = (p * inv).astype(v_h.dtype)
        o_h = jnp.dot(p, v_h, preferred_element_type=jnp.float32)        # (Lq, dh)
        w_oh = wo_ref[:, sl]                                             # (E, dh)
        y = y + jax.lax.dot_general(o_h.astype(w_oh.dtype), w_oh,
                                    (((1,), (1,)), ((), ())),
                                    preferred_element_type=jnp.float32)  # (Lq, E)
    y = y + bo_ref[...] + r_ref[...].astype(jnp.float32)
    mean = jnp.mean(y, axis=-1, keepdims=True)
    c = y - mean
    var = jnp.mean(c * c, axis=-1, keepdims=True)
    z = c * jax.lax.rsqrt(var + eps)
    o_ref[...] = (z * g_ref[...] + bln_ref[...]).astype(o_ref.dtype)


def attention_block(q, k, v, residual, wo, bo, g, b, nheads, eps=1e-5):
    """q: (B, Lq, E); k/v: (B, Lk, E); residual: (B, Lq, E) -> LN(attn_out + res)."""
    B, Lq, E = q.shape
    Lk = k.shape[1]
    scale = 1.0 / math.sqrt(E // nheads)
    kernel = functools.partial(_attn_block_kernel, nheads=nheads, scale=scale, eps=eps)
    return pl.pallas_call(
        kernel,
        out_shape=jax.ShapeDtypeStruct((B, Lq, E), residual.dtype),
        grid=(B,),
        in_specs=[
            pl.BlockSpec((None, Lq, E), lambda i: (i, 0, 0)),
            pl.BlockSpec((None, Lk, E), lambda i: (i, 0, 0)),
            pl.BlockSpec((None, Lk, E), lambda i: (i, 0, 0)),
            pl.BlockSpec((None, Lq, E), lambda i: (i, 0, 0)),   # residual
            pl.BlockSpec((E, E), lambda i: (0, 0)),             # out_proj weight
            pl.BlockSpec((1, E), lambda i: (0, 0)),             # out_proj bias
            pl.BlockSpec((1, E), lambda i: (0, 0)),             # LN gamma
            pl.BlockSpec((1, E), lambda i: (0, 0)),             # LN beta
        ],
        out_specs=pl.BlockSpec((None, Lq, E), lambda i: (i, 0, 0)),
        compiler_params=pltpu.CompilerParams(
            dimension_semantics=("parallel",), vmem_limit_bytes=_VMEM_LIMIT),
    )(q, k, v, residual, wo, bo.reshape(1, E), g.reshape(1, E), b.reshape(1, E))


# ----------------------------------------------------------------------------
# Fused feed-forward block: lin1 + ReLU + lin2 + residual add + LayerNorm.
# The (tm, ff) intermediate stays in VMEM/vregs.
# ----------------------------------------------------------------------------
def _ffn_kernel(x_ref, w1_ref, b1_ref, w2_ref, b2_ref, g_ref, bln_ref, o_ref, *, eps):
    x = x_ref[...]
    h = jax.lax.dot_general(x, w1_ref[...], (((1,), (1,)), ((), ())),
                            preferred_element_type=jnp.float32)
    h = jnp.maximum(h + b1_ref[...], 0.0)
    y = jax.lax.dot_general(h.astype(w2_ref.dtype), w2_ref[...],
                            (((1,), (1,)), ((), ())),
                            preferred_element_type=jnp.float32)
    y = y + b2_ref[...] + x.astype(jnp.float32)
    mean = jnp.mean(y, axis=-1, keepdims=True)
    c = y - mean
    var = jnp.mean(c * c, axis=-1, keepdims=True)
    z = c * jax.lax.rsqrt(var + eps)
    o_ref[...] = (z * g_ref[...] + bln_ref[...]).astype(o_ref.dtype)


def ffn_block(x, w1, b1, w2, b2, g, b, eps=1e-5, tm=256):
    M, D = x.shape
    F = w1.shape[0]
    tm = _tile(M, tm)
    kernel = functools.partial(_ffn_kernel, eps=eps)
    return pl.pallas_call(
        kernel,
        out_shape=jax.ShapeDtypeStruct((M, D), x.dtype),
        grid=(M // tm,),
        in_specs=[
            pl.BlockSpec((tm, D), lambda i: (i, 0)),
            pl.BlockSpec((F, D), lambda i: (0, 0)),
            pl.BlockSpec((1, F), lambda i: (0, 0)),
            pl.BlockSpec((D, F), lambda i: (0, 0)),
            pl.BlockSpec((1, D), lambda i: (0, 0)),
            pl.BlockSpec((1, D), lambda i: (0, 0)),
            pl.BlockSpec((1, D), lambda i: (0, 0)),
        ],
        out_specs=pl.BlockSpec((tm, D), lambda i: (i, 0)),
        compiler_params=pltpu.CompilerParams(
            dimension_semantics=("parallel",), vmem_limit_bytes=_VMEM_LIMIT),
    )(x, w1, b1.reshape(1, F), w2, b2.reshape(1, D), g.reshape(1, D), b.reshape(1, D))


# ----------------------------------------------------------------------------
# Row-tiled LayerNorm (no fake zero residual).
# ----------------------------------------------------------------------------
def _ln_kernel(x_ref, g_ref, b_ref, o_ref, *, eps):
    x = x_ref[...].astype(jnp.float32)
    mean = jnp.mean(x, axis=-1, keepdims=True)
    c = x - mean
    var = jnp.mean(c * c, axis=-1, keepdims=True)
    y = c * jax.lax.rsqrt(var + eps)
    o_ref[...] = (y * g_ref[...] + b_ref[...]).astype(o_ref.dtype)


def layernorm(x, g, b, eps=1e-5, tm=512):
    M, D = x.shape
    tm = _tile(M, tm)
    kernel = functools.partial(_ln_kernel, eps=eps)
    return pl.pallas_call(
        kernel,
        out_shape=jax.ShapeDtypeStruct((M, D), x.dtype),
        grid=(M // tm,),
        in_specs=[
            pl.BlockSpec((tm, D), lambda i: (i, 0)),
            pl.BlockSpec((1, D), lambda i: (0, 0)),
            pl.BlockSpec((1, D), lambda i: (0, 0)),
        ],
        out_specs=pl.BlockSpec((tm, D), lambda i: (i, 0)),
        compiler_params=pltpu.CompilerParams(
            dimension_semantics=("parallel",), vmem_limit_bytes=_VMEM_LIMIT),
    )(x, g.reshape(1, D), b.reshape(1, D))


# ----------------------------------------------------------------------------
# nn.Transformer (post-norm, relu, eval) built from the fused kernels above.
# ----------------------------------------------------------------------------
def encoder_layer(src, p, nheads):
    B, L, E = src.shape
    q, k, v = multi_proj(src.reshape(B * L, E),
                         p["self_attn"]["in_proj_w"], p["self_attn"]["in_proj_b"], 3)
    x = attention_block(q.reshape(B, L, E), k.reshape(B, L, E), v.reshape(B, L, E),
                        src, p["self_attn"]["out_proj_w"], p["self_attn"]["out_proj_b"],
                        p["norm1_g"], p["norm1_b"], nheads)
    x2d = ffn_block(x.reshape(B * L, E), p["lin1_w"], p["lin1_b"],
                    p["lin2_w"], p["lin2_b"], p["norm2_g"], p["norm2_b"])
    return x2d.reshape(B, L, E)


def decoder_layer(tgt, memory, p, nheads):
    B, Lq, E = tgt.shape
    Lk = memory.shape[1]
    # Self-attention block.
    q, k, v = multi_proj(tgt.reshape(B * Lq, E),
                         p["self_attn"]["in_proj_w"], p["self_attn"]["in_proj_b"], 3)
    x = attention_block(q.reshape(B, Lq, E), k.reshape(B, Lq, E), v.reshape(B, Lq, E),
                        tgt, p["self_attn"]["out_proj_w"], p["self_attn"]["out_proj_b"],
                        p["norm1_g"], p["norm1_b"], nheads)
    # Cross-attention block (q from decoder state, k/v from encoder memory).
    ca = p["cross_attn"]
    wq, bq = ca["in_proj_w"][:E], ca["in_proj_b"][:E]
    wkv, bkv = ca["in_proj_w"][E:], ca["in_proj_b"][E:]
    (q2,) = multi_proj(x.reshape(B * Lq, E), wq, bq, 1)
    k2, v2 = multi_proj(memory.reshape(B * Lk, E), wkv, bkv, 2)
    x = attention_block(q2.reshape(B, Lq, E), k2.reshape(B, Lk, E), v2.reshape(B, Lk, E),
                        x, ca["out_proj_w"], ca["out_proj_b"],
                        p["norm2_g"], p["norm2_b"], nheads)
    # Feed-forward block.
    x2d = ffn_block(x.reshape(B * Lq, E), p["lin1_w"], p["lin1_b"],
                    p["lin2_w"], p["lin2_b"], p["norm3_g"], p["norm3_b"])
    return x2d.reshape(B, Lq, E)


# ----------------------------------------------------------------------------
# Full forward pass of cvt384_q2l.
# ----------------------------------------------------------------------------
def forward(params, x, *, patch, nheads, num_classes, hidden,
            compute_dtype=jnp.bfloat16):
    B, C, Hi, Wi = x.shape
    H, W = Hi // patch, Wi // patch
    S = H * W
    xc = x.astype(compute_dtype)

    # TODO(synk): synthetic backbone stand-in (patch-embed projection) for the
    # pretrained CvT-w24-384 stage-3 feature map.
    patches = xc.reshape(B, C, H, patch, W, patch)
    patches = jnp.transpose(patches, (0, 2, 4, 1, 3, 5)).reshape(B * S, C * patch * patch)
    feat = linear(patches, params["pe_w"], params["pe_b"])          # (B*S, conv_out)

    # self.conv: 1x1 Conv2d(conv_out, hidden) == per-position linear.
    h = linear(feat, params["conv_w"], params["conv_b"])            # (B*S, hidden)
    src = h.reshape(B, S, hidden)                                   # batch-major tokens

    # label_emb.repeat(B, 1, 1) -> (B, num_classes, hidden) (batch-major).
    tgt = jnp.broadcast_to(params["label_emb"].astype(compute_dtype),
                           (B, num_classes, hidden))

    # nn.Transformer(hidden, nheads, 1 encoder layer, 2 decoder layers).
    mem = encoder_layer(src, params["enc0"], nheads)
    mem = layernorm(mem.reshape(B * S, hidden),
                    params["enc_norm_g"], params["enc_norm_b"]).reshape(B, S, hidden)

    out = tgt
    for dp in params["dec"]:
        out = decoder_layer(out, mem, dp, nheads)
    out = layernorm(out.reshape(B * num_classes, hidden),
                    params["dec_norm_g"], params["dec_norm_b"])

    # (B, num_classes, hidden) -> (B, num_classes*hidden) -> classifier.
    out = out.reshape(B, num_classes * hidden)
    logits = linear(out, params["cls_w"], params["cls_b"], out_dtype=jnp.float32)
    return logits


# ----------------------------------------------------------------------------
# Deterministic parameter initialization (synthetic; no checkpoint loading).
# Matmul weights stored in bf16; biases / LayerNorm params in f32.
# ----------------------------------------------------------------------------
def init_params(key, *, img_c, patch, conv_out, hidden, ff, num_classes, n_dec,
                w_dtype=jnp.bfloat16):
    keys = iter(jax.random.split(key, 128))

    def wgt(shape, scale=0.02):
        return (scale * jax.random.normal(next(keys), shape, jnp.float32)).astype(w_dtype)

    def vec(shape, scale=0.02):
        return scale * jax.random.normal(next(keys), shape, jnp.float32)

    def mha_p():
        return dict(
            in_proj_w=wgt((3 * hidden, hidden)), in_proj_b=vec((3 * hidden,)),
            out_proj_w=wgt((hidden, hidden)), out_proj_b=vec((hidden,)),
        )

    def enc_p():
        return dict(
            self_attn=mha_p(),
            lin1_w=wgt((ff, hidden)), lin1_b=vec((ff,)),
            lin2_w=wgt((hidden, ff)), lin2_b=vec((hidden,)),
            norm1_g=jnp.ones((hidden,), jnp.float32), norm1_b=jnp.zeros((hidden,), jnp.float32),
            norm2_g=jnp.ones((hidden,), jnp.float32), norm2_b=jnp.zeros((hidden,), jnp.float32),
        )

    def dec_p():
        d = enc_p()
        d["cross_attn"] = mha_p()
        d["norm3_g"] = jnp.ones((hidden,), jnp.float32)
        d["norm3_b"] = jnp.zeros((hidden,), jnp.float32)
        return d

    return dict(
        pe_w=wgt((conv_out, img_c * patch * patch)), pe_b=vec((conv_out,)),
        conv_w=wgt((hidden, conv_out)), conv_b=vec((hidden,)),
        label_emb=jax.random.uniform(next(keys), (1, num_classes, hidden), jnp.float32),
        enc0=enc_p(),
        enc_norm_g=jnp.ones((hidden,), jnp.float32), enc_norm_b=jnp.zeros((hidden,), jnp.float32),
        dec=[dec_p() for _ in range(n_dec)],
        dec_norm_g=jnp.ones((hidden,), jnp.float32), dec_norm_b=jnp.zeros((hidden,), jnp.float32),
        cls_w=wgt((num_classes, num_classes * hidden)), cls_b=vec((num_classes,)),
    )


if __name__ == "__main__":
    # Small shapes consistent with the module structure.
    B, C_img, HW_img = 2, 3, 16
    patch = 4            # synthetic backbone downsampling -> 4x4 feature map
    conv_out = 32        # stands in for the 1024-channel CvT stage-3 output
    hidden = 32          # hidden_dim
    nheads = 4
    ff = 64              # transformer feed-forward dim (PyTorch default would be 2048)
    num_classes = 6
    decoder_layers = 2

    x = jax.random.normal(jax.random.PRNGKey(0), (B, C_img, HW_img, HW_img), jnp.float32)
    params = init_params(
        jax.random.PRNGKey(1),
        img_c=C_img, patch=patch, conv_out=conv_out, hidden=hidden,
        ff=ff, num_classes=num_classes, n_dec=decoder_layers,
    )

    fwd = jax.jit(functools.partial(
        forward, patch=patch, nheads=nheads, num_classes=num_classes, hidden=hidden))
    logits = fwd(params, x)
    jax.block_until_ready(logits)
    assert logits.shape == (B, num_classes), logits.shape
    assert logits.dtype == jnp.float32
    assert bool(jnp.all(jnp.isfinite(logits)))
    print("KERNEL_OK")
</pallas_src>

<mosaic_0001>
module attributes {stable_mosaic.version = 11 : i64} {
  func.func @_linear_kernel(%arg0: i32, %arg1: i32, %arg2: i32, %arg3: memref<32x48xbf16, #tpu.memory_space<vmem>>, %arg4: memref<32x48xbf16, #tpu.memory_space<vmem>>, %arg5: memref<1x32xf32, #tpu.memory_space<vmem>>, %arg6: memref<32x32xbf16, #tpu.memory_space<vmem>>, %arg7: memref<32x32xf32, #tpu.memory_space<vmem>>) attributes {dimension_semantics = [#tpu.dimension_semantics<parallel>, #tpu.dimension_semantics<parallel>, #tpu.dimension_semantics<arbitrary>], iteration_bounds = array<i64: 1, 1, 1>, scalar_prefetch = 0 : i64, scratch_operands = 1 : i64, tpu.core_type = #tpu.core_type<tc>, window_params = [{transform_indices = @transform_0, window_bounds = array<i64: 32, 48>}, {transform_indices = @transform_1, window_bounds = array<i64: 32, 48>}, {transform_indices = @transform_2, window_bounds = array<i64: 1, 32>}, {transform_indices = @transform_3, window_bounds = array<i64: 32, 32>}]} {
    %c0_i32 = arith.constant 0 : i32
    %0 = arith.cmpi eq, %arg2, %c0_i32 : i32
    %1 = arith.extui %0 : i1 to i32
    %c0_i32_0 = arith.constant 0 : i32
    %2 = arith.cmpi ne, %1, %c0_i32_0 : i32
    scf.if %2 {
      %cst_10 = arith.constant 0.000000e+00 : f32
      %12 = vector.broadcast %cst_10 : f32 to vector<32x32xf32>
      %c0_11 = arith.constant 0 : index
      %c0_12 = arith.constant 0 : index
      %13 = vector.load %arg7[%c0_11, %c0_12] : memref<32x32xf32, #tpu.memory_space<vmem>>, vector<32x32xf32>
      tpu.vector_store %arg7[%c0_11, %c0_12], %12 {strides = array<i32>} : memref<32x32xf32, #tpu.memory_space<vmem>>, vector<32x32xf32>,
    } else {
    }
    %c0 = arith.constant 0 : index
    %c0_1 = arith.constant 0 : index
    %3 = vector.load %arg7[%c0, %c0_1] : memref<32x32xf32, #tpu.memory_space<vmem>>, vector<32x32xf32>
    %c0_2 = arith.constant 0 : index
    %c0_3 = arith.constant 0 : index
    %4 = vector.load %arg3[%c0_2, %c0_3] : memref<32x48xbf16, #tpu.memory_space<vmem>>, vector<32x48xbf16>
    %c0_4 = arith.constant 0 : index
    %c0_5 = arith.constant 0 : index
    %5 = vector.load %arg4[%c0_4, %c0_5] : memref<32x48xbf16, #tpu.memory_space<vmem>>, vector<32x48xbf16>
    %cst = arith.constant dense<0.000000e+00> : vector<32x32xf32>
    %6 = tpu.matmul %4, %5, %cst {dimension_numbers = #tpu.dot_dimension_numbers<[1], [1], [0], [0], [0, 0, 1, 0], [], []>} : vector<32x48xbf16>, vector<32x48xbf16>, vector<32x32xf32> -> vector<32x32xf32>
    %7 = arith.addf %3, %6 : vector<32x32xf32>
    %c0_6 = arith.constant 0 : index
    %c0_7 = arith.constant 0 : index
    %8 = vector.load %arg7[%c0_6, %c0_7] : memref<32x32xf32, #tpu.memory_space<vmem>>, vector<32x32xf32>
    tpu.vector_store %arg7[%c0_6, %c0_7], %7 {strides = array<i32>} : memref<32x32xf32, #tpu.memory_space<vmem>>, vector<32x32xf32>,
    %c0_i32_8 = arith.constant 0 : i32
    %9 = arith.cmpi eq, %arg2, %c0_i32_8 : i32
    %10 = arith.extui %9 : i1 to i32
    %c0_i32_9 = arith.constant 0 : i32
    %11 = arith.cmpi ne, %10, %c0_i32_9 : i32
    scf.if %11 {
      %c0_10 = arith.constant 0 : index
      %c0_11 = arith.constant 0 : index
      %12 = vector.load %arg7[%c0_10, %c0_11] : memref<32x32xf32, #tpu.memory_space<vmem>>, vector<32x32xf32>
      %c0_12 = arith.constant 0 : index
      %c0_13 = arith.constant 0 : index
      %13 = vector.load %arg5[%c0_12, %c0_13] : memref<1x32xf32, #tpu.memory_space<vmem>>, vector<1x32xf32>
      %14 = vector.broadcast %13 : vector<1x32xf32> to vector<32x32xf32>
      %15 = arith.addf %12, %14 : vector<32x32xf32>
      %16 = arith.truncf %15 : vector<32x32xf32> to vector<32x32xbf16>
      %c0_14 = arith.constant 0 : index
      %c0_15 = arith.constant 0 : index
      %17 = vector.load %arg6[%c0_14, %c0_15] : memref<32x32xbf16, #tpu.memory_space<vmem>>, vector<32x32xbf16>
      tpu.vector_store %arg6[%c0_14, %c0_15], %16 {strides = array<i32>} : memref<32x32xbf16, #tpu.memory_space<vmem>>, vector<32x32xbf16>,
    } else {
    }
    return
  }
  func.func @transform_0(%arg0: i32, %arg1: i32, %arg2: i32) -> (i32, i32) {
    %c0_i32 = arith.constant 0 : i32
    return %arg0, %arg2 : i32, i32
  }
  func.func @transform_1(%arg0: i32, %arg1: i32, %arg2: i32) -> (i32, i32) {
    %c0_i32 = arith.constant 0 : i32
    return %arg1, %arg2 : i32, i32
  }
  func.func @transform_2(%arg0: i32, %arg1: i32, %arg2: i32) -> (i32, i32) {
    %c0_i32 = arith.constant 0 : i32
    %c0_i32_0 = arith.constant 0 : i32
    return %c0_i32, %arg1 : i32, i32
  }
  func.func @transform_3(%arg0: i32, %arg1: i32, %arg2: i32) -> (i32, i32) {
    %c0_i32 = arith.constant 0 : i32
    return %arg0, %arg1 : i32, i32
  }
}

module attributes {stable_mosaic.version = 11 : i64} {
  func.func @_linear_kernel(%arg0: i32, %arg1: i32, %arg2: i32, %arg3: memref<32x32xbf16, #tpu.memory_space<vmem>>, %arg4: memref<32x32xbf16, #tpu.memory_space<vmem>>, %arg5: memref<1x32xf32, #tpu.memory_space<vmem>>, %arg6: memref<32x32xbf16, #tpu.memory_space<vmem>>, %arg7: memref<32x32xf32, #tpu.memory_space<vmem>>) attributes {dimension_semantics = [#tpu.dimension_semantics<parallel>, #tpu.dimension_semantics<parallel>, #tpu.dimension_semantics<arbitrary>], iteration_bounds = array<i64: 1, 1, 1>, scalar_prefetch = 0 : i64, scratch_operands = 1 : i64, tpu.core_type = #tpu.core_type<tc>, window_params = [{transform_indices = @transform_0, window_bounds = array<i64: 32, 32>}, {transform_indices = @transform_1, window_bounds = array<i64: 32, 32>}, {transform_indices = @transform_2, window_bounds = array<i64: 1, 32>}, {transform_indices = @transform_3, window_bounds = array<i64: 32, 32>}]} {
    %c0_i32 = arith.constant 0 : i32
    %0 = arith.cmpi eq, %arg2, %c0_i32 : i32
    %1 = arith.extui %0 : i1 to i32
    %c0_i32_0 = arith.constant 0 : i32
    %2 = arith.cmpi ne, %1, %c0_i32_0 : i32
    scf.if %2 {
      %cst_10 = arith.constant 0.000000e+00 : f32
      %12 = vector.broadcast %cst_10 : f32 to vector<32x32xf32>
      %c0_11 = arith.constant 0 : index
      %c0_12 = arith.constant 0 : index
      %13 = vector.load %arg7[%c0_11, %c0_12] : memref<32x32xf32, #tpu.memory_space<vmem>>, vector<32x32xf32>
      tpu.vector_store %arg7[%c0_11, %c0_12], %12 {strides = array<i32>} : memref<32x32xf32, #tpu.memory_space<vmem>>, vector<32x32xf32>,
    } else {
    }
    %c0 = arith.constant 0 : index
    %c0_1 = arith.constant 0 : index
    %3 = vector.load %arg7[%c0, %c0_1] : memref<32x32xf32, #tpu.memory_space<vmem>>, vector<32x32xf32>
    %c0_2 = arith.constant 0 : index
    %c0_3 = arith.constant 0 : index
    %4 = vector.load %arg3[%c0_2, %c0_3] : memref<32x32xbf16, #tpu.memory_space<vmem>>, vector<32x32xbf16>
    %c0_4 = arith.constant 0 : index
    %c0_5 = arith.constant 0 : index
    %5 = vector.load %arg4[%c0_4, %c0_5] : memref<32x32xbf16, #tpu.memory_space<vmem>>, vector<32x32xbf16>
    %cst = arith.constant dense<0.000000e+00> : vector<32x32xf32>
    %6 = tpu.matmul %4, %5, %cst {dimension_numbers = #tpu.dot_dimension_numbers<[1], [1], [0], [0], [0, 0, 1, 0], [], []>} : vector<32x32xbf16>, vector<32x32xbf16>, vector<32x32xf32> -> vector<32x32xf32>
    %7 = arith.addf %3, %6 : vector<32x32xf32>
    %c0_6 = arith.constant 0 : index
    %c0_7 = arith.constant 0 : index
    %8 = vector.load %arg7[%c0_6, %c0_7] : memref<32x32xf32, #tpu.memory_space<vmem>>, vector<32x32xf32>
    tpu.vector_store %arg7[%c0_6, %c0_7], %7 {strides = array<i32>} : memref<32x32xf32, #tpu.memory_space<vmem>>, vector<32x32xf32>,
    %c0_i32_8 = arith.constant 0 : i32
    %9 = arith.cmpi eq, %arg2, %c0_i32_8 : i32
    %10 = arith.extui %9 : i1 to i32
    %c0_i32_9 = arith.constant 0 : i32
    %11 = arith.cmpi ne, %10, %c0_i32_9 : i32
    scf.if %11 {
      %c0_10 = arith.constant 0 : index
      %c0_11 = arith.constant 0 : index
      %12 = vector.load %arg7[%c0_10, %c0_11] : memref<32x32xf32, #tpu.memory_space<vmem>>, vector<32x32xf32>
      %c0_12 = arith.constant 0 : index
      %c0_13 = arith.constant 0 : index
      %13 = vector.load %arg5[%c0_12, %c0_13] : memref<1x32xf32, #tpu.memory_space<vmem>>, vector<1x32xf32>
      %14 = vector.broadcast %13 : vector<1x32xf32> to vector<32x32xf32>
      %15 = arith.addf %12, %14 : vector<32x32xf32>
      %16 = arith.truncf %15 : vector<32x32xf32> to vector<32x32xbf16>
      %c0_14 = arith.constant 0 : index
      %c0_15 = arith.constant 0 : index
      %17 = vector.load %arg6[%c0_14, %c0_15] : memref<32x32xbf16, #tpu.memory_space<vmem>>, vector<32x32xbf16>
      tpu.vector_store %arg6[%c0_14, %c0_15], %16 {strides = array<i32>} : memref<32x32xbf16, #tpu.memory_space<vmem>>, vector<32x32xbf16>,
    } else {
    }
    return
  }
  func.func @transform_0(%arg0: i32, %arg1: i32, %arg2: i32) -> (i32, i32) {
    %c0_i32 = arith.constant 0 : i32
    return %arg0, %arg2 : i32, i32
  }
  func.func @transform_1(%arg0: i32, %arg1: i32, %arg2: i32) -> (i32, i32) {
    %c0_i32 = arith.constant 0 : i32
    return %arg1, %arg2 : i32, i32
  }
  func.func @transform_2(%arg0: i32, %arg1: i32, %arg2: i32) -> (i32, i32) {
    %c0_i32 = arith.constant 0 : i32
    %c0_i32_0 = arith.constant 0 : i32
    return %c0_i32, %arg1 : i32, i32
  }
  func.func @transform_3(%arg0: i32, %arg1: i32, %arg2: i32) -> (i32, i32) {
    %c0_i32 = arith.constant 0 : i32
    return %arg0, %arg1 : i32, i32
  }
}

module attributes {stable_mosaic.version = 11 : i64} {
  func.func @_multi_proj_kernel(%arg0: i32, %arg1: memref<32x32xbf16, #tpu.memory_space<vmem>>, %arg2: memref<96x32xbf16, #tpu.memory_space<vmem>>, %arg3: memref<1x96xf32, #tpu.memory_space<vmem>>, %arg4: memref<32x32xbf16, #tpu.memory_space<vmem>>, %arg5: memref<32x32xbf16, #tpu.memory_space<vmem>>, %arg6: memref<32x32xbf16, #tpu.memory_space<vmem>>) attributes {dimension_semantics = [#tpu.dimension_semantics<parallel>], iteration_bounds = array<i64: 1>, scalar_prefetch = 0 : i64, scratch_operands = 0 : i64, tpu.core_type = #tpu.core_type<tc>, window_params = [{transform_indices = @transform_0, window_bounds = array<i64: 32, 32>}, {pipeline_mode = #tpu.pipeline_mode<synchronous>, transform_indices = @transform_1, window_bounds = array<i64: 96, 32>}, {pipeline_mode = #tpu.pipeline_mode<synchronous>, transform_indices = @transform_2, window_bounds = array<i64: 1, 96>}, {transform_indices = @transform_3, window_bounds = array<i64: 32, 32>}, {transform_indices = @transform_4, window_bounds = array<i64: 32, 32>}, {transform_indices = @transform_5, window_bounds = array<i64: 32, 32>}]} {
    %c0 = arith.constant 0 : index
    %c0_0 = arith.constant 0 : index
    %0 = vector.load %arg1[%c0, %c0_0] : memref<32x32xbf16, #tpu.memory_space<vmem>>, vector<32x32xbf16>
    %c0_1 = arith.constant 0 : index
    %c0_2 = arith.constant 0 : index
    %1 = vector.load %arg2[%c0_1, %c0_2] : memref<96x32xbf16, #tpu.memory_space<vmem>>, vector<32x32xbf16>
    %cst = arith.constant dense<0.000000e+00> : vector<32x32xf32>
    %2 = tpu.matmul %0, %1, %cst {dimension_numbers = #tpu.dot_dimension_numbers<[1], [1], [0], [0], [0, 0, 1, 0], [], []>} : vector<32x32xbf16>, vector<32x32xbf16>, vector<32x32xf32> -> vector<32x32xf32>
    %c0_3 = arith.constant 0 : index
    %c0_4 = arith.constant 0 : index
    %3 = vector.load %arg3[%c0_3, %c0_4] : memref<1x96xf32, #tpu.memory_space<vmem>>, vector<1x32xf32>
    %4 = vector.broadcast %3 : vector<1x32xf32> to vector<32x32xf32>
    %5 = arith.addf %2, %4 : vector<32x32xf32>
    %6 = arith.truncf %5 : vector<32x32xf32> to vector<32x32xbf16>
    %c0_5 = arith.constant 0 : index
    %c0_6 = arith.constant 0 : index
    %7 = vector.load %arg4[%c0_5, %c0_6] : memref<32x32xbf16, #tpu.memory_space<vmem>>, vector<32x32xbf16>
    tpu.vector_store %arg4[%c0_5, %c0_6], %6 {strides = array<i32>} : memref<32x32xbf16, #tpu.memory_space<vmem>>, vector<32x32xbf16>,
    %c32 = arith.constant 32 : index
    %c0_7 = arith.constant 0 : index
    %8 = vector.load %arg2[%c32, %c0_7] : memref<96x32xbf16, #tpu.memory_space<vmem>>, vector<32x32xbf16>
    %cst_8 = arith.constant dense<0.000000e+00> : vector<32x32xf32>
    %9 = tpu.matmul %0, %8, %cst_8 {dimension_numbers = #tpu.dot_dimension_numbers<[1], [1], [0], [0], [0, 0, 1, 0], [], []>} : vector<32x32xbf16>, vector<32x32xbf16>, vector<32x32xf32> -> vector<32x32xf32>
    %c0_9 = arith.constant 0 : index
    %c32_10 = arith.constant 32 : index
    %10 = vector.load %arg3[%c0_9, %c32_10] : memref<1x96xf32, #tpu.memory_space<vmem>>, vector<1x32xf32>
    %11 = vector.broadcast %10 : vector<1x32xf32> to vector<32x32xf32>
    %12 = arith.addf %9, %11 : vector<32x32xf32>
    %13 = arith.truncf %12 : vector<32x32xf32> to vector<32x32xbf16>
    %c0_11 = arith.constant 0 : index
    %c0_12 = arith.constant 0 : index
    %14 = vector.load %arg5[%c0_11, %c0_12] : memref<32x32xbf16, #tpu.memory_space<vmem>>, vector<32x32xbf16>
    tpu.vector_store %arg5[%c0_11, %c0_12], %13 {strides = array<i32>} : memref<32x32xbf16, #tpu.memory_space<vmem>>, vector<32x32xbf16>,
    %c64 = arith.constant 64 : index
    %c0_13 = arith.constant 0 : index
    %15 = vector.load %arg2[%c64, %c0_13] : memref<96x32xbf16, #tpu.memory_space<vmem>>, vector<32x32xbf16>
    %cst_14 = arith.constant dense<0.000000e+00> : vector<32x32xf32>
    %16 = tpu.matmul %0, %15, %cst_14 {dimension_numbers = #tpu.dot_dimension_numbers<[1], [1], [0], [0], [0, 0, 1, 0], [], []>} : vector<32x32xbf16>, vector<32x32xbf16>, vector<32x32xf32> -> vector<32x32xf32>
    %c0_15 = arith.constant 0 : index
    %c64_16 = arith.constant 64 : index
    %17 = vector.load %arg3[%c0_15, %c64_16] : memref<1x96xf32, #tpu.memory_space<vmem>>, vector<1x32xf32>
    %18 = vector.broadcast %17 : vector<1x32xf32> to vector<32x32xf32>
    %19 = arith.addf %16, %18 : vector<32x32xf32>
    %20 = arith.truncf %19 : vector<32x32xf32> to vector<32x32xbf16>
    %c0_17 = arith.constant 0 : index
    %c0_18 = arith.constant 0 : index
    %21 = vector.load %arg6[%c0_17, %c0_18] : memref<32x32xbf16, #tpu.memory_space<vmem>>, vector<32x32xbf16>
    tpu.vector_store %arg6[%c0_17, %c0_18], %20 {strides = array<i32>} : memref<32x32xbf16, #tpu.memory_space<vmem>>, vector<32x32xbf16>,
    return
  }
  func.func @transform_0(%arg0: i32) -> (i32, i32) {
    %c0_i32 = arith.constant 0 : i32
    %c0_i32_0 = arith.constant 0 : i32
    return %arg0, %c0_i32 : i32, i32
  }
  func.func @transform_1(%arg0: i32) -> (i32, i32) {
    %c0_i32 = arith.constant 0 : i32
    %c0_i32_0 = arith.constant 0 : i32
    %c0_i32_1 = arith.constant 0 : i32
    return %c0_i32, %c0_i32_0 : i32, i32
  }
  func.func @transform_2(%arg0: i32) -> (i32, i32) {
    %c0_i32 = arith.constant 0 : i32
    %c0_i32_0 = arith.constant 0 : i32
    %c0_i32_1 = arith.constant 0 : i32
    return %c0_i32, %c0_i32_0 : i32, i32
  }
  func.func @transform_3(%arg0: i32) -> (i32, i32) {
    %c0_i32 = arith.constant 0 : i32
    %c0_i32_0 = arith.constant 0 : i32
    return %arg0, %c0_i32 : i32, i32
  }
  func.func @transform_4(%arg0: i32) -> (i32, i32) {
    %c0_i32 = arith.constant 0 : i32
    %c0_i32_0 = arith.constant 0 : i32
    return %arg0, %c0_i32 : i32, i32
  }
  func.func @transform_5(%arg0: i32) -> (i32, i32) {
    %c0_i32 = arith.constant 0 : i32
    %c0_i32_0 = arith.constant 0 : i32
    return %arg0, %c0_i32 : i32, i32
  }
}

module attributes {stable_mosaic.version = 11 : i64} {
  func.func @_attn_block_kernel(%arg0: i32, %arg1: memref<1x16x32xbf16, #tpu.memory_space<vmem>>, %arg2: memref<1x16x32xbf16, #tpu.memory_space<vmem>>, %arg3: memref<1x16x32xbf16, #tpu.memory_space<vmem>>, %arg4: memref<1x16x32xbf16, #tpu.memory_space<vmem>>, %arg5: memref<32x32xbf16, #tpu.memory_space<vmem>>, %arg6: memref<1x32xf32, #tpu.memory_space<vmem>>, %arg7: memref<1x32xf32, #tpu.memory_space<vmem>>, %arg8: memref<1x32xf32, #tpu.memory_space<vmem>>, %arg9: memref<1x16x32xbf16, #tpu.memory_space<vmem>>) attributes {dimension_semantics = [#tpu.dimension_semantics<parallel>], iteration_bounds = array<i64: 2>, scalar_prefetch = 0 : i64, scratch_operands = 0 : i64, tpu.core_type = #tpu.core_type<tc>, window_params = [{transform_indices = @transform_0, window_bounds = array<i64: 1, 16, 32>}, {transform_indices = @transform_1, window_bounds = array<i64: 1, 16, 32>}, {transform_indices = @transform_2, window_bounds = array<i64: 1, 16, 32>}, {transform_indices = @transform_3, window_bounds = array<i64: 1, 16, 32>}, {pipeline_mode = #tpu.pipeline_mode<synchronous>, transform_indices = @transform_4, window_bounds = array<i64: 32, 32>}, {pipeline_mode = #tpu.pipeline_mode<synchronous>, transform_indices = @transform_5, window_bounds = array<i64: 1, 32>}, {pipeline_mode = #tpu.pipeline_mode<synchronous>, transform_indices = @transform_6, window_bounds = array<i64: 1, 32>}, {pipeline_mode = #tpu.pipeline_mode<synchronous>, transform_indices = @transform_7, window_bounds = array<i64: 1, 32>}, {transform_indices = @transform_8, window_bounds = array<i64: 1, 16, 32>}]} {
    %c0 = arith.constant 0 : index
    %c0_0 = arith.constant 0 : index
    %c0_1 = arith.constant 0 : index
    %0 = vector.load %arg1[%c0, %c0_0, %c0_1] : memref<1x16x32xbf16, #tpu.memory_space<vmem>>, vector<1x16x32xbf16>
    %1 = vector.shape_cast %0 : vector<1x16x32xbf16> to vector<16x32xbf16>
    %c0_2 = arith.constant 0 : index
    %c0_3 = arith.constant 0 : index
    %c0_4 = arith.constant 0 : index
    %2 = vector.load %arg2[%c0_2, %c0_3, %c0_4] : memref<1x16x32xbf16, #tpu.memory_space<vmem>>, vector<1x16x32xbf16>
    %3 = vector.shape_cast %2 : vector<1x16x32xbf16> to vector<16x32xbf16>
    %c0_5 = arith.constant 0 : index
    %c0_6 = arith.constant 0 : index
    %c0_7 = arith.constant 0 : index
    %4 = vector.load %arg3[%c0_5, %c0_6, %c0_7] : memref<1x16x32xbf16, #tpu.memory_space<vmem>>, vector<1x16x32xbf16>
    %5 = vector.shape_cast %4 : vector<1x16x32xbf16> to vector<16x32xbf16>
    %cst = arith.constant 0.000000e+00 : f32
    %6 = vector.broadcast %cst : f32 to vector<16x32xf32>
    %7 = vector.extract_strided_slice %1 {offsets = [0, 0], sizes = [16, 8], strides = [1, 1]} : vector<16x32xbf16> to vector<16x8xbf16>
    %8 = vector.extract_strided_slice %3 {offsets = [0, 0], sizes = [16, 8], strides = [1, 1]} : vector<16x32xbf16> to vector<16x8xbf16>
    %9 = vector.extract_strided_slice %5 {offsets = [0, 0], sizes = [16, 8], strides = [1, 1]} : vector<16x32xbf16> to vector<16x8xbf16>
    %cst_8 = arith.constant dense<0.000000e+00> : vector<16x16xf32>
    %10 = tpu.matmul %7, %8, %cst_8 {dimension_numbers = #tpu.dot_dimension_numbers<[1], [1], [0], [0], [0, 0, 1, 0], [], []>} : vector<16x8xbf16>, vector<16x8xbf16>, vector<16x16xf32> -> vector<16x16xf32>
    %cst_9 = arith.constant 0.353553385 : f32
    %11 = vector.broadcast %cst_9 : f32 to vector<16x16xf32>
    %12 = arith.mulf %10, %11 : vector<16x16xf32>
    %cst_10 = arith.constant dense<0xFF800000> : vector<16xf32>
    %13 = vector.multi_reduction <maximumf>, %12, %cst_10 [1] : vector<16x16xf32> to vector<16xf32>
    %14 = vector.shape_cast %13 : vector<16xf32> to vector<16x1xf32>
    %15 = vector.broadcast %14 : vector<16x1xf32> to vector<16x16xf32>
    %16 = arith.subf %12, %15 : vector<16x16xf32>
    %17 = math.exp %16 : vector<16x16xf32>
    %cst_11 = arith.constant dense<0.000000e+00> : vector<16xf32>
    %18 = vector.multi_reduction <add>, %17, %cst_11 [1] : vector<16x16xf32> to vector<16xf32>
    %19 = vector.shape_cast %18 : vector<16xf32> to vector<16x1xf32>
    %20 = tpu.reciprocal %19 {approx = true} : vector<16x1xf32> -> vector<16x1xf32>
    %21 = vector.broadcast %20 : vector<16x1xf32> to vector<16x16xf32>
    %22 = arith.mulf %17, %21 : vector<16x16xf32>
    %23 = arith.truncf %22 : vector<16x16xf32> to vector<16x16xbf16>
    %cst_12 = arith.constant dense<0.000000e+00> : vector<16x8xf32>
    %24 = tpu.matmul %23, %9, %cst_12 {dimension_numbers = #tpu.dot_dimension_numbers<[1], [0], [0], [1], [0, 0, 1, 1], [], []>} : vector<16x16xbf16>, vector<16x8xbf16>, vector<16x8xf32> -> vector<16x8xf32>
    %c0_13 = arith.constant 0 : index
    %c0_14 = arith.constant 0 : index
    %25 = vector.load %arg5[%c0_13, %c0_14] : memref<32x32xbf16, #tpu.memory_space<vmem>>, vector<32x8xbf16>
    %26 = arith.truncf %24 : vector<16x8xf32> to vector<16x8xbf16>
    %cst_15 = arith.constant dense<0.000000e+00> : vector<16x32xf32>
    %27 = tpu.matmul %26, %25, %cst_15 {dimension_numbers = #tpu.dot_dimension_numbers<[1], [1], [0], [0], [0, 0, 1, 0], [], []>} : vector<16x8xbf16>, vector<32x8xbf16>, vector<16x32xf32> -> vector<16x32xf32>
    %28 = arith.addf %6, %27 : vector<16x32xf32>
    %29 = vector.extract_strided_slice %1 {offsets = [0, 8], sizes = [16, 8], strides = [1, 1]} : vector<16x32xbf16> to vector<16x8xbf16>
    %30 = vector.extract_strided_slice %3 {offsets = [0, 8], sizes = [16, 8], strides = [1, 1]} : vector<16x32xbf16> to vector<16x8xbf16>
    %31 = vector.extract_strided_slice %5 {offsets = [0, 8], sizes = [16, 8], strides = [1, 1]} : vector<16x32xbf16> to vector<16x8xbf16>
    %cst_16 = arith.constant dense<0.000000e+00> : vector<16x16xf32>
    %32 = tpu.matmul %29, %30, %cst_16 {dimension_numbers = #tpu.dot_dimension_numbers<[1], [1], [0], [0], [0, 0, 1, 0], [], []>} : vector<16x8xbf16>, vector<16x8xbf16>, vector<16x16xf32> -> vector<16x16xf32>
    %cst_17 = arith.constant 0.353553385 : f32
    %33 = vector.broadcast %cst_17 : f32 to vector<16x16xf32>
    %34 = arith.mulf %32, %33 : vector<16x16xf32>
    %cst_18 = arith.constant dense<0xFF800000> : vector<16xf32>
    %35 = vector.multi_reduction <maximumf>, %34, %cst_18 [1] : vector<16x16xf32> to vector<16xf32>
    %36 = vector.shape_cast %35 : vector<16xf32> to vector<16x1xf32>
    %37 = vector.broadcast %36 : vector<16x1xf32> to vector<16x16xf32>
    %38 = arith.subf %34, %37 : vector<16x16xf32>
    %39 = math.exp %38 : vector<16x16xf32>
    %cst_19 = arith.constant dense<0.000000e+00> : vector<16xf32>
    %40 = vector.multi_reduction <add>, %39, %cst_19 [1] : vector<16x16xf32> to vector<16xf32>
    %41 = vector.shape_cast %40 : vector<16xf32> to vector<16x1xf32>
    %42 = tpu.reciprocal %41 {approx = true} : vector<16x1xf32> -> vector<16x1xf32>
    %43 = vector.broadcast %42 : vector<16x1xf32> to vector<16x16xf32>
    %44 = arith.mulf %39, %43 : vector<16x16xf32>
    %45 = arith.truncf %44 : vector<16x16xf32> to vector<16x16xbf16>
    %cst_20 = arith.constant dense<0.000000e+00> : vector<16x8xf32>
    %46 = tpu.matmul %45, %31, %cst_20 {dimension_numbers = #tpu.dot_dimension_numbers<[1], [0], [0], [1], [0, 0, 1, 1], [], []>} : vector<16x16xbf16>, vector<16x8xbf16>, vector<16x8xf32> -> vector<16x8xf32>
    %c0_21 = arith.constant 0 : index
    %c8 = arith.constant 8 : index
    %47 = vector.load %arg5[%c0_21, %c8] : memref<32x32xbf16, #tpu.memory_space<vmem>>, vector<32x8xbf16>
    %48 = arith.truncf %46 : vector<16x8xf32> to vector<16x8xbf16>
    %cst_22 = arith.constant dense<0.000000e+00> : vector<16x32xf32>
    %49 = tpu.matmul %48, %47, %cst_22 {dimension_numbers = #tpu.dot_dimension_numbers<[1], [1], [0], [0], [0, 0, 1, 0], [], []>} : vector<16x8xbf16>, vector<32x8xbf16>, vector<16x32xf32> -> vector<16x32xf32>
    %50 = arith.addf %28, %49 : vector<16x32xf32>
    %51 = vector.extract_strided_slice %1 {offsets = [0, 16], sizes = [16, 8], strides = [1, 1]} : vector<16x32xbf16> to vector<16x8xbf16>
    %52 = vector.extract_strided_slice %3 {offsets = [0, 16], sizes = [16, 8], strides = [1, 1]} : vector<16x32xbf16> to vector<16x8xbf16>
    %53 = vector.extract_strided_slice %5 {offsets = [0, 16], sizes = [16, 8], strides = [1, 1]} : vector<16x32xbf16> to vector<16x8xbf16>
    %cst_23 = arith.constant dense<0.000000e+00> : vector<16x16xf32>
    %54 = tpu.matmul %51, %52, %cst_23 {dimension_numbers = #tpu.dot_dimension_numbers<[1], [1], [0], [0], [0, 0, 1, 0], [], []>} : vector<16x8xbf16>, vector<16x8xbf16>, vector<16x16xf32> -> vector<16x16xf32>
    %cst_24 = arith.constant 0.353553385 : f32
    %55 = vector.broadcast %cst_24 : f32 to vector<16x16xf32>
    %56 = arith.mulf %54, %55 : vector<16x16xf32>
    %cst_25 = arith.constant dense<0xFF800000> : vector<16xf32>
    %57 = vector.multi_reduction <maximumf>, %56, %cst_25 [1] : vector<16x16xf32> to vector<16xf32>
    %58 = vector.shape_cast %57 : vector<16xf32> to vector<16x1xf32>
    %59 = vector.broadcast %58 : vector<16x1xf32> to vector<16x16xf32>
    %60 = arith.subf %56, %59 : vector<16x16xf32>
    %61 = math.exp %60 : vector<16x16xf32>
    %cst_26 = arith.constant dense<0.000000e+00> : vector<16xf32>
    %62 = vector.multi_reduction <add>, %61, %cst_26 [1] : vector<16x16xf32> to vector<16xf32>
    %63 = vector.shape_cast %62 : vector<16xf32> to vector<16x1xf32>
    %64 = tpu.reciprocal %63 {approx = true} : vector<16x1xf32> -> vector<16x1xf32>
    %65 = vector.broadcast %64 : vector<16x1xf32> to vector<16x16xf32>
    %66 = arith.mulf %61, %65 : vector<16x16xf32>
    %67 = arith.truncf %66 : vector<16x16xf32> to vector<16x16xbf16>
    %cst_27 = arith.constant dense<0.000000e+00> : vector<16x8xf32>
    %68 = tpu.matmul %67, %53, %cst_27 {dimension_numbers = #tpu.dot_dimension_numbers<[1], [0], [0], [1], [0, 0, 1, 1], [], []>} : vector<16x16xbf16>, vector<16x8xbf16>, vector<16x8xf32> -> vector<16x8xf32>
    %c0_28 = arith.constant 0 : index
    %c16 = arith.constant 16 : index
    %69 = vector.load %arg5[%c0_28, %c16] : memref<32x32xbf16, #tpu.memory_space<vmem>>, vector<32x8xbf16>
    %70 = arith.truncf %68 : vector<16x8xf32> to vector<16x8xbf16>
    %cst_29 = arith.constant dense<0.000000e+00> : vector<16x32xf32>
    %71 = tpu.matmul %70, %69, %cst_29 {dimension_numbers = #tpu.dot_dimension_numbers<[1], [1], [0], [0], [0, 0, 1, 0], [], []>} : vector<16x8xbf16>, vector<32x8xbf16>, vector<16x32xf32> -> vector<16x32xf32>
    %72 = arith.addf %50, %71 : vector<16x32xf32>
    %73 = vector.extract_strided_slice %1 {offsets = [0, 24], sizes = [16, 8], strides = [1, 1]} : vector<16x32xbf16> to vector<16x8xbf16>
    %74 = vector.extract_strided_slice %3 {offsets = [0, 24], sizes = [16, 8], strides = [1, 1]} : vector<16x32xbf16> to vector<16x8xbf16>
    %75 = vector.extract_strided_slice %5 {offsets = [0, 24], sizes = [16, 8], strides = [1, 1]} : vector<16x32xbf16> to vector<16x8xbf16>
    %cst_30 = arith.constant dense<0.000000e+00> : vector<16x16xf32>
    %76 = tpu.matmul %73, %74, %cst_30 {dimension_numbers = #tpu.dot_dimension_numbers<[1], [1], [0], [0], [0, 0, 1, 0], [], []>} : vector<16x8xbf16>, vector<16x8xbf16>, vector<16x16xf32> -> vector<16x16xf32>
    %cst_31 = arith.constant 0.353553385 : f32
    %77 = vector.broadcast %cst_31 : f32 to vector<16x16xf32>
    %78 = arith.mulf %76, %77 : vector<16x16xf32>
    %cst_32 = arith.constant dense<0xFF800000> : vector<16xf32>
    %79 = vector.multi_reduction <maximumf>, %78, %cst_32 [1] : vector<16x16xf32> to vector<16xf32>
    %80 = vector.shape_cast %79 : vector<16xf32> to vector<16x1xf32>
    %81 = vector.broadcast %80 : vector<16x1xf32> to vector<16x16xf32>
    %82 = arith.subf %78, %81 : vector<16x16xf32>
    %83 = math.exp %82 : vector<16x16xf32>
    %cst_33 = arith.constant dense<0.000000e+00> : vector<16xf32>
    %84 = vector.multi_reduction <add>, %83, %cst_33 [1] : vector<16x16xf32> to vector<16xf32>
    %85 = vector.shape_cast %84 : vector<16xf32> to vector<16x1xf32>
    %86 = tpu.reciprocal %85 {approx = true} : vector<16x1xf32> -> vector<16x1xf32>
    %87 = vector.broadcast %86 : vector<16x1xf32> to vector<16x16xf32>
    %88 = arith.mulf %83, %87 : vector<16x16xf32>
    %89 = arith.truncf %88 : vector<16x16xf32> to vector<16x16xbf16>
    %cst_34 = arith.constant dense<0.000000e+00> : vector<16x8xf32>
    %90 = tpu.matmul %89, %75, %cst_34 {dimension_numbers = #tpu.dot_dimension_numbers<[1], [0], [0], [1], [0, 0, 1, 1], [], []>} : vector<16x16xbf16>, vector<16x8xbf16>, vector<16x8xf32> -> vector<16x8xf32>
    %c0_35 = arith.constant 0 : index
    %c24 = arith.constant 24 : index
    %91 = vector.load %arg5[%c0_35, %c24] : memref<32x32xbf16, #tpu.memory_space<vmem>>, vector<32x8xbf16>
    %92 = arith.truncf %90 : vector<16x8xf32> to vector<16x8xbf16>
    %cst_36 = arith.constant dense<0.000000e+00> : vector<16x32xf32>
    %93 = tpu.matmul %92, %91, %cst_36 {dimension_numbers = #tpu.dot_dimension_numbers<[1], [1], [0], [0], [0, 0, 1, 0], [], []>} : vector<16x8xbf16>, vector<32x8xbf16>, vector<16x32xf32> -> vector<16x32xf32>
    %94 = arith.addf %72, %93 : vector<16x32xf32>
    %c0_37 = arith.constant 0 : index
    %c0_38 = arith.constant 0 : index
    %95 = vector.load %arg6[%c0_37, %c0_38] : memref<1x32xf32, #tpu.memory_space<vmem>>, vector<1x32xf32>
    %96 = vector.broadcast %95 : vector<1x32xf32> to vector<16x32xf32>
    %97 = arith.addf %94, %96 : vector<16x32xf32>
    %c0_39 = arith.constant 0 : index
    %c0_40 = arith.constant 0 : index
    %c0_41 = arith.constant 0 : index
    %98 = vector.load %arg4[%c0_39, %c0_40, %c0_41] : memref<1x16x32xbf16, #tpu.memory_space<vmem>>, vector<1x16x32xbf16>
    %99 = vector.shape_cast %98 : vector<1x16x32xbf16> to vector<16x32xbf16>
    %100 = arith.extf %99 : vector<16x32xbf16> to vector<16x32xf32>
    %101 = arith.addf %97, %100 : vector<16x32xf32>
    %cst_42 = arith.constant dense<0.000000e+00> : vector<16xf32>
    %102 = vector.multi_reduction <add>, %101, %cst_42 [1] : vector<16x32xf32> to vector<16xf32>
    %103 = vector.shape_cast %102 : vector<16xf32> to vector<16x1xf32>
    %cst_43 = arith.constant 3.200000e+01 : f32
    %104 = vector.broadcast %cst_43 : f32 to vector<16x1xf32>
    %105 = arith.divf %103, %104 : vector<16x1xf32>
    %106 = vector.broadcast %105 : vector<16x1xf32> to vector<16x32xf32>
    %107 = arith.subf %101, %106 : vector<16x32xf32>
    %108 = arith.mulf %107, %107 : vector<16x32xf32>
    %cst_44 = arith.constant dense<0.000000e+00> : vector<16xf32>
    %109 = vector.multi_reduction <add>, %108, %cst_44 [1] : vector<16x32xf32> to vector<16xf32>
    %110 = vector.shape_cast %109 : vector<16xf32> to vector<16x1xf32>
    %cst_45 = arith.constant 3.200000e+01 : f32
    %111 = vector.broadcast %cst_45 : f32 to vector<16x1xf32>
    %112 = arith.divf %110, %111 : vector<16x1xf32>
    %cst_46 = arith.constant 9.99999974E-6 : f32
    %113 = vector.broadcast %cst_46 : f32 to vector<16x1xf32>
    %114 = arith.addf %112, %113 : vector<16x1xf32>
    %115 = math.rsqrt %114 : vector<16x1xf32>
    %116 = vector.broadcast %115 : vector<16x1xf32> to vector<16x32xf32>
    %117 = arith.mulf %107, %116 : vector<16x32xf32>
    %c0_47 = arith.constant 0 : index
    %c0_48 = arith.constant 0 : index
    %118 = vector.load %arg7[%c0_47, %c0_48] : memref<1x32xf32, #tpu.memory_space<vmem>>, vector<1x32xf32>
    %119 = vector.broadcast %118 : vector<1x32xf32> to vector<16x32xf32>
    %120 = arith.mulf %117, %119 : vector<16x32xf32>
    %c0_49 = arith.constant 0 : index
    %c0_50 = arith.constant 0 : index
    %121 = vector.load %arg8[%c0_49, %c0_50] : memref<1x32xf32, #tpu.memory_space<vmem>>, vector<1x32xf32>
    %122 = vector.broadcast %121 : vector<1x32xf32> to vector<16x32xf32>
    %123 = arith.addf %120, %122 : vector<16x32xf32>
    %124 = arith.truncf %123 : vector<16x32xf32> to vector<16x32xbf16>
    %c0_51 = arith.constant 0 : index
    %c0_52 = arith.constant 0 : index
    %c0_53 = arith.constant 0 : index
    %125 = vector.load %arg9[%c0_51, %c0_52, %c0_53] : memref<1x16x32xbf16, #tpu.memory_space<vmem>>, vector<1x16x32xbf16>
    %126 = vector.shape_cast %125 : vector<1x16x32xbf16> to vector<16x32xbf16>
    %127 = vector.shape_cast %124 : vector<16x32xbf16> to vector<1x16x32xbf16>
    tpu.vector_store %arg9[%c0_51, %c0_52, %c0_53], %127 {strides = array<i32>} : memref<1x16x32xbf16, #tpu.memory_space<vmem>>, vector<1x16x32xbf16>,
    return
  }
  func.func @transform_0(%arg0: i32) -> (i32, i32, i32) {
    %c0_i32 = arith.constant 0 : i32
    %c0_i32_0 = arith.constant 0 : i32
    %c0_i32_1 = arith.constant 0 : i32
    return %arg0, %c0_i32, %c0_i32_0 : i32, i32, i32
  }
  func.func @transform_1(%arg0: i32) -> (i32, i32, i32) {
    %c0_i32 = arith.constant 0 : i32
    %c0_i32_0 = arith.constant 0 : i32
    %c0_i32_1 = arith.constant 0 : i32
    return %arg0, %c0_i32, %c0_i32_0 : i32, i32, i32
  }
  func.func @transform_2(%arg0: i32) -> (i32, i32, i32) {
    %c0_i32 = arith.constant 0 : i32
    %c0_i32_0 = arith.constant 0 : i32
    %c0_i32_1 = arith.constant 0 : i32
    return %arg0, %c0_i32, %c0_i32_0 : i32, i32, i32
  }
  func.func @transform_3(%arg0: i32) -> (i32, i32, i32) {
    %c0_i32 = arith.constant 0 : i32
    %c0_i32_0 = arith.constant 0 : i32
    %c0_i32_1 = arith.constant 0 : i32
    return %arg0, %c0_i32, %c0_i32_0 : i32, i32, i32
  }
  func.func @transform_4(%arg0: i32) -> (i32, i32) {
    %c0_i32 = arith.constant 0 : i32
    %c0_i32_0 = arith.constant 0 : i32
    %c0_i32_1 = arith.constant 0 : i32
    return %c0_i32, %c0_i32_0 : i32, i32
  }
  func.func @transform_5(%arg0: i32) -> (i32, i32) {
    %c0_i32 = arith.constant 0 : i32
    %c0_i32_0 = arith.constant 0 : i32
    %c0_i32_1 = arith.constant 0 : i32
    return %c0_i32, %c0_i32_0 : i32, i32
  }
  func.func @transform_6(%arg0: i32) -> (i32, i32) {
    %c0_i32 = arith.constant 0 : i32
    %c0_i32_0 = arith.constant 0 : i32
    %c0_i32_1 = arith.constant 0 : i32
    return %c0_i32, %c0_i32_0 : i32, i32
  }
  func.func @transform_7(%arg0: i32) -> (i32, i32) {
    %c0_i32 = arith.constant 0 : i32
    %c0_i32_0 = arith.constant 0 : i32
    %c0_i32_1 = arith.constant 0 : i32
    return %c0_i32, %c0_i32_0 : i32, i32
  }
  func.func @transform_8(%arg0: i32) -> (i32, i32, i32) {
    %c0_i32 = arith.constant 0 : i32
    %c0_i32_0 = arith.constant 0 : i32
    %c0_i32_1 = arith.constant 0 : i32
    return %arg0, %c0_i32, %c0_i32_0 : i32, i32, i32
  }
}

module attributes {stable_mosaic.version = 11 : i64} {
  func.func @_ffn_kernel(%arg0: i32, %arg1: memref<32x32xbf16, #tpu.memory_space<vmem>>, %arg2: memref<64x32xbf16, #tpu.memory_space<vmem>>, %arg3: memref<1x64xf32, #tpu.memory_space<vmem>>, %arg4: memref<32x64xbf16, #tpu.memory_space<vmem>>, %arg5: memref<1x32xf32, #tpu.memory_space<vmem>>, %arg6: memref<1x32xf32, #tpu.memory_space<vmem>>, %arg7: memref<1x32xf32, #tpu.memory_space<vmem>>, %arg8: memref<32x32xbf16, #tpu.memory_space<vmem>>) attributes {dimension_semantics = [#tpu.dimension_semantics<parallel>], iteration_bounds = array<i64: 1>, scalar_prefetch = 0 : i64, scratch_operands = 0 : i64, tpu.core_type = #tpu.core_type<tc>, window_params = [{transform_indices = @transform_0, window_bounds = array<i64: 32, 32>}, {pipeline_mode = #tpu.pipeline_mode<synchronous>, transform_indices = @transform_1, window_bounds = array<i64: 64, 32>}, {pipeline_mode = #tpu.pipeline_mode<synchronous>, transform_indices = @transform_2, window_bounds = array<i64: 1, 64>}, {pipeline_mode = #tpu.pipeline_mode<synchronous>, transform_indices = @transform_3, window_bounds = array<i64: 32, 64>}, {pipeline_mode = #tpu.pipeline_mode<synchronous>, transform_indices = @transform_4, window_bounds = array<i64: 1, 32>}, {pipeline_mode = #tpu.pipeline_mode<synchronous>, transform_indices = @transform_5, window_bounds = array<i64: 1, 32>}, {pipeline_mode = #tpu.pipeline_mode<synchronous>, transform_indices = @transform_6, window_bounds = array<i64: 1, 32>}, {transform_indices = @transform_7, window_bounds = array<i64: 32, 32>}]} {
    %c0 = arith.constant 0 : index
    %c0_0 = arith.constant 0 : index
    %0 = vector.load %arg1[%c0, %c0_0] : memref<32x32xbf16, #tpu.memory_space<vmem>>, vector<32x32xbf16>
    %c0_1 = arith.constant 0 : index
    %c0_2 = arith.constant 0 : index
    %1 = vector.load %arg2[%c0_1, %c0_2] : memref<64x32xbf16, #tpu.memory_space<vmem>>, vector<64x32xbf16>
    %cst = arith.constant dense<0.000000e+00> : vector<32x64xf32>
    %2 = tpu.matmul %0, %1, %cst {dimension_numbers = #tpu.dot_dimension_numbers<[1], [1], [0], [0], [0, 0, 1, 0], [], []>} : vector<32x32xbf16>, vector<64x32xbf16>, vector<32x64xf32> -> vector<32x64xf32>
    %c0_3 = arith.constant 0 : index
    %c0_4 = arith.constant 0 : index
    %3 = vector.load %arg3[%c0_3, %c0_4] : memref<1x64xf32, #tpu.memory_space<vmem>>, vector<1x64xf32>
    %4 = vector.broadcast %3 : vector<1x64xf32> to vector<32x64xf32>
    %5 = arith.addf %2, %4 : vector<32x64xf32>
    %cst_5 = arith.constant 0.000000e+00 : f32
    %6 = vector.broadcast %cst_5 : f32 to vector<32x64xf32>
    %7 = arith.maximumf %5, %6 : vector<32x64xf32>
    %8 = arith.truncf %7 : vector<32x64xf32> to vector<32x64xbf16>
    %c0_6 = arith.constant 0 : index
    %c0_7 = arith.constant 0 : index
    %9 = vector.load %arg4[%c0_6, %c0_7] : memref<32x64xbf16, #tpu.memory_space<vmem>>, vector<32x64xbf16>
    %cst_8 = arith.constant dense<0.000000e+00> : vector<32x32xf32>
    %10 = tpu.matmul %8, %9, %cst_8 {dimension_numbers = #tpu.dot_dimension_numbers<[1], [1], [0], [0], [0, 0, 1, 0], [], []>} : vector<32x64xbf16>, vector<32x64xbf16>, vector<32x32xf32> -> vector<32x32xf32>
    %c0_9 = arith.constant 0 : index
    %c0_10 = arith.constant 0 : index
    %11 = vector.load %arg5[%c0_9, %c0_10] : memref<1x32xf32, #tpu.memory_space<vmem>>, vector<1x32xf32>
    %12 = vector.broadcast %11 : vector<1x32xf32> to vector<32x32xf32>
    %13 = arith.addf %10, %12 : vector<32x32xf32>
    %14 = arith.extf %0 : vector<32x32xbf16> to vector<32x32xf32>
    %15 = arith.addf %13, %14 : vector<32x32xf32>
    %cst_11 = arith.constant dense<0.000000e+00> : vector<32xf32>
    %16 = vector.multi_reduction <add>, %15, %cst_11 [1] : vector<32x32xf32> to vector<32xf32>
    %17 = vector.shape_cast %16 : vector<32xf32> to vector<32x1xf32>
    %cst_12 = arith.constant 3.200000e+01 : f32
    %18 = vector.broadcast %cst_12 : f32 to vector<32x1xf32>
    %19 = arith.divf %17, %18 : vector<32x1xf32>
    %20 = vector.broadcast %19 : vector<32x1xf32> to vector<32x32xf32>
    %21 = arith.subf %15, %20 : vector<32x32xf32>
    %22 = arith.mulf %21, %21 : vector<32x32xf32>
    %cst_13 = arith.constant dense<0.000000e+00> : vector<32xf32>
    %23 = vector.multi_reduction <add>, %22, %cst_13 [1] : vector<32x32xf32> to vector<32xf32>
    %24 = vector.shape_cast %23 : vector<32xf32> to vector<32x1xf32>
    %cst_14 = arith.constant 3.200000e+01 : f32
    %25 = vector.broadcast %cst_14 : f32 to vector<32x1xf32>
    %26 = arith.divf %24, %25 : vector<32x1xf32>
    %cst_15 = arith.constant 9.99999974E-6 : f32
    %27 = vector.broadcast %cst_15 : f32 to vector<32x1xf32>
    %28 = arith.addf %26, %27 : vector<32x1xf32>
    %29 = math.rsqrt %28 : vector<32x1xf32>
    %30 = vector.broadcast %29 : vector<32x1xf32> to vector<32x32xf32>
    %31 = arith.mulf %21, %30 : vector<32x32xf32>
    %c0_16 = arith.constant 0 : index
    %c0_17 = arith.constant 0 : index
    %32 = vector.load %arg6[%c0_16, %c0_17] : memref<1x32xf32, #tpu.memory_space<vmem>>, vector<1x32xf32>
    %33 = vector.broadcast %32 : vector<1x32xf32> to vector<32x32xf32>
    %34 = arith.mulf %31, %33 : vector<32x32xf32>
    %c0_18 = arith.constant 0 : index
    %c0_19 = arith.constant 0 : index
    %35 = vector.load %arg7[%c0_18, %c0_19] : memref<1x32xf32, #tpu.memory_space<vmem>>, vector<1x32xf32>
    %36 = vector.broadcast %35 : vector<1x32xf32> to vector<32x32xf32>
    %37 = arith.addf %34, %36 : vector<32x32xf32>
    %38 = arith.truncf %37 : vector<32x32xf32> to vector<32x32xbf16>
    %c0_20 = arith.constant 0 : index
    %c0_21 = arith.constant 0 : index
    %39 = vector.load %arg8[%c0_20, %c0_21] : memref<32x32xbf16, #tpu.memory_space<vmem>>, vector<32x32xbf16>
    tpu.vector_store %arg8[%c0_20, %c0_21], %38 {strides = array<i32>} : memref<32x32xbf16, #tpu.memory_space<vmem>>, vector<32x32xbf16>,
    return
  }
  func.func @transform_0(%arg0: i32) -> (i32, i32) {
    %c0_i32 = arith.constant 0 : i32
    %c0_i32_0 = arith.constant 0 : i32
    return %arg0, %c0_i32 : i32, i32
  }
  func.func @transform_1(%arg0: i32) -> (i32, i32) {
    %c0_i32 = arith.constant 0 : i32
    %c0_i32_0 = arith.constant 0 : i32
    %c0_i32_1 = arith.constant 0 : i32
    return %c0_i32, %c0_i32_0 : i32, i32
  }
  func.func @transform_2(%arg0: i32) -> (i32, i32) {
    %c0_i32 = arith.constant 0 : i32
    %c0_i32_0 = arith.constant 0 : i32
    %c0_i32_1 = arith.constant 0 : i32
    return %c0_i32, %c0_i32_0 : i32, i32
  }
  func.func @transform_3(%arg0: i32) -> (i32, i32) {
    %c0_i32 = arith.constant 0 : i32
    %c0_i32_0 = arith.constant 0 : i32
    %c0_i32_1 = arith.constant 0 : i32
    return %c0_i32, %c0_i32_0 : i32, i32
  }
  func.func @transform_4(%arg0: i32) -> (i32, i32) {
    %c0_i32 = arith.constant 0 : i32
    %c0_i32_0 = arith.constant 0 : i32
    %c0_i32_1 = arith.constant 0 : i32
    return %c0_i32, %c0_i32_0 : i32, i32
  }
  func.func @transform_5(%arg0: i32) -> (i32, i32) {
    %c0_i32 = arith.constant 0 : i32
    %c0_i32_0 = arith.constant 0 : i32
    %c0_i32_1 = arith.constant 0 : i32
    return %c0_i32, %c0_i32_0 : i32, i32
  }
  func.func @transform_6(%arg0: i32) -> (i32, i32) {
    %c0_i32 = arith.constant 0 : i32
    %c0_i32_0 = arith.constant 0 : i32
    %c0_i32_1 = arith.constant 0 : i32
    return %c0_i32, %c0_i32_0 : i32, i32
  }
  func.func @transform_7(%arg0: i32) -> (i32, i32) {
    %c0_i32 = arith.constant 0 : i32
    %c0_i32_0 = arith.constant 0 : i32
    return %arg0, %c0_i32 : i32, i32
  }
}

module attributes {stable_mosaic.version = 11 : i64} {
  func.func @_ln_kernel(%arg0: i32, %arg1: memref<32x32xbf16, #tpu.memory_space<vmem>>, %arg2: memref<1x32xf32, #tpu.memory_space<vmem>>, %arg3: memref<1x32xf32, #tpu.memory_space<vmem>>, %arg4: memref<32x32xbf16, #tpu.memory_space<vmem>>) attributes {dimension_semantics = [#tpu.dimension_semantics<parallel>], iteration_bounds = array<i64: 1>, scalar_prefetch = 0 : i64, scratch_operands = 0 : i64, tpu.core_type = #tpu.core_type<tc>, window_params = [{transform_indices = @transform_0, window_bounds = array<i64: 32, 32>}, {pipeline_mode = #tpu.pipeline_mode<synchronous>, transform_indices = @transform_1, window_bounds = array<i64: 1, 32>}, {pipeline_mode = #tpu.pipeline_mode<synchronous>, transform_indices = @transform_2, window_bounds = array<i64: 1, 32>}, {transform_indices = @transform_3, window_bounds = array<i64: 32, 32>}]} {
    %c0 = arith.constant 0 : index
    %c0_0 = arith.constant 0 : index
    %0 = vector.load %arg1[%c0, %c0_0] : memref<32x32xbf16, #tpu.memory_space<vmem>>, vector<32x32xbf16>
    %1 = arith.extf %0 : vector<32x32xbf16> to vector<32x32xf32>
    %cst = arith.constant dense<0.000000e+00> : vector<32xf32>
    %2 = vector.multi_reduction <add>, %1, %cst [1] : vector<32x32xf32> to vector<32xf32>
    %3 = vector.shape_cast %2 : vector<32xf32> to vector<32x1xf32>
    %cst_1 = arith.constant 3.200000e+01 : f32
    %4 = vector.broadcast %cst_1 : f32 to vector<32x1xf32>
    %5 = arith.divf %3, %4 : vector<32x1xf32>
    %6 = vector.broadcast %5 : vector<32x1xf32> to vector<32x32xf32>
    %7 = arith.subf %1, %6 : vector<32x32xf32>
    %8 = arith.mulf %7, %7 : vector<32x32xf32>
    %cst_2 = arith.constant dense<0.000000e+00> : vector<32xf32>
    %9 = vector.multi_reduction <add>, %8, %cst_2 [1] : vector<32x32xf32> to vector<32xf32>
    %10 = vector.shape_cast %9 : vector<32xf32> to vector<32x1xf32>
    %cst_3 = arith.constant 3.200000e+01 : f32
    %11 = vector.broadcast %cst_3 : f32 to vector<32x1xf32>
    %12 = arith.divf %10, %11 : vector<32x1xf32>
    %cst_4 = arith.constant 9.99999974E-6 : f32
    %13 = vector.broadcast %cst_4 : f32 to vector<32x1xf32>
    %14 = arith.addf %12, %13 : vector<32x1xf32>
    %15 = math.rsqrt %14 : vector<32x1xf32>
    %16 = vector.broadcast %15 : vector<32x1xf32> to vector<32x32xf32>
    %17 = arith.mulf %7, %16 : vector<32x32xf32>
    %c0_5 = arith.constant 0 : index
    %c0_6 = arith.constant 0 : index
    %18 = vector.load %arg2[%c0_5, %c0_6] : memref<1x32xf32, #tpu.memory_space<vmem>>, vector<1x32xf32>
    %19 = vector.broadcast %18 : vector<1x32xf32> to vector<32x32xf32>
    %20 = arith.mulf %17, %19 : vector<32x32xf32>
    %c0_7 = arith.constant 0 : index
    %c0_8 = arith.constant 0 : index
    %21 = vector.load %arg3[%c0_7, %c0_8] : memref<1x32xf32, #tpu.memory_space<vmem>>, vector<1x32xf32>
    %22 = vector.broadcast %21 : vector<1x32xf32> to vector<32x32xf32>
    %23 = arith.addf %20, %22 : vector<32x32xf32>
    %24 = arith.truncf %23 : vector<32x32xf32> to vector<32x32xbf16>
    %c0_9 = arith.constant 0 : index
    %c0_10 = arith.constant 0 : index
    %25 = vector.load %arg4[%c0_9, %c0_10] : memref<32x32xbf16, #tpu.memory_space<vmem>>, vector<32x32xbf16>
    tpu.vector_store %arg4[%c0_9, %c0_10], %24 {strides = array<i32>} : memref<32x32xbf16, #tpu.memory_space<vmem>>, vector<32x32xbf16>,
    return
  }
  func.func @transform_0(%arg0: i32) -> (i32, i32) {
    %c0_i32 = arith.constant 0 : i32
    %c0_i32_0 = arith.constant 0 : i32
    return %arg0, %c0_i32 : i32, i32
  }
  func.func @transform_1(%arg0: i32) -> (i32, i32) {
    %c0_i32 = arith.constant 0 : i32
    %c0_i32_0 = arith.constant 0 : i32
    %c0_i32_1 = arith.constant 0 : i32
    return %c0_i32, %c0_i32_0 : i32, i32
  }
  func.func @transform_2(%arg0: i32) -> (i32, i32) {
    %c0_i32 = arith.constant 0 : i32
    %c0_i32_0 = arith.constant 0 : i32
    %c0_i32_1 = arith.constant 0 : i32
    return %c0_i32, %c0_i32_0 : i32, i32
  }
  func.func @transform_3(%arg0: i32) -> (i32, i32) {
    %c0_i32 = arith.constant 0 : i32
    %c0_i32_0 = arith.constant 0 : i32
    return %arg0, %c0_i32 : i32, i32
  }
}

module attributes {stable_mosaic.version = 11 : i64} {
  func.func @_multi_proj_kernel(%arg0: i32, %arg1: memref<32x32xbf16, #tpu.memory_space<vmem>>, %arg2: memref<64x32xbf16, #tpu.memory_space<vmem>>, %arg3: memref<1x64xf32, #tpu.memory_space<vmem>>, %arg4: memref<32x32xbf16, #tpu.memory_space<vmem>>, %arg5: memref<32x32xbf16, #tpu.memory_space<vmem>>) attributes {dimension_semantics = [#tpu.dimension_semantics<parallel>], iteration_bounds = array<i64: 1>, scalar_prefetch = 0 : i64, scratch_operands = 0 : i64, tpu.core_type = #tpu.core_type<tc>, window_params = [{transform_indices = @transform_0, window_bounds = array<i64: 32, 32>}, {pipeline_mode = #tpu.pipeline_mode<synchronous>, transform_indices = @transform_1, window_bounds = array<i64: 64, 32>}, {pipeline_mode = #tpu.pipeline_mode<synchronous>, transform_indices = @transform_2, window_bounds = array<i64: 1, 64>}, {transform_indices = @transform_3, window_bounds = array<i64: 32, 32>}, {transform_indices = @transform_4, window_bounds = array<i64: 32, 32>}]} {
    %c0 = arith.constant 0 : index
    %c0_0 = arith.constant 0 : index
    %0 = vector.load %arg1[%c0, %c0_0] : memref<32x32xbf16, #tpu.memory_space<vmem>>, vector<32x32xbf16>
    %c0_1 = arith.constant 0 : index
    %c0_2 = arith.constant 0 : index
    %1 = vector.load %arg2[%c0_1, %c0_2] : memref<64x32xbf16, #tpu.memory_space<vmem>>, vector<32x32xbf16>
    %cst = arith.constant dense<0.000000e+00> : vector<32x32xf32>
    %2 = tpu.matmul %0, %1, %cst {dimension_numbers = #tpu.dot_dimension_numbers<[1], [1], [0], [0], [0, 0, 1, 0], [], []>} : vector<32x32xbf16>, vector<32x32xbf16>, vector<32x32xf32> -> vector<32x32xf32>
    %c0_3 = arith.constant 0 : index
    %c0_4 = arith.constant 0 : index
    %3 = vector.load %arg3[%c0_3, %c0_4] : memref<1x64xf32, #tpu.memory_space<vmem>>, vector<1x32xf32>
    %4 = vector.broadcast %3 : vector<1x32xf32> to vector<32x32xf32>
    %5 = arith.addf %2, %4 : vector<32x32xf32>
    %6 = arith.truncf %5 : vector<32x32xf32> to vector<32x32xbf16>
    %c0_5 = arith.constant 0 : index
    %c0_6 = arith.constant 0 : index
    %7 = vector.load %arg4[%c0_5, %c0_6] : memref<32x32xbf16, #tpu.memory_space<vmem>>, vector<32x32xbf16>
    tpu.vector_store %arg4[%c0_5, %c0_6], %6 {strides = array<i32>} : memref<32x32xbf16, #tpu.memory_space<vmem>>, vector<32x32xbf16>,
    %c32 = arith.constant 32 : index
    %c0_7 = arith.constant 0 : index
    %8 = vector.load %arg2[%c32, %c0_7] : memref<64x32xbf16, #tpu.memory_space<vmem>>, vector<32x32xbf16>
    %cst_8 = arith.constant dense<0.000000e+00> : vector<32x32xf32>
    %9 = tpu.matmul %0, %8, %cst_8 {dimension_numbers = #tpu.dot_dimension_numbers<[1], [1], [0], [0], [0, 0, 1, 0], [], []>} : vector<32x32xbf16>, vector<32x32xbf16>, vector<32x32xf32> -> vector<32x32xf32>
    %c0_9 = arith.constant 0 : index
    %c32_10 = arith.constant 32 : index
    %10 = vector.load %arg3[%c0_9, %c32_10] : memref<1x64xf32, #tpu.memory_space<vmem>>, vector<1x32xf32>
    %11 = vector.broadcast %10 : vector<1x32xf32> to vector<32x32xf32>
    %12 = arith.addf %9, %11 : vector<32x32xf32>
    %13 = arith.truncf %12 : vector<32x32xf32> to vector<32x32xbf16>
    %c0_11 = arith.constant 0 : index
    %c0_12 = arith.constant 0 : index
    %14 = vector.load %arg5[%c0_11, %c0_12] : memref<32x32xbf16, #tpu.memory_space<vmem>>, vector<32x32xbf16>
    tpu.vector_store %arg5[%c0_11, %c0_12], %13 {strides = array<i32>} : memref<32x32xbf16, #tpu.memory_space<vmem>>, vector<32x32xbf16>,
    return
  }
  func.func @transform_0(%arg0: i32) -> (i32, i32) {
    %c0_i32 = arith.constant 0 : i32
    %c0_i32_0 = arith.constant 0 : i32
    return %arg0, %c0_i32 : i32, i32
  }
  func.func @transform_1(%arg0: i32) -> (i32, i32) {
    %c0_i32 = arith.constant 0 : i32
    %c0_i32_0 = arith.constant 0 : i32
    %c0_i32_1 = arith.constant 0 : i32
    return %c0_i32, %c0_i32_0 : i32, i32
  }
  func.func @transform_2(%arg0: i32) -> (i32, i32) {
    %c0_i32 = arith.constant 0 : i32
    %c0_i32_0 = arith.constant 0 : i32
    %c0_i32_1 = arith.constant 0 : i32
    return %c0_i32, %c0_i32_0 : i32, i32
  }
  func.func @transform_3(%arg0: i32) -> (i32, i32) {
    %c0_i32 = arith.constant 0 : i32
    %c0_i32_0 = arith.constant 0 : i32
    return %arg0, %c0_i32 : i32, i32
  }
  func.func @transform_4(%arg0: i32) -> (i32, i32) {
    %c0_i32 = arith.constant 0 : i32
    %c0_i32_0 = arith.constant 0 : i32
    return %arg0, %c0_i32 : i32, i32
  }
}

module attributes {stable_mosaic.version = 11 : i64} {
  func.func @_multi_proj_kernel(%arg0: i32, %arg1: memref<12x32xbf16, #tpu.memory_space<vmem>>, %arg2: memref<96x32xbf16, #tpu.memory_space<vmem>>, %arg3: memref<1x96xf32, #tpu.memory_space<vmem>>, %arg4: memref<12x32xbf16, #tpu.memory_space<vmem>>, %arg5: memref<12x32xbf16, #tpu.memory_space<vmem>>, %arg6: memref<12x32xbf16, #tpu.memory_space<vmem>>) attributes {dimension_semantics = [#tpu.dimension_semantics<parallel>], iteration_bounds = array<i64: 1>, scalar_prefetch = 0 : i64, scratch_operands = 0 : i64, tpu.core_type = #tpu.core_type<tc>, window_params = [{transform_indices = @transform_0, window_bounds = array<i64: 12, 32>}, {pipeline_mode = #tpu.pipeline_mode<synchronous>, transform_indices = @transform_1, window_bounds = array<i64: 96, 32>}, {pipeline_mode = #tpu.pipeline_mode<synchronous>, transform_indices = @transform_2, window_bounds = array<i64: 1, 96>}, {transform_indices = @transform_3, window_bounds = array<i64: 12, 32>}, {transform_indices = @transform_4, window_bounds = array<i64: 12, 32>}, {transform_indices = @transform_5, window_bounds = array<i64: 12, 32>}]} {
    %c0 = arith.constant 0 : index
    %c0_0 = arith.constant 0 : index
    %0 = vector.load %arg1[%c0, %c0_0] : memref<12x32xbf16, #tpu.memory_space<vmem>>, vector<12x32xbf16>
    %c0_1 = arith.constant 0 : index
    %c0_2 = arith.constant 0 : index
    %1 = vector.load %arg2[%c0_1, %c0_2] : memref<96x32xbf16, #tpu.memory_space<vmem>>, vector<32x32xbf16>
    %cst = arith.constant dense<0.000000e+00> : vector<12x32xf32>
    %2 = tpu.matmul %0, %1, %cst {dimension_numbers = #tpu.dot_dimension_numbers<[1], [1], [0], [0], [0, 0, 1, 0], [], []>} : vector<12x32xbf16>, vector<32x32xbf16>, vector<12x32xf32> -> vector<12x32xf32>
    %c0_3 = arith.constant 0 : index
    %c0_4 = arith.constant 0 : index
    %3 = vector.load %arg3[%c0_3, %c0_4] : memref<1x96xf32, #tpu.memory_space<vmem>>, vector<1x32xf32>
    %4 = vector.broadcast %3 : vector<1x32xf32> to vector<12x32xf32>
    %5 = arith.addf %2, %4 : vector<12x32xf32>
    %6 = arith.truncf %5 : vector<12x32xf32> to vector<12x32xbf16>
    %c0_5 = arith.constant 0 : index
    %c0_6 = arith.constant 0 : index
    %7 = vector.load %arg4[%c0_5, %c0_6] : memref<12x32xbf16, #tpu.memory_space<vmem>>, vector<12x32xbf16>
    tpu.vector_store %arg4[%c0_5, %c0_6], %6 {strides = array<i32>} : memref<12x32xbf16, #tpu.memory_space<vmem>>, vector<12x32xbf16>,
    %c32 = arith.constant 32 : index
    %c0_7 = arith.constant 0 : index
    %8 = vector.load %arg2[%c32, %c0_7] : memref<96x32xbf16, #tpu.memory_space<vmem>>, vector<32x32xbf16>
    %cst_8 = arith.constant dense<0.000000e+00> : vector<12x32xf32>
    %9 = tpu.matmul %0, %8, %cst_8 {dimension_numbers = #tpu.dot_dimension_numbers<[1], [1], [0], [0], [0, 0, 1, 0], [], []>} : vector<12x32xbf16>, vector<32x32xbf16>, vector<12x32xf32> -> vector<12x32xf32>
    %c0_9 = arith.constant 0 : index
    %c32_10 = arith.constant 32 : index
    %10 = vector.load %arg3[%c0_9, %c32_10] : memref<1x96xf32, #tpu.memory_space<vmem>>, vector<1x32xf32>
    %11 = vector.broadcast %10 : vector<1x32xf32> to vector<12x32xf32>
    %12 = arith.addf %9, %11 : vector<12x32xf32>
    %13 = arith.truncf %12 : vector<12x32xf32> to vector<12x32xbf16>
    %c0_11 = arith.constant 0 : index
    %c0_12 = arith.constant 0 : index
    %14 = vector.load %arg5[%c0_11, %c0_12] : memref<12x32xbf16, #tpu.memory_space<vmem>>, vector<12x32xbf16>
    tpu.vector_store %arg5[%c0_11, %c0_12], %13 {strides = array<i32>} : memref<12x32xbf16, #tpu.memory_space<vmem>>, vector<12x32xbf16>,
    %c64 = arith.constant 64 : index
    %c0_13 = arith.constant 0 : index
    %15 = vector.load %arg2[%c64, %c0_13] : memref<96x32xbf16, #tpu.memory_space<vmem>>, vector<32x32xbf16>
    %cst_14 = arith.constant dense<0.000000e+00> : vector<12x32xf32>
    %16 = tpu.matmul %0, %15, %cst_14 {dimension_numbers = #tpu.dot_dimension_numbers<[1], [1], [0], [0], [0, 0, 1, 0], [], []>} : vector<12x32xbf16>, vector<32x32xbf16>, vector<12x32xf32> -> vector<12x32xf32>
    %c0_15 = arith.constant 0 : index
    %c64_16 = arith.constant 64 : index
    %17 = vector.load %arg3[%c0_15, %c64_16] : memref<1x96xf32, #tpu.memory_space<vmem>>, vector<1x32xf32>
    %18 = vector.broadcast %17 : vector<1x32xf32> to vector<12x32xf32>
    %19 = arith.addf %16, %18 : vector<12x32xf32>
    %20 = arith.truncf %19 : vector<12x32xf32> to vector<12x32xbf16>
    %c0_17 = arith.constant 0 : index
    %c0_18 = arith.constant 0 : index
    %21 = vector.load %arg6[%c0_17, %c0_18] : memref<12x32xbf16, #tpu.memory_space<vmem>>, vector<12x32xbf16>
    tpu.vector_store %arg6[%c0_17, %c0_18], %20 {strides = array<i32>} : memref<12x32xbf16, #tpu.memory_space<vmem>>, vector<12x32xbf16>,
    return
  }
  func.func @transform_0(%arg0: i32) -> (i32, i32) {
    %c0_i32 = arith.constant 0 : i32
    %c0_i32_0 = arith.constant 0 : i32
    return %arg0, %c0_i32 : i32, i32
  }
  func.func @transform_1(%arg0: i32) -> (i32, i32) {
    %c0_i32 = arith.constant 0 : i32
    %c0_i32_0 = arith.constant 0 : i32
    %c0_i32_1 = arith.constant 0 : i32
    return %c0_i32, %c0_i32_0 : i32, i32
  }
  func.func @transform_2(%arg0: i32) -> (i32, i32) {
    %c0_i32 = arith.constant 0 : i32
    %c0_i32_0 = arith.constant 0 : i32
    %c0_i32_1 = arith.constant 0 : i32
    return %c0_i32, %c0_i32_0 : i32, i32
  }
  func.func @transform_3(%arg0: i32) -> (i32, i32) {
    %c0_i32 = arith.constant 0 : i32
    %c0_i32_0 = arith.constant 0 : i32
    return %arg0, %c0_i32 : i32, i32
  }
  func.func @transform_4(%arg0: i32) -> (i32, i32) {
    %c0_i32 = arith.constant 0 : i32
    %c0_i32_0 = arith.constant 0 : i32
    return %arg0, %c0_i32 : i32, i32
  }
  func.func @transform_5(%arg0: i32) -> (i32, i32) {
    %c0_i32 = arith.constant 0 : i32
    %c0_i32_0 = arith.constant 0 : i32
    return %arg0, %c0_i32 : i32, i32
  }
}

module attributes {stable_mosaic.version = 11 : i64} {
  func.func @_attn_block_kernel(%arg0: i32, %arg1: memref<1x6x32xbf16, #tpu.memory_space<vmem>>, %arg2: memref<1x6x32xbf16, #tpu.memory_space<vmem>>, %arg3: memref<1x6x32xbf16, #tpu.memory_space<vmem>>, %arg4: memref<1x6x32xbf16, #tpu.memory_space<vmem>>, %arg5: memref<32x32xbf16, #tpu.memory_space<vmem>>, %arg6: memref<1x32xf32, #tpu.memory_space<vmem>>, %arg7: memref<1x32xf32, #tpu.memory_space<vmem>>, %arg8: memref<1x32xf32, #tpu.memory_space<vmem>>, %arg9: memref<1x6x32xbf16, #tpu.memory_space<vmem>>) attributes {dimension_semantics = [#tpu.dimension_semantics<parallel>], iteration_bounds = array<i64: 2>, scalar_prefetch = 0 : i64, scratch_operands = 0 : i64, tpu.core_type = #tpu.core_type<tc>, window_params = [{transform_indices = @transform_0, window_bounds = array<i64: 1, 6, 32>}, {transform_indices = @transform_1, window_bounds = array<i64: 1, 6, 32>}, {transform_indices = @transform_2, window_bounds = array<i64: 1, 6, 32>}, {transform_indices = @transform_3, window_bounds = array<i64: 1, 6, 32>}, {pipeline_mode = #tpu.pipeline_mode<synchronous>, transform_indices = @transform_4, window_bounds = array<i64: 32, 32>}, {pipeline_mode = #tpu.pipeline_mode<synchronous>, transform_indices = @transform_5, window_bounds = array<i64: 1, 32>}, {pipeline_mode = #tpu.pipeline_mode<synchronous>, transform_indices = @transform_6, window_bounds = array<i64: 1, 32>}, {pipeline_mode = #tpu.pipeline_mode<synchronous>, transform_indices = @transform_7, window_bounds = array<i64: 1, 32>}, {transform_indices = @transform_8, window_bounds = array<i64: 1, 6, 32>}]} {
    %c0 = arith.constant 0 : index
    %c0_0 = arith.constant 0 : index
    %c0_1 = arith.constant 0 : index
    %0 = vector.load %arg1[%c0, %c0_0, %c0_1] : memref<1x6x32xbf16, #tpu.memory_space<vmem>>, vector<1x6x32xbf16>
    %1 = vector.shape_cast %0 : vector<1x6x32xbf16> to vector<6x32xbf16>
    %c0_2 = arith.constant 0 : index
    %c0_3 = arith.constant 0 : index
    %c0_4 = arith.constant 0 : index
    %2 = vector.load %arg2[%c0_2, %c0_3, %c0_4] : memref<1x6x32xbf16, #tpu.memory_space<vmem>>, vector<1x6x32xbf16>
    %3 = vector.shape_cast %2 : vector<1x6x32xbf16> to vector<6x32xbf16>
    %c0_5 = arith.constant 0 : index
    %c0_6 = arith.constant 0 : index
    %c0_7 = arith.constant 0 : index
    %4 = vector.load %arg3[%c0_5, %c0_6, %c0_7] : memref<1x6x32xbf16, #tpu.memory_space<vmem>>, vector<1x6x32xbf16>
    %5 = vector.shape_cast %4 : vector<1x6x32xbf16> to vector<6x32xbf16>
    %cst = arith.constant 0.000000e+00 : f32
    %6 = vector.broadcast %cst : f32 to vector<6x32xf32>
    %7 = vector.extract_strided_slice %1 {offsets = [0, 0], sizes = [6, 8], strides = [1, 1]} : vector<6x32xbf16> to vector<6x8xbf16>
    %8 = vector.extract_strided_slice %3 {offsets = [0, 0], sizes = [6, 8], strides = [1, 1]} : vector<6x32xbf16> to vector<6x8xbf16>
    %9 = vector.extract_strided_slice %5 {offsets = [0, 0], sizes = [6, 8], strides = [1, 1]} : vector<6x32xbf16> to vector<6x8xbf16>
    %cst_8 = arith.constant dense<0.000000e+00> : vector<6x6xf32>
    %10 = tpu.matmul %7, %8, %cst_8 {dimension_numbers = #tpu.dot_dimension_numbers<[1], [1], [0], [0], [0, 0, 1, 0], [], []>} : vector<6x8xbf16>, vector<6x8xbf16>, vector<6x6xf32> -> vector<6x6xf32>
    %cst_9 = arith.constant 0.353553385 : f32
    %11 = vector.broadcast %cst_9 : f32 to vector<6x6xf32>
    %12 = arith.mulf %10, %11 : vector<6x6xf32>
    %cst_10 = arith.constant dense<0xFF800000> : vector<6xf32>
    %13 = vector.multi_reduction <maximumf>, %12, %cst_10 [1] : vector<6x6xf32> to vector<6xf32>
    %14 = vector.shape_cast %13 : vector<6xf32> to vector<6x1xf32>
    %15 = vector.broadcast %14 : vector<6x1xf32> to vector<6x6xf32>
    %16 = arith.subf %12, %15 : vector<6x6xf32>
    %17 = math.exp %16 : vector<6x6xf32>
    %cst_11 = arith.constant dense<0.000000e+00> : vector<6xf32>
    %18 = vector.multi_reduction <add>, %17, %cst_11 [1] : vector<6x6xf32> to vector<6xf32>
    %19 = vector.shape_cast %18 : vector<6xf32> to vector<6x1xf32>
    %20 = tpu.reciprocal %19 {approx = true} : vector<6x1xf32> -> vector<6x1xf32>
    %21 = vector.broadcast %20 : vector<6x1xf32> to vector<6x6xf32>
    %22 = arith.mulf %17, %21 : vector<6x6xf32>
    %23 = arith.truncf %22 : vector<6x6xf32> to vector<6x6xbf16>
    %cst_12 = arith.constant dense<0.000000e+00> : vector<6x8xf32>
    %24 = tpu.matmul %23, %9, %cst_12 {dimension_numbers = #tpu.dot_dimension_numbers<[1], [0], [0], [1], [0, 0, 1, 1], [], []>} : vector<6x6xbf16>, vector<6x8xbf16>, vector<6x8xf32> -> vector<6x8xf32>
    %c0_13 = arith.constant 0 : index
    %c0_14 = arith.constant 0 : index
    %25 = vector.load %arg5[%c0_13, %c0_14] : memref<32x32xbf16, #tpu.memory_space<vmem>>, vector<32x8xbf16>
    %26 = arith.truncf %24 : vector<6x8xf32> to vector<6x8xbf16>
    %cst_15 = arith.constant dense<0.000000e+00> : vector<6x32xf32>
    %27 = tpu.matmul %26, %25, %cst_15 {dimension_numbers = #tpu.dot_dimension_numbers<[1], [1], [0], [0], [0, 0, 1, 0], [], []>} : vector<6x8xbf16>, vector<32x8xbf16>, vector<6x32xf32> -> vector<6x32xf32>
    %28 = arith.addf %6, %27 : vector<6x32xf32>
    %29 = vector.extract_strided_slice %1 {offsets = [0, 8], sizes = [6, 8], strides = [1, 1]} : vector<6x32xbf16> to vector<6x8xbf16>
    %30 = vector.extract_strided_slice %3 {offsets = [0, 8], sizes = [6, 8], strides = [1, 1]} : vector<6x32xbf16> to vector<6x8xbf16>
    %31 = vector.extract_strided_slice %5 {offsets = [0, 8], sizes = [6, 8], strides = [1, 1]} : vector<6x32xbf16> to vector<6x8xbf16>
    %cst_16 = arith.constant dense<0.000000e+00> : vector<6x6xf32>
    %32 = tpu.matmul %29, %30, %cst_16 {dimension_numbers = #tpu.dot_dimension_numbers<[1], [1], [0], [0], [0, 0, 1, 0], [], []>} : vector<6x8xbf16>, vector<6x8xbf16>, vector<6x6xf32> -> vector<6x6xf32>
    %cst_17 = arith.constant 0.353553385 : f32
    %33 = vector.broadcast %cst_17 : f32 to vector<6x6xf32>
    %34 = arith.mulf %32, %33 : vector<6x6xf32>
    %cst_18 = arith.constant dense<0xFF800000> : vector<6xf32>
    %35 = vector.multi_reduction <maximumf>, %34, %cst_18 [1] : vector<6x6xf32> to vector<6xf32>
    %36 = vector.shape_cast %35 : vector<6xf32> to vector<6x1xf32>
    %37 = vector.broadcast %36 : vector<6x1xf32> to vector<6x6xf32>
    %38 = arith.subf %34, %37 : vector<6x6xf32>
    %39 = math.exp %38 : vector<6x6xf32>
    %cst_19 = arith.constant dense<0.000000e+00> : vector<6xf32>
    %40 = vector.multi_reduction <add>, %39, %cst_19 [1] : vector<6x6xf32> to vector<6xf32>
    %41 = vector.shape_cast %40 : vector<6xf32> to vector<6x1xf32>
    %42 = tpu.reciprocal %41 {approx = true} : vector<6x1xf32> -> vector<6x1xf32>
    %43 = vector.broadcast %42 : vector<6x1xf32> to vector<6x6xf32>
    %44 = arith.mulf %39, %43 : vector<6x6xf32>
    %45 = arith.truncf %44 : vector<6x6xf32> to vector<6x6xbf16>
    %cst_20 = arith.constant dense<0.000000e+00> : vector<6x8xf32>
    %46 = tpu.matmul %45, %31, %cst_20 {dimension_numbers = #tpu.dot_dimension_numbers<[1], [0], [0], [1], [0, 0, 1, 1], [], []>} : vector<6x6xbf16>, vector<6x8xbf16>, vector<6x8xf32> -> vector<6x8xf32>
    %c0_21 = arith.constant 0 : index
    %c8 = arith.constant 8 : index
    %47 = vector.load %arg5[%c0_21, %c8] : memref<32x32xbf16, #tpu.memory_space<vmem>>, vector<32x8xbf16>
    %48 = arith.truncf %46 : vector<6x8xf32> to vector<6x8xbf16>
    %cst_22 = arith.constant dense<0.000000e+00> : vector<6x32xf32>
    %49 = tpu.matmul %48, %47, %cst_22 {dimension_numbers = #tpu.dot_dimension_numbers<[1], [1], [0], [0], [0, 0, 1, 0], [], []>} : vector<6x8xbf16>, vector<32x8xbf16>, vector<6x32xf32> -> vector<6x32xf32>
    %50 = arith.addf %28, %49 : vector<6x32xf32>
    %51 = vector.extract_strided_slice %1 {offsets = [0, 16], sizes = [6, 8], strides = [1, 1]} : vector<6x32xbf16> to vector<6x8xbf16>
    %52 = vector.extract_strided_slice %3 {offsets = [0, 16], sizes = [6, 8], strides = [1, 1]} : vector<6x32xbf16> to vector<6x8xbf16>
    %53 = vector.extract_strided_slice %5 {offsets = [0, 16], sizes = [6, 8], strides = [1, 1]} : vector<6x32xbf16> to vector<6x8xbf16>
    %cst_23 = arith.constant dense<0.000000e+00> : vector<6x6xf32>
    %54 = tpu.matmul %51, %52, %cst_23 {dimension_numbers = #tpu.dot_dimension_numbers<[1], [1], [0], [0], [0, 0, 1, 0], [], []>} : vector<6x8xbf16>, vector<6x8xbf16>, vector<6x6xf32> -> vector<6x6xf32>
    %cst_24 = arith.constant 0.353553385 : f32
    %55 = vector.broadcast %cst_24 : f32 to vector<6x6xf32>
    %56 = arith.mulf %54, %55 : vector<6x6xf32>
    %cst_25 = arith.constant dense<0xFF800000> : vector<6xf32>
    %57 = vector.multi_reduction <maximumf>, %56, %cst_25 [1] : vector<6x6xf32> to vector<6xf32>
    %58 = vector.shape_cast %57 : vector<6xf32> to vector<6x1xf32>
    %59 = vector.broadcast %58 : vector<6x1xf32> to vector<6x6xf32>
    %60 = arith.subf %56, %59 : vector<6x6xf32>
    %61 = math.exp %60 : vector<6x6xf32>
    %cst_26 = arith.constant dense<0.000000e+00> : vector<6xf32>
    %62 = vector.multi_reduction <add>, %61, %cst_26 [1] : vector<6x6xf32> to vector<6xf32>
    %63 = vector.shape_cast %62 : vector<6xf32> to vector<6x1xf32>
    %64 = tpu.reciprocal %63 {approx = true} : vector<6x1xf32> -> vector<6x1xf32>
    %65 = vector.broadcast %64 : vector<6x1xf32> to vector<6x6xf32>
    %66 = arith.mulf %61, %65 : vector<6x6xf32>
    %67 = arith.truncf %66 : vector<6x6xf32> to vector<6x6xbf16>
    %cst_27 = arith.constant dense<0.000000e+00> : vector<6x8xf32>
    %68 = tpu.matmul %67, %53, %cst_27 {dimension_numbers = #tpu.dot_dimension_numbers<[1], [0], [0], [1], [0, 0, 1, 1], [], []>} : vector<6x6xbf16>, vector<6x8xbf16>, vector<6x8xf32> -> vector<6x8xf32>
    %c0_28 = arith.constant 0 : index
    %c16 = arith.constant 16 : index
    %69 = vector.load %arg5[%c0_28, %c16] : memref<32x32xbf16, #tpu.memory_space<vmem>>, vector<32x8xbf16>
    %70 = arith.truncf %68 : vector<6x8xf32> to vector<6x8xbf16>
    %cst_29 = arith.constant dense<0.000000e+00> : vector<6x32xf32>
    %71 = tpu.matmul %70, %69, %cst_29 {dimension_numbers = #tpu.dot_dimension_numbers<[1], [1], [0], [0], [0, 0, 1, 0], [], []>} : vector<6x8xbf16>, vector<32x8xbf16>, vector<6x32xf32> -> vector<6x32xf32>
    %72 = arith.addf %50, %71 : vector<6x32xf32>
    %73 = vector.extract_strided_slice %1 {offsets = [0, 24], sizes = [6, 8], strides = [1, 1]} : vector<6x32xbf16> to vector<6x8xbf16>
    %74 = vector.extract_strided_slice %3 {offsets = [0, 24], sizes = [6, 8], strides = [1, 1]} : vector<6x32xbf16> to vector<6x8xbf16>
    %75 = vector.extract_strided_slice %5 {offsets = [0, 24], sizes = [6, 8], strides = [1, 1]} : vector<6x32xbf16> to vector<6x8xbf16>
    %cst_30 = arith.constant dense<0.000000e+00> : vector<6x6xf32>
    %76 = tpu.matmul %73, %74, %cst_30 {dimension_numbers = #tpu.dot_dimension_numbers<[1], [1], [0], [0], [0, 0, 1, 0], [], []>} : vector<6x8xbf16>, vector<6x8xbf16>, vector<6x6xf32> -> vector<6x6xf32>
    %cst_31 = arith.constant 0.353553385 : f32
    %77 = vector.broadcast %cst_31 : f32 to vector<6x6xf32>
    %78 = arith.mulf %76, %77 : vector<6x6xf32>
    %cst_32 = arith.constant dense<0xFF800000> : vector<6xf32>
    %79 = vector.multi_reduction <maximumf>, %78, %cst_32 [1] : vector<6x6xf32> to vector<6xf32>
    %80 = vector.shape_cast %79 : vector<6xf32> to vector<6x1xf32>
    %81 = vector.broadcast %80 : vector<6x1xf32> to vector<6x6xf32>
    %82 = arith.subf %78, %81 : vector<6x6xf32>
    %83 = math.exp %82 : vector<6x6xf32>
    %cst_33 = arith.constant dense<0.000000e+00> : vector<6xf32>
    %84 = vector.multi_reduction <add>, %83, %cst_33 [1] : vector<6x6xf32> to vector<6xf32>
    %85 = vector.shape_cast %84 : vector<6xf32> to vector<6x1xf32>
    %86 = tpu.reciprocal %85 {approx = true} : vector<6x1xf32> -> vector<6x1xf32>
    %87 = vector.broadcast %86 : vector<6x1xf32> to vector<6x6xf32>
    %88 = arith.mulf %83, %87 : vector<6x6xf32>
    %89 = arith.truncf %88 : vector<6x6xf32> to vector<6x6xbf16>
    %cst_34 = arith.constant dense<0.000000e+00> : vector<6x8xf32>
    %90 = tpu.matmul %89, %75, %cst_34 {dimension_numbers = #tpu.dot_dimension_numbers<[1], [0], [0], [1], [0, 0, 1, 1], [], []>} : vector<6x6xbf16>, vector<6x8xbf16>, vector<6x8xf32> -> vector<6x8xf32>
    %c0_35 = arith.constant 0 : index
    %c24 = arith.constant 24 : index
    %91 = vector.load %arg5[%c0_35, %c24] : memref<32x32xbf16, #tpu.memory_space<vmem>>, vector<32x8xbf16>
    %92 = arith.truncf %90 : vector<6x8xf32> to vector<6x8xbf16>
    %cst_36 = arith.constant dense<0.000000e+00> : vector<6x32xf32>
    %93 = tpu.matmul %92, %91, %cst_36 {dimension_numbers = #tpu.dot_dimension_numbers<[1], [1], [0], [0], [0, 0, 1, 0], [], []>} : vector<6x8xbf16>, vector<32x8xbf16>, vector<6x32xf32> -> vector<6x32xf32>
    %94 = arith.addf %72, %93 : vector<6x32xf32>
    %c0_37 = arith.constant 0 : index
    %c0_38 = arith.constant 0 : index
    %95 = vector.load %arg6[%c0_37, %c0_38] : memref<1x32xf32, #tpu.memory_space<vmem>>, vector<1x32xf32>
    %96 = vector.broadcast %95 : vector<1x32xf32> to vector<6x32xf32>
    %97 = arith.addf %94, %96 : vector<6x32xf32>
    %c0_39 = arith.constant 0 : index
    %c0_40 = arith.constant 0 : index
    %c0_41 = arith.constant 0 : index
    %98 = vector.load %arg4[%c0_39, %c0_40, %c0_41] : memref<1x6x32xbf16, #tpu.memory_space<vmem>>, vector<1x6x32xbf16>
    %99 = vector.shape_cast %98 : vector<1x6x32xbf16> to vector<6x32xbf16>
    %100 = arith.extf %99 : vector<6x32xbf16> to vector<6x32xf32>
    %101 = arith.addf %97, %100 : vector<6x32xf32>
    %cst_42 = arith.constant dense<0.000000e+00> : vector<6xf32>
    %102 = vector.multi_reduction <add>, %101, %cst_42 [1] : vector<6x32xf32> to vector<6xf32>
    %103 = vector.shape_cast %102 : vector<6xf32> to vector<6x1xf32>
    %cst_43 = arith.constant 3.200000e+01 : f32
    %104 = vector.broadcast %cst_43 : f32 to vector<6x1xf32>
    %105 = arith.divf %103, %104 : vector<6x1xf32>
    %106 = vector.broadcast %105 : vector<6x1xf32> to vector<6x32xf32>
    %107 = arith.subf %101, %106 : vector<6x32xf32>
    %108 = arith.mulf %107, %107 : vector<6x32xf32>
    %cst_44 = arith.constant dense<0.000000e+00> : vector<6xf32>
    %109 = vector.multi_reduction <add>, %108, %cst_44 [1] : vector<6x32xf32> to vector<6xf32>
    %110 = vector.shape_cast %109 : vector<6xf32> to vector<6x1xf32>
    %cst_45 = arith.constant 3.200000e+01 : f32
    %111 = vector.broadcast %cst_45 : f32 to vector<6x1xf32>
    %112 = arith.divf %110, %111 : vector<6x1xf32>
    %cst_46 = arith.constant 9.99999974E-6 : f32
    %113 = vector.broadcast %cst_46 : f32 to vector<6x1xf32>
    %114 = arith.addf %112, %113 : vector<6x1xf32>
    %115 = math.rsqrt %114 : vector<6x1xf32>
    %116 = vector.broadcast %115 : vector<6x1xf32> to vector<6x32xf32>
    %117 = arith.mulf %107, %116 : vector<6x32xf32>
    %c0_47 = arith.constant 0 : index
    %c0_48 = arith.constant 0 : index
    %118 = vector.load %arg7[%c0_47, %c0_48] : memref<1x32xf32, #tpu.memory_space<vmem>>, vector<1x32xf32>
    %119 = vector.broadcast %118 : vector<1x32xf32> to vector<6x32xf32>
    %120 = arith.mulf %117, %119 : vector<6x32xf32>
    %c0_49 = arith.constant 0 : index
    %c0_50 = arith.constant 0 : index
    %121 = vector.load %arg8[%c0_49, %c0_50] : memref<1x32xf32, #tpu.memory_space<vmem>>, vector<1x32xf32>
    %122 = vector.broadcast %121 : vector<1x32xf32> to vector<6x32xf32>
    %123 = arith.addf %120, %122 : vector<6x32xf32>
    %124 = arith.truncf %123 : vector<6x32xf32> to vector<6x32xbf16>
    %c0_51 = arith.constant 0 : index
    %c0_52 = arith.constant 0 : index
    %c0_53 = arith.constant 0 : index
    %125 = vector.load %arg9[%c0_51, %c0_52, %c0_53] : memref<1x6x32xbf16, #tpu.memory_space<vmem>>, vector<1x6x32xbf16>
    %126 = vector.shape_cast %125 : vector<1x6x32xbf16> to vector<6x32xbf16>
    %127 = vector.shape_cast %124 : vector<6x32xbf16> to vector<1x6x32xbf16>
    tpu.vector_store %arg9[%c0_51, %c0_52, %c0_53], %127 {strides = array<i32>} : memref<1x6x32xbf16, #tpu.memory_space<vmem>>, vector<1x6x32xbf16>,
    return
  }
  func.func @transform_0(%arg0: i32) -> (i32, i32, i32) {
    %c0_i32 = arith.constant 0 : i32
    %c0_i32_0 = arith.constant 0 : i32
    %c0_i32_1 = arith.constant 0 : i32
    return %arg0, %c0_i32, %c0_i32_0 : i32, i32, i32
  }
  func.func @transform_1(%arg0: i32) -> (i32, i32, i32) {
    %c0_i32 = arith.constant 0 : i32
    %c0_i32_0 = arith.constant 0 : i32
    %c0_i32_1 = arith.constant 0 : i32
    return %arg0, %c0_i32, %c0_i32_0 : i32, i32, i32
  }
  func.func @transform_2(%arg0: i32) -> (i32, i32, i32) {
    %c0_i32 = arith.constant 0 : i32
    %c0_i32_0 = arith.constant 0 : i32
    %c0_i32_1 = arith.constant 0 : i32
    return %arg0, %c0_i32, %c0_i32_0 : i32, i32, i32
  }
  func.func @transform_3(%arg0: i32) -> (i32, i32, i32) {
    %c0_i32 = arith.constant 0 : i32
    %c0_i32_0 = arith.constant 0 : i32
    %c0_i32_1 = arith.constant 0 : i32
    return %arg0, %c0_i32, %c0_i32_0 : i32, i32, i32
  }
  func.func @transform_4(%arg0: i32) -> (i32, i32) {
    %c0_i32 = arith.constant 0 : i32
    %c0_i32_0 = arith.constant 0 : i32
    %c0_i32_1 = arith.constant 0 : i32
    return %c0_i32, %c0_i32_0 : i32, i32
  }
  func.func @transform_5(%arg0: i32) -> (i32, i32) {
    %c0_i32 = arith.constant 0 : i32
    %c0_i32_0 = arith.constant 0 : i32
    %c0_i32_1 = arith.constant 0 : i32
    return %c0_i32, %c0_i32_0 : i32, i32
  }
  func.func @transform_6(%arg0: i32) -> (i32, i32) {
    %c0_i32 = arith.constant 0 : i32
    %c0_i32_0 = arith.constant 0 : i32
    %c0_i32_1 = arith.constant 0 : i32
    return %c0_i32, %c0_i32_0 : i32, i32
  }
  func.func @transform_7(%arg0: i32) -> (i32, i32) {
    %c0_i32 = arith.constant 0 : i32
    %c0_i32_0 = arith.constant 0 : i32
    %c0_i32_1 = arith.constant 0 : i32
    return %c0_i32, %c0_i32_0 : i32, i32
  }
  func.func @transform_8(%arg0: i32) -> (i32, i32, i32) {
    %c0_i32 = arith.constant 0 : i32
    %c0_i32_0 = arith.constant 0 : i32
    %c0_i32_1 = arith.constant 0 : i32
    return %arg0, %c0_i32, %c0_i32_0 : i32, i32, i32
  }
}

module attributes {stable_mosaic.version = 11 : i64} {
  func.func @_multi_proj_kernel(%arg0: i32, %arg1: memref<12x32xbf16, #tpu.memory_space<vmem>>, %arg2: memref<32x32xbf16, #tpu.memory_space<vmem>>, %arg3: memref<1x32xf32, #tpu.memory_space<vmem>>, %arg4: memref<12x32xbf16, #tpu.memory_space<vmem>>) attributes {dimension_semantics = [#tpu.dimension_semantics<parallel>], iteration_bounds = array<i64: 1>, scalar_prefetch = 0 : i64, scratch_operands = 0 : i64, tpu.core_type = #tpu.core_type<tc>, window_params = [{transform_indices = @transform_0, window_bounds = array<i64: 12, 32>}, {pipeline_mode = #tpu.pipeline_mode<synchronous>, transform_indices = @transform_1, window_bounds = array<i64: 32, 32>}, {pipeline_mode = #tpu.pipeline_mode<synchronous>, transform_indices = @transform_2, window_bounds = array<i64: 1, 32>}, {transform_indices = @transform_3, window_bounds = array<i64: 12, 32>}]} {
    %c0 = arith.constant 0 : index
    %c0_0 = arith.constant 0 : index
    %0 = vector.load %arg1[%c0, %c0_0] : memref<12x32xbf16, #tpu.memory_space<vmem>>, vector<12x32xbf16>
    %c0_1 = arith.constant 0 : index
    %c0_2 = arith.constant 0 : index
    %1 = vector.load %arg2[%c0_1, %c0_2] : memref<32x32xbf16, #tpu.memory_space<vmem>>, vector<32x32xbf16>
    %cst = arith.constant dense<0.000000e+00> : vector<12x32xf32>
    %2 = tpu.matmul %0, %1, %cst {dimension_numbers = #tpu.dot_dimension_numbers<[1], [1], [0], [0], [0, 0, 1, 0], [], []>} : vector<12x32xbf16>, vector<32x32xbf16>, vector<12x32xf32> -> vector<12x32xf32>
    %c0_3 = arith.constant 0 : index
    %c0_4 = arith.constant 0 : index
    %3 = vector.load %arg3[%c0_3, %c0_4] : memref<1x32xf32, #tpu.memory_space<vmem>>, vector<1x32xf32>
    %4 = vector.broadcast %3 : vector<1x32xf32> to vector<12x32xf32>
    %5 = arith.addf %2, %4 : vector<12x32xf32>
    %6 = arith.truncf %5 : vector<12x32xf32> to vector<12x32xbf16>
    %c0_5 = arith.constant 0 : index
    %c0_6 = arith.constant 0 : index
    %7 = vector.load %arg4[%c0_5, %c0_6] : memref<12x32xbf16, #tpu.memory_space<vmem>>, vector<12x32xbf16>
    tpu.vector_store %arg4[%c0_5, %c0_6], %6 {strides = array<i32>} : memref<12x32xbf16, #tpu.memory_space<vmem>>, vector<12x32xbf16>,
    return
  }
  func.func @transform_0(%arg0: i32) -> (i32, i32) {
    %c0_i32 = arith.constant 0 : i32
    %c0_i32_0 = arith.constant 0 : i32
    return %arg0, %c0_i32 : i32, i32
  }
  func.func @transform_1(%arg0: i32) -> (i32, i32) {
    %c0_i32 = arith.constant 0 : i32
    %c0_i32_0 = arith.constant 0 : i32
    %c0_i32_1 = arith.constant 0 : i32
    return %c0_i32, %c0_i32_0 : i32, i32
  }
  func.func @transform_2(%arg0: i32) -> (i32, i32) {
    %c0_i32 = arith.constant 0 : i32
    %c0_i32_0 = arith.constant 0 : i32
    %c0_i32_1 = arith.constant 0 : i32
    return %c0_i32, %c0_i32_0 : i32, i32
  }
  func.func @transform_3(%arg0: i32) -> (i32, i32) {
    %c0_i32 = arith.constant 0 : i32
    %c0_i32_0 = arith.constant 0 : i32
    return %arg0, %c0_i32 : i32, i32
  }
}

module attributes {stable_mosaic.version = 11 : i64} {
  func.func @_attn_block_kernel(%arg0: i32, %arg1: memref<1x6x32xbf16, #tpu.memory_space<vmem>>, %arg2: memref<1x16x32xbf16, #tpu.memory_space<vmem>>, %arg3: memref<1x16x32xbf16, #tpu.memory_space<vmem>>, %arg4: memref<1x6x32xbf16, #tpu.memory_space<vmem>>, %arg5: memref<32x32xbf16, #tpu.memory_space<vmem>>, %arg6: memref<1x32xf32, #tpu.memory_space<vmem>>, %arg7: memref<1x32xf32, #tpu.memory_space<vmem>>, %arg8: memref<1x32xf32, #tpu.memory_space<vmem>>, %arg9: memref<1x6x32xbf16, #tpu.memory_space<vmem>>) attributes {dimension_semantics = [#tpu.dimension_semantics<parallel>], iteration_bounds = array<i64: 2>, scalar_prefetch = 0 : i64, scratch_operands = 0 : i64, tpu.core_type = #tpu.core_type<tc>, window_params = [{transform_indices = @transform_0, window_bounds = array<i64: 1, 6, 32>}, {transform_indices = @transform_1, window_bounds = array<i64: 1, 16, 32>}, {transform_indices = @transform_2, window_bounds = array<i64: 1, 16, 32>}, {transform_indices = @transform_3, window_bounds = array<i64: 1, 6, 32>}, {pipeline_mode = #tpu.pipeline_mode<synchronous>, transform_indices = @transform_4, window_bounds = array<i64: 32, 32>}, {pipeline_mode = #tpu.pipeline_mode<synchronous>, transform_indices = @transform_5, window_bounds = array<i64: 1, 32>}, {pipeline_mode = #tpu.pipeline_mode<synchronous>, transform_indices = @transform_6, window_bounds = array<i64: 1, 32>}, {pipeline_mode = #tpu.pipeline_mode<synchronous>, transform_indices = @transform_7, window_bounds = array<i64: 1, 32>}, {transform_indices = @transform_8, window_bounds = array<i64: 1, 6, 32>}]} {
    %c0 = arith.constant 0 : index
    %c0_0 = arith.constant 0 : index
    %c0_1 = arith.constant 0 : index
    %0 = vector.load %arg1[%c0, %c0_0, %c0_1] : memref<1x6x32xbf16, #tpu.memory_space<vmem>>, vector<1x6x32xbf16>
    %1 = vector.shape_cast %0 : vector<1x6x32xbf16> to vector<6x32xbf16>
    %c0_2 = arith.constant 0 : index
    %c0_3 = arith.constant 0 : index
    %c0_4 = arith.constant 0 : index
    %2 = vector.load %arg2[%c0_2, %c0_3, %c0_4] : memref<1x16x32xbf16, #tpu.memory_space<vmem>>, vector<1x16x32xbf16>
    %3 = vector.shape_cast %2 : vector<1x16x32xbf16> to vector<16x32xbf16>
    %c0_5 = arith.constant 0 : index
    %c0_6 = arith.constant 0 : index
    %c0_7 = arith.constant 0 : index
    %4 = vector.load %arg3[%c0_5, %c0_6, %c0_7] : memref<1x16x32xbf16, #tpu.memory_space<vmem>>, vector<1x16x32xbf16>
    %5 = vector.shape_cast %4 : vector<1x16x32xbf16> to vector<16x32xbf16>
    %cst = arith.constant 0.000000e+00 : f32
    %6 = vector.broadcast %cst : f32 to vector<6x32xf32>
    %7 = vector.extract_strided_slice %1 {offsets = [0, 0], sizes = [6, 8], strides = [1, 1]} : vector<6x32xbf16> to vector<6x8xbf16>
    %8 = vector.extract_strided_slice %3 {offsets = [0, 0], sizes = [16, 8], strides = [1, 1]} : vector<16x32xbf16> to vector<16x8xbf16>
    %9 = vector.extract_strided_slice %5 {offsets = [0, 0], sizes = [16, 8], strides = [1, 1]} : vector<16x32xbf16> to vector<16x8xbf16>
    %cst_8 = arith.constant dense<0.000000e+00> : vector<6x16xf32>
    %10 = tpu.matmul %7, %8, %cst_8 {dimension_numbers = #tpu.dot_dimension_numbers<[1], [1], [0], [0], [0, 0, 1, 0], [], []>} : vector<6x8xbf16>, vector<16x8xbf16>, vector<6x16xf32> -> vector<6x16xf32>
    %cst_9 = arith.constant 0.353553385 : f32
    %11 = vector.broadcast %cst_9 : f32 to vector<6x16xf32>
    %12 = arith.mulf %10, %11 : vector<6x16xf32>
    %cst_10 = arith.constant dense<0xFF800000> : vector<6xf32>
    %13 = vector.multi_reduction <maximumf>, %12, %cst_10 [1] : vector<6x16xf32> to vector<6xf32>
    %14 = vector.shape_cast %13 : vector<6xf32> to vector<6x1xf32>
    %15 = vector.broadcast %14 : vector<6x1xf32> to vector<6x16xf32>
    %16 = arith.subf %12, %15 : vector<6x16xf32>
    %17 = math.exp %16 : vector<6x16xf32>
    %cst_11 = arith.constant dense<0.000000e+00> : vector<6xf32>
    %18 = vector.multi_reduction <add>, %17, %cst_11 [1] : vector<6x16xf32> to vector<6xf32>
    %19 = vector.shape_cast %18 : vector<6xf32> to vector<6x1xf32>
    %20 = tpu.reciprocal %19 {approx = true} : vector<6x1xf32> -> vector<6x1xf32>
    %21 = vector.broadcast %20 : vector<6x1xf32> to vector<6x16xf32>
    %22 = arith.mulf %17, %21 : vector<6x16xf32>
    %23 = arith.truncf %22 : vector<6x16xf32> to vector<6x16xbf16>
    %cst_12 = arith.constant dense<0.000000e+00> : vector<6x8xf32>
    %24 = tpu.matmul %23, %9, %cst_12 {dimension_numbers = #tpu.dot_dimension_numbers<[1], [0], [0], [1], [0, 0, 1, 1], [], []>} : vector<6x16xbf16>, vector<16x8xbf16>, vector<6x8xf32> -> vector<6x8xf32>
    %c0_13 = arith.constant 0 : index
    %c0_14 = arith.constant 0 : index
    %25 = vector.load %arg5[%c0_13, %c0_14] : memref<32x32xbf16, #tpu.memory_space<vmem>>, vector<32x8xbf16>
    %26 = arith.truncf %24 : vector<6x8xf32> to vector<6x8xbf16>
    %cst_15 = arith.constant dense<0.000000e+00> : vector<6x32xf32>
    %27 = tpu.matmul %26, %25, %cst_15 {dimension_numbers = #tpu.dot_dimension_numbers<[1], [1], [0], [0], [0, 0, 1, 0], [], []>} : vector<6x8xbf16>, vector<32x8xbf16>, vector<6x32xf32> -> vector<6x32xf32>
    %28 = arith.addf %6, %27 : vector<6x32xf32>
    %29 = vector.extract_strided_slice %1 {offsets = [0, 8], sizes = [6, 8], strides = [1, 1]} : vector<6x32xbf16> to vector<6x8xbf16>
    %30 = vector.extract_strided_slice %3 {offsets = [0, 8], sizes = [16, 8], strides = [1, 1]} : vector<16x32xbf16> to vector<16x8xbf16>
    %31 = vector.extract_strided_slice %5 {offsets = [0, 8], sizes = [16, 8], strides = [1, 1]} : vector<16x32xbf16> to vector<16x8xbf16>
    %cst_16 = arith.constant dense<0.000000e+00> : vector<6x16xf32>
    %32 = tpu.matmul %29, %30, %cst_16 {dimension_numbers = #tpu.dot_dimension_numbers<[1], [1], [0], [0], [0, 0, 1, 0], [], []>} : vector<6x8xbf16>, vector<16x8xbf16>, vector<6x16xf32> -> vector<6x16xf32>
    %cst_17 = arith.constant 0.353553385 : f32
    %33 = vector.broadcast %cst_17 : f32 to vector<6x16xf32>
    %34 = arith.mulf %32, %33 : vector<6x16xf32>
    %cst_18 = arith.constant dense<0xFF800000> : vector<6xf32>
    %35 = vector.multi_reduction <maximumf>, %34, %cst_18 [1] : vector<6x16xf32> to vector<6xf32>
    %36 = vector.shape_cast %35 : vector<6xf32> to vector<6x1xf32>
    %37 = vector.broadcast %36 : vector<6x1xf32> to vector<6x16xf32>
    %38 = arith.subf %34, %37 : vector<6x16xf32>
    %39 = math.exp %38 : vector<6x16xf32>
    %cst_19 = arith.constant dense<0.000000e+00> : vector<6xf32>
    %40 = vector.multi_reduction <add>, %39, %cst_19 [1] : vector<6x16xf32> to vector<6xf32>
    %41 = vector.shape_cast %40 : vector<6xf32> to vector<6x1xf32>
    %42 = tpu.reciprocal %41 {approx = true} : vector<6x1xf32> -> vector<6x1xf32>
    %43 = vector.broadcast %42 : vector<6x1xf32> to vector<6x16xf32>
    %44 = arith.mulf %39, %43 : vector<6x16xf32>
    %45 = arith.truncf %44 : vector<6x16xf32> to vector<6x16xbf16>
    %cst_20 = arith.constant dense<0.000000e+00> : vector<6x8xf32>
    %46 = tpu.matmul %45, %31, %cst_20 {dimension_numbers = #tpu.dot_dimension_numbers<[1], [0], [0], [1], [0, 0, 1, 1], [], []>} : vector<6x16xbf16>, vector<16x8xbf16>, vector<6x8xf32> -> vector<6x8xf32>
    %c0_21 = arith.constant 0 : index
    %c8 = arith.constant 8 : index
    %47 = vector.load %arg5[%c0_21, %c8] : memref<32x32xbf16, #tpu.memory_space<vmem>>, vector<32x8xbf16>
    %48 = arith.truncf %46 : vector<6x8xf32> to vector<6x8xbf16>
    %cst_22 = arith.constant dense<0.000000e+00> : vector<6x32xf32>
    %49 = tpu.matmul %48, %47, %cst_22 {dimension_numbers = #tpu.dot_dimension_numbers<[1], [1], [0], [0], [0, 0, 1, 0], [], []>} : vector<6x8xbf16>, vector<32x8xbf16>, vector<6x32xf32> -> vector<6x32xf32>
    %50 = arith.addf %28, %49 : vector<6x32xf32>
    %51 = vector.extract_strided_slice %1 {offsets = [0, 16], sizes = [6, 8], strides = [1, 1]} : vector<6x32xbf16> to vector<6x8xbf16>
    %52 = vector.extract_strided_slice %3 {offsets = [0, 16], sizes = [16, 8], strides = [1, 1]} : vector<16x32xbf16> to vector<16x8xbf16>
    %53 = vector.extract_strided_slice %5 {offsets = [0, 16], sizes = [16, 8], strides = [1, 1]} : vector<16x32xbf16> to vector<16x8xbf16>
    %cst_23 = arith.constant dense<0.000000e+00> : vector<6x16xf32>
    %54 = tpu.matmul %51, %52, %cst_23 {dimension_numbers = #tpu.dot_dimension_numbers<[1], [1], [0], [0], [0, 0, 1, 0], [], []>} : vector<6x8xbf16>, vector<16x8xbf16>, vector<6x16xf32> -> vector<6x16xf32>
    %cst_24 = arith.constant 0.353553385 : f32
    %55 = vector.broadcast %cst_24 : f32 to vector<6x16xf32>
    %56 = arith.mulf %54, %55 : vector<6x16xf32>
    %cst_25 = arith.constant dense<0xFF800000> : vector<6xf32>
    %57 = vector.multi_reduction <maximumf>, %56, %cst_25 [1] : vector<6x16xf32> to vector<6xf32>
    %58 = vector.shape_cast %57 : vector<6xf32> to vector<6x1xf32>
    %59 = vector.broadcast %58 : vector<6x1xf32> to vector<6x16xf32>
    %60 = arith.subf %56, %59 : vector<6x16xf32>
    %61 = math.exp %60 : vector<6x16xf32>
    %cst_26 = arith.constant dense<0.000000e+00> : vector<6xf32>
    %62 = vector.multi_reduction <add>, %61, %cst_26 [1] : vector<6x16xf32> to vector<6xf32>
    %63 = vector.shape_cast %62 : vector<6xf32> to vector<6x1xf32>
    %64 = tpu.reciprocal %63 {approx = true} : vector<6x1xf32> -> vector<6x1xf32>
    %65 = vector.broadcast %64 : vector<6x1xf32> to vector<6x16xf32>
    %66 = arith.mulf %61, %65 : vector<6x16xf32>
    %67 = arith.truncf %66 : vector<6x16xf32> to vector<6x16xbf16>
    %cst_27 = arith.constant dense<0.000000e+00> : vector<6x8xf32>
    %68 = tpu.matmul %67, %53, %cst_27 {dimension_numbers = #tpu.dot_dimension_numbers<[1], [0], [0], [1], [0, 0, 1, 1], [], []>} : vector<6x16xbf16>, vector<16x8xbf16>, vector<6x8xf32> -> vector<6x8xf32>
    %c0_28 = arith.constant 0 : index
    %c16 = arith.constant 16 : index
    %69 = vector.load %arg5[%c0_28, %c16] : memref<32x32xbf16, #tpu.memory_space<vmem>>, vector<32x8xbf16>
    %70 = arith.truncf %68 : vector<6x8xf32> to vector<6x8xbf16>
    %cst_29 = arith.constant dense<0.000000e+00> : vector<6x32xf32>
    %71 = tpu.matmul %70, %69, %cst_29 {dimension_numbers = #tpu.dot_dimension_numbers<[1], [1], [0], [0], [0, 0, 1, 0], [], []>} : vector<6x8xbf16>, vector<32x8xbf16>, vector<6x32xf32> -> vector<6x32xf32>
    %72 = arith.addf %50, %71 : vector<6x32xf32>
    %73 = vector.extract_strided_slice %1 {offsets = [0, 24], sizes = [6, 8], strides = [1, 1]} : vector<6x32xbf16> to vector<6x8xbf16>
    %74 = vector.extract_strided_slice %3 {offsets = [0, 24], sizes = [16, 8], strides = [1, 1]} : vector<16x32xbf16> to vector<16x8xbf16>
    %75 = vector.extract_strided_slice %5 {offsets = [0, 24], sizes = [16, 8], strides = [1, 1]} : vector<16x32xbf16> to vector<16x8xbf16>
    %cst_30 = arith.constant dense<0.000000e+00> : vector<6x16xf32>
    %76 = tpu.matmul %73, %74, %cst_30 {dimension_numbers = #tpu.dot_dimension_numbers<[1], [1], [0], [0], [0, 0, 1, 0], [], []>} : vector<6x8xbf16>, vector<16x8xbf16>, vector<6x16xf32> -> vector<6x16xf32>
    %cst_31 = arith.constant 0.353553385 : f32
    %77 = vector.broadcast %cst_31 : f32 to vector<6x16xf32>
    %78 = arith.mulf %76, %77 : vector<6x16xf32>
    %cst_32 = arith.constant dense<0xFF800000> : vector<6xf32>
    %79 = vector.multi_reduction <maximumf>, %78, %cst_32 [1] : vector<6x16xf32> to vector<6xf32>
    %80 = vector.shape_cast %79 : vector<6xf32> to vector<6x1xf32>
    %81 = vector.broadcast %80 : vector<6x1xf32> to vector<6x16xf32>
    %82 = arith.subf %78, %81 : vector<6x16xf32>
    %83 = math.exp %82 : vector<6x16xf32>
    %cst_33 = arith.constant dense<0.000000e+00> : vector<6xf32>
    %84 = vector.multi_reduction <add>, %83, %cst_33 [1] : vector<6x16xf32> to vector<6xf32>
    %85 = vector.shape_cast %84 : vector<6xf32> to vector<6x1xf32>
    %86 = tpu.reciprocal %85 {approx = true} : vector<6x1xf32> -> vector<6x1xf32>
    %87 = vector.broadcast %86 : vector<6x1xf32> to vector<6x16xf32>
    %88 = arith.mulf %83, %87 : vector<6x16xf32>
    %89 = arith.truncf %88 : vector<6x16xf32> to vector<6x16xbf16>
    %cst_34 = arith.constant dense<0.000000e+00> : vector<6x8xf32>
    %90 = tpu.matmul %89, %75, %cst_34 {dimension_numbers = #tpu.dot_dimension_numbers<[1], [0], [0], [1], [0, 0, 1, 1], [], []>} : vector<6x16xbf16>, vector<16x8xbf16>, vector<6x8xf32> -> vector<6x8xf32>
    %c0_35 = arith.constant 0 : index
    %c24 = arith.constant 24 : index
    %91 = vector.load %arg5[%c0_35, %c24] : memref<32x32xbf16, #tpu.memory_space<vmem>>, vector<32x8xbf16>
    %92 = arith.truncf %90 : vector<6x8xf32> to vector<6x8xbf16>
    %cst_36 = arith.constant dense<0.000000e+00> : vector<6x32xf32>
    %93 = tpu.matmul %92, %91, %cst_36 {dimension_numbers = #tpu.dot_dimension_numbers<[1], [1], [0], [0], [0, 0, 1, 0], [], []>} : vector<6x8xbf16>, vector<32x8xbf16>, vector<6x32xf32> -> vector<6x32xf32>
    %94 = arith.addf %72, %93 : vector<6x32xf32>
    %c0_37 = arith.constant 0 : index
    %c0_38 = arith.constant 0 : index
    %95 = vector.load %arg6[%c0_37, %c0_38] : memref<1x32xf32, #tpu.memory_space<vmem>>, vector<1x32xf32>
    %96 = vector.broadcast %95 : vector<1x32xf32> to vector<6x32xf32>
    %97 = arith.addf %94, %96 : vector<6x32xf32>
    %c0_39 = arith.constant 0 : index
    %c0_40 = arith.constant 0 : index
    %c0_41 = arith.constant 0 : index
    %98 = vector.load %arg4[%c0_39, %c0_40, %c0_41] : memref<1x6x32xbf16, #tpu.memory_space<vmem>>, vector<1x6x32xbf16>
    %99 = vector.shape_cast %98 : vector<1x6x32xbf16> to vector<6x32xbf16>
    %100 = arith.extf %99 : vector<6x32xbf16> to vector<6x32xf32>
    %101 = arith.addf %97, %100 : vector<6x32xf32>
    %cst_42 = arith.constant dense<0.000000e+00> : vector<6xf32>
    %102 = vector.multi_reduction <add>, %101, %cst_42 [1] : vector<6x32xf32> to vector<6xf32>
    %103 = vector.shape_cast %102 : vector<6xf32> to vector<6x1xf32>
    %cst_43 = arith.constant 3.200000e+01 : f32
    %104 = vector.broadcast %cst_43 : f32 to vector<6x1xf32>
    %105 = arith.divf %103, %104 : vector<6x1xf32>
    %106 = vector.broadcast %105 : vector<6x1xf32> to vector<6x32xf32>
    %107 = arith.subf %101, %106 : vector<6x32xf32>
    %108 = arith.mulf %107, %107 : vector<6x32xf32>
    %cst_44 = arith.constant dense<0.000000e+00> : vector<6xf32>
    %109 = vector.multi_reduction <add>, %108, %cst_44 [1] : vector<6x32xf32> to vector<6xf32>
    %110 = vector.shape_cast %109 : vector<6xf32> to vector<6x1xf32>
    %cst_45 = arith.constant 3.200000e+01 : f32
    %111 = vector.broadcast %cst_45 : f32 to vector<6x1xf32>
    %112 = arith.divf %110, %111 : vector<6x1xf32>
    %cst_46 = arith.constant 9.99999974E-6 : f32
    %113 = vector.broadcast %cst_46 : f32 to vector<6x1xf32>
    %114 = arith.addf %112, %113 : vector<6x1xf32>
    %115 = math.rsqrt %114 : vector<6x1xf32>
    %116 = vector.broadcast %115 : vector<6x1xf32> to vector<6x32xf32>
    %117 = arith.mulf %107, %116 : vector<6x32xf32>
    %c0_47 = arith.constant 0 : index
    %c0_48 = arith.constant 0 : index
    %118 = vector.load %arg7[%c0_47, %c0_48] : memref<1x32xf32, #tpu.memory_space<vmem>>, vector<1x32xf32>
    %119 = vector.broadcast %118 : vector<1x32xf32> to vector<6x32xf32>
    %120 = arith.mulf %117, %119 : vector<6x32xf32>
    %c0_49 = arith.constant 0 : index
    %c0_50 = arith.constant 0 : index
    %121 = vector.load %arg8[%c0_49, %c0_50] : memref<1x32xf32, #tpu.memory_space<vmem>>, vector<1x32xf32>
    %122 = vector.broadcast %121 : vector<1x32xf32> to vector<6x32xf32>
    %123 = arith.addf %120, %122 : vector<6x32xf32>
    %124 = arith.truncf %123 : vector<6x32xf32> to vector<6x32xbf16>
    %c0_51 = arith.constant 0 : index
    %c0_52 = arith.constant 0 : index
    %c0_53 = arith.constant 0 : index
    %125 = vector.load %arg9[%c0_51, %c0_52, %c0_53] : memref<1x6x32xbf16, #tpu.memory_space<vmem>>, vector<1x6x32xbf16>
    %126 = vector.shape_cast %125 : vector<1x6x32xbf16> to vector<6x32xbf16>
    %127 = vector.shape_cast %124 : vector<6x32xbf16> to vector<1x6x32xbf16>
    tpu.vector_store %arg9[%c0_51, %c0_52, %c0_53], %127 {strides = array<i32>} : memref<1x6x32xbf16, #tpu.memory_space<vmem>>, vector<1x6x32xbf16>,
    return
  }
  func.func @transform_0(%arg0: i32) -> (i32, i32, i32) {
    %c0_i32 = arith.constant 0 : i32
    %c0_i32_0 = arith.constant 0 : i32
    %c0_i32_1 = arith.constant 0 : i32
    return %arg0, %c0_i32, %c0_i32_0 : i32, i32, i32
  }
  func.func @transform_1(%arg0: i32) -> (i32, i32, i32) {
    %c0_i32 = arith.constant 0 : i32
    %c0_i32_0 = arith.constant 0 : i32
    %c0_i32_1 = arith.constant 0 : i32
    return %arg0, %c0_i32, %c0_i32_0 : i32, i32, i32
  }
  func.func @transform_2(%arg0: i32) -> (i32, i32, i32) {
    %c0_i32 = arith.constant 0 : i32
    %c0_i32_0 = arith.constant 0 : i32
    %c0_i32_1 = arith.constant 0 : i32
    return %arg0, %c0_i32, %c0_i32_0 : i32, i32, i32
  }
  func.func @transform_3(%arg0: i32) -> (i32, i32, i32) {
    %c0_i32 = arith.constant 0 : i32
    %c0_i32_0 = arith.constant 0 : i32
    %c0_i32_1 = arith.constant 0 : i32
    return %arg0, %c0_i32, %c0_i32_0 : i32, i32, i32
  }
  func.func @transform_4(%arg0: i32) -> (i32, i32) {
    %c0_i32 = arith.constant 0 : i32
    %c0_i32_0 = arith.constant 0 : i32
    %c0_i32_1 = arith.constant 0 : i32
    return %c0_i32, %c0_i32_0 : i32, i32
  }
  func.func @transform_5(%arg0: i32) -> (i32, i32) {
    %c0_i32 = arith.constant 0 : i32
    %c0_i32_0 = arith.constant 0 : i32
    %c0_i32_1 = arith.constant 0 : i32
    return %c0_i32, %c0_i32_0 : i32, i32
  }
  func.func @transform_6(%arg0: i32) -> (i32, i32) {
    %c0_i32 = arith.constant 0 : i32
    %c0_i32_0 = arith.constant 0 : i32
    %c0_i32_1 = arith.constant 0 : i32
    return %c0_i32, %c0_i32_0 : i32, i32
  }
  func.func @transform_7(%arg0: i32) -> (i32, i32) {
    %c0_i32 = arith.constant 0 : i32
    %c0_i32_0 = arith.constant 0 : i32
    %c0_i32_1 = arith.constant 0 : i32
    return %c0_i32, %c0_i32_0 : i32, i32
  }
  func.func @transform_8(%arg0: i32) -> (i32, i32, i32) {
    %c0_i32 = arith.constant 0 : i32
    %c0_i32_0 = arith.constant 0 : i32
    %c0_i32_1 = arith.constant 0 : i32
    return %arg0, %c0_i32, %c0_i32_0 : i32, i32, i32
  }
}

module attributes {stable_mosaic.version = 11 : i64} {
  func.func @_ln_kernel(%arg0: i32, %arg1: memref<12x32xbf16, #tpu.memory_space<vmem>>, %arg2: memref<1x32xf32, #tpu.memory_space<vmem>>, %arg3: memref<1x32xf32, #tpu.memory_space<vmem>>, %arg4: memref<12x32xbf16, #tpu.memory_space<vmem>>) attributes {dimension_semantics = [#tpu.dimension_semantics<parallel>], iteration_bounds = array<i64: 1>, scalar_prefetch = 0 : i64, scratch_operands = 0 : i64, tpu.core_type = #tpu.core_type<tc>, window_params = [{transform_indices = @transform_0, window_bounds = array<i64: 12, 32>}, {pipeline_mode = #tpu.pipeline_mode<synchronous>, transform_indices = @transform_1, window_bounds = array<i64: 1, 32>}, {pipeline_mode = #tpu.pipeline_mode<synchronous>, transform_indices = @transform_2, window_bounds = array<i64: 1, 32>}, {transform_indices = @transform_3, window_bounds = array<i64: 12, 32>}]} {
    %c0 = arith.constant 0 : index
    %c0_0 = arith.constant 0 : index
    %0 = vector.load %arg1[%c0, %c0_0] : memref<12x32xbf16, #tpu.memory_space<vmem>>, vector<12x32xbf16>
    %1 = arith.extf %0 : vector<12x32xbf16> to vector<12x32xf32>
    %cst = arith.constant dense<0.000000e+00> : vector<12xf32>
    %2 = vector.multi_reduction <add>, %1, %cst [1] : vector<12x32xf32> to vector<12xf32>
    %3 = vector.shape_cast %2 : vector<12xf32> to vector<12x1xf32>
    %cst_1 = arith.constant 3.200000e+01 : f32
    %4 = vector.broadcast %cst_1 : f32 to vector<12x1xf32>
    %5 = arith.divf %3, %4 : vector<12x1xf32>
    %6 = vector.broadcast %5 : vector<12x1xf32> to vector<12x32xf32>
    %7 = arith.subf %1, %6 : vector<12x32xf32>
    %8 = arith.mulf %7, %7 : vector<12x32xf32>
    %cst_2 = arith.constant dense<0.000000e+00> : vector<12xf32>
    %9 = vector.multi_reduction <add>, %8, %cst_2 [1] : vector<12x32xf32> to vector<12xf32>
    %10 = vector.shape_cast %9 : vector<12xf32> to vector<12x1xf32>
    %cst_3 = arith.constant 3.200000e+01 : f32
    %11 = vector.broadcast %cst_3 : f32 to vector<12x1xf32>
    %12 = arith.divf %10, %11 : vector<12x1xf32>
    %cst_4 = arith.constant 9.99999974E-6 : f32
    %13 = vector.broadcast %cst_4 : f32 to vector<12x1xf32>
    %14 = arith.addf %12, %13 : vector<12x1xf32>
    %15 = math.rsqrt %14 : vector<12x1xf32>
    %16 = vector.broadcast %15 : vector<12x1xf32> to vector<12x32xf32>
    %17 = arith.mulf %7, %16 : vector<12x32xf32>
    %c0_5 = arith.constant 0 : index
    %c0_6 = arith.constant 0 : index
    %18 = vector.load %arg2[%c0_5, %c0_6] : memref<1x32xf32, #tpu.memory_space<vmem>>, vector<1x32xf32>
    %19 = vector.broadcast %18 : vector<1x32xf32> to vector<12x32xf32>
    %20 = arith.mulf %17, %19 : vector<12x32xf32>
    %c0_7 = arith.constant 0 : index
    %c0_8 = arith.constant 0 : index
    %21 = vector.load %arg3[%c0_7, %c0_8] : memref<1x32xf32, #tpu.memory_space<vmem>>, vector<1x32xf32>
    %22 = vector.broadcast %21 : vector<1x32xf32> to vector<12x32xf32>
    %23 = arith.addf %20, %22 : vector<12x32xf32>
    %24 = arith.truncf %23 : vector<12x32xf32> to vector<12x32xbf16>
    %c0_9 = arith.constant 0 : index
    %c0_10 = arith.constant 0 : index
    %25 = vector.load %arg4[%c0_9, %c0_10] : memref<12x32xbf16, #tpu.memory_space<vmem>>, vector<12x32xbf16>
    tpu.vector_store %arg4[%c0_9, %c0_10], %24 {strides = array<i32>} : memref<12x32xbf16, #tpu.memory_space<vmem>>, vector<12x32xbf16>,
    return
  }
  func.func @transform_0(%arg0: i32) -> (i32, i32) {
    %c0_i32 = arith.constant 0 : i32
    %c0_i32_0 = arith.constant 0 : i32
    return %arg0, %c0_i32 : i32, i32
  }
  func.func @transform_1(%arg0: i32) -> (i32, i32) {
    %c0_i32 = arith.constant 0 : i32
    %c0_i32_0 = arith.constant 0 : i32
    %c0_i32_1 = arith.constant 0 : i32
    return %c0_i32, %c0_i32_0 : i32, i32
  }
  func.func @transform_2(%arg0: i32) -> (i32, i32) {
    %c0_i32 = arith.constant 0 : i32
    %c0_i32_0 = arith.constant 0 : i32
    %c0_i32_1 = arith.constant 0 : i32
    return %c0_i32, %c0_i32_0 : i32, i32
  }
  func.func @transform_3(%arg0: i32) -> (i32, i32) {
    %c0_i32 = arith.constant 0 : i32
    %c0_i32_0 = arith.constant 0 : i32
    return %arg0, %c0_i32 : i32, i32
  }
}

module attributes {stable_mosaic.version = 11 : i64} {
  func.func @_ffn_kernel(%arg0: i32, %arg1: memref<12x32xbf16, #tpu.memory_space<vmem>>, %arg2: memref<64x32xbf16, #tpu.memory_space<vmem>>, %arg3: memref<1x64xf32, #tpu.memory_space<vmem>>, %arg4: memref<32x64xbf16, #tpu.memory_space<vmem>>, %arg5: memref<1x32xf32, #tpu.memory_space<vmem>>, %arg6: memref<1x32xf32, #tpu.memory_space<vmem>>, %arg7: memref<1x32xf32, #tpu.memory_space<vmem>>, %arg8: memref<12x32xbf16, #tpu.memory_space<vmem>>) attributes {dimension_semantics = [#tpu.dimension_semantics<parallel>], iteration_bounds = array<i64: 1>, scalar_prefetch = 0 : i64, scratch_operands = 0 : i64, tpu.core_type = #tpu.core_type<tc>, window_params = [{transform_indices = @transform_0, window_bounds = array<i64: 12, 32>}, {pipeline_mode = #tpu.pipeline_mode<synchronous>, transform_indices = @transform_1, window_bounds = array<i64: 64, 32>}, {pipeline_mode = #tpu.pipeline_mode<synchronous>, transform_indices = @transform_2, window_bounds = array<i64: 1, 64>}, {pipeline_mode = #tpu.pipeline_mode<synchronous>, transform_indices = @transform_3, window_bounds = array<i64: 32, 64>}, {pipeline_mode = #tpu.pipeline_mode<synchronous>, transform_indices = @transform_4, window_bounds = array<i64: 1, 32>}, {pipeline_mode = #tpu.pipeline_mode<synchronous>, transform_indices = @transform_5, window_bounds = array<i64: 1, 32>}, {pipeline_mode = #tpu.pipeline_mode<synchronous>, transform_indices = @transform_6, window_bounds = array<i64: 1, 32>}, {transform_indices = @transform_7, window_bounds = array<i64: 12, 32>}]} {
    %c0 = arith.constant 0 : index
    %c0_0 = arith.constant 0 : index
    %0 = vector.load %arg1[%c0, %c0_0] : memref<12x32xbf16, #tpu.memory_space<vmem>>, vector<12x32xbf16>
    %c0_1 = arith.constant 0 : index
    %c0_2 = arith.constant 0 : index
    %1 = vector.load %arg2[%c0_1, %c0_2] : memref<64x32xbf16, #tpu.memory_space<vmem>>, vector<64x32xbf16>
    %cst = arith.constant dense<0.000000e+00> : vector<12x64xf32>
    %2 = tpu.matmul %0, %1, %cst {dimension_numbers = #tpu.dot_dimension_numbers<[1], [1], [0], [0], [0, 0, 1, 0], [], []>} : vector<12x32xbf16>, vector<64x32xbf16>, vector<12x64xf32> -> vector<12x64xf32>
    %c0_3 = arith.constant 0 : index
    %c0_4 = arith.constant 0 : index
    %3 = vector.load %arg3[%c0_3, %c0_4] : memref<1x64xf32, #tpu.memory_space<vmem>>, vector<1x64xf32>
    %4 = vector.broadcast %3 : vector<1x64xf32> to vector<12x64xf32>
    %5 = arith.addf %2, %4 : vector<12x64xf32>
    %cst_5 = arith.constant 0.000000e+00 : f32
    %6 = vector.broadcast %cst_5 : f32 to vector<12x64xf32>
    %7 = arith.maximumf %5, %6 : vector<12x64xf32>
    %8 = arith.truncf %7 : vector<12x64xf32> to vector<12x64xbf16>
    %c0_6 = arith.constant 0 : index
    %c0_7 = arith.constant 0 : index
    %9 = vector.load %arg4[%c0_6, %c0_7] : memref<32x64xbf16, #tpu.memory_space<vmem>>, vector<32x64xbf16>
    %cst_8 = arith.constant dense<0.000000e+00> : vector<12x32xf32>
    %10 = tpu.matmul %8, %9, %cst_8 {dimension_numbers = #tpu.dot_dimension_numbers<[1], [1], [0], [0], [0, 0, 1, 0], [], []>} : vector<12x64xbf16>, vector<32x64xbf16>, vector<12x32xf32> -> vector<12x32xf32>
    %c0_9 = arith.constant 0 : index
    %c0_10 = arith.constant 0 : index
    %11 = vector.load %arg5[%c0_9, %c0_10] : memref<1x32xf32, #tpu.memory_space<vmem>>, vector<1x32xf32>
    %12 = vector.broadcast %11 : vector<1x32xf32> to vector<12x32xf32>
    %13 = arith.addf %10, %12 : vector<12x32xf32>
    %14 = arith.extf %0 : vector<12x32xbf16> to vector<12x32xf32>
    %15 = arith.addf %13, %14 : vector<12x32xf32>
    %cst_11 = arith.constant dense<0.000000e+00> : vector<12xf32>
    %16 = vector.multi_reduction <add>, %15, %cst_11 [1] : vector<12x32xf32> to vector<12xf32>
    %17 = vector.shape_cast %16 : vector<12xf32> to vector<12x1xf32>
    %cst_12 = arith.constant 3.200000e+01 : f32
    %18 = vector.broadcast %cst_12 : f32 to vector<12x1xf32>
    %19 = arith.divf %17, %18 : vector<12x1xf32>
    %20 = vector.broadcast %19 : vector<12x1xf32> to vector<12x32xf32>
    %21 = arith.subf %15, %20 : vector<12x32xf32>
    %22 = arith.mulf %21, %21 : vector<12x32xf32>
    %cst_13 = arith.constant dense<0.000000e+00> : vector<12xf32>
    %23 = vector.multi_reduction <add>, %22, %cst_13 [1] : vector<12x32xf32> to vector<12xf32>
    %24 = vector.shape_cast %23 : vector<12xf32> to vector<12x1xf32>
    %cst_14 = arith.constant 3.200000e+01 : f32
    %25 = vector.broadcast %cst_14 : f32 to vector<12x1xf32>
    %26 = arith.divf %24, %25 : vector<12x1xf32>
    %cst_15 = arith.constant 9.99999974E-6 : f32
    %27 = vector.broadcast %cst_15 : f32 to vector<12x1xf32>
    %28 = arith.addf %26, %27 : vector<12x1xf32>
    %29 = math.rsqrt %28 : vector<12x1xf32>
    %30 = vector.broadcast %29 : vector<12x1xf32> to vector<12x32xf32>
    %31 = arith.mulf %21, %30 : vector<12x32xf32>
    %c0_16 = arith.constant 0 : index
    %c0_17 = arith.constant 0 : index
    %32 = vector.load %arg6[%c0_16, %c0_17] : memref<1x32xf32, #tpu.memory_space<vmem>>, vector<1x32xf32>
    %33 = vector.broadcast %32 : vector<1x32xf32> to vector<12x32xf32>
    %34 = arith.mulf %31, %33 : vector<12x32xf32>
    %c0_18 = arith.constant 0 : index
    %c0_19 = arith.constant 0 : index
    %35 = vector.load %arg7[%c0_18, %c0_19] : memref<1x32xf32, #tpu.memory_space<vmem>>, vector<1x32xf32>
    %36 = vector.broadcast %35 : vector<1x32xf32> to vector<12x32xf32>
    %37 = arith.addf %34, %36 : vector<12x32xf32>
    %38 = arith.truncf %37 : vector<12x32xf32> to vector<12x32xbf16>
    %c0_20 = arith.constant 0 : index
    %c0_21 = arith.constant 0 : index
    %39 = vector.load %arg8[%c0_20, %c0_21] : memref<12x32xbf16, #tpu.memory_space<vmem>>, vector<12x32xbf16>
    tpu.vector_store %arg8[%c0_20, %c0_21], %38 {strides = array<i32>} : memref<12x32xbf16, #tpu.memory_space<vmem>>, vector<12x32xbf16>,
    return
  }
  func.func @transform_0(%arg0: i32) -> (i32, i32) {
    %c0_i32 = arith.constant 0 : i32
    %c0_i32_0 = arith.constant 0 : i32
    return %arg0, %c0_i32 : i32, i32
  }
  func.func @transform_1(%arg0: i32) -> (i32, i32) {
    %c0_i32 = arith.constant 0 : i32
    %c0_i32_0 = arith.constant 0 : i32
    %c0_i32_1 = arith.constant 0 : i32
    return %c0_i32, %c0_i32_0 : i32, i32
  }
  func.func @transform_2(%arg0: i32) -> (i32, i32) {
    %c0_i32 = arith.constant 0 : i32
    %c0_i32_0 = arith.constant 0 : i32
    %c0_i32_1 = arith.constant 0 : i32
    return %c0_i32, %c0_i32_0 : i32, i32
  }
  func.func @transform_3(%arg0: i32) -> (i32, i32) {
    %c0_i32 = arith.constant 0 : i32
    %c0_i32_0 = arith.constant 0 : i32
    %c0_i32_1 = arith.constant 0 : i32
    return %c0_i32, %c0_i32_0 : i32, i32
  }
  func.func @transform_4(%arg0: i32) -> (i32, i32) {
    %c0_i32 = arith.constant 0 : i32
    %c0_i32_0 = arith.constant 0 : i32
    %c0_i32_1 = arith.constant 0 : i32
    return %c0_i32, %c0_i32_0 : i32, i32
  }
  func.func @transform_5(%arg0: i32) -> (i32, i32) {
    %c0_i32 = arith.constant 0 : i32
    %c0_i32_0 = arith.constant 0 : i32
    %c0_i32_1 = arith.constant 0 : i32
    return %c0_i32, %c0_i32_0 : i32, i32
  }
  func.func @transform_6(%arg0: i32) -> (i32, i32) {
    %c0_i32 = arith.constant 0 : i32
    %c0_i32_0 = arith.constant 0 : i32
    %c0_i32_1 = arith.constant 0 : i32
    return %c0_i32, %c0_i32_0 : i32, i32
  }
  func.func @transform_7(%arg0: i32) -> (i32, i32) {
    %c0_i32 = arith.constant 0 : i32
    %c0_i32_0 = arith.constant 0 : i32
    return %arg0, %c0_i32 : i32, i32
  }
}

module attributes {stable_mosaic.version = 11 : i64} {
  func.func @_linear_kernel(%arg0: i32, %arg1: i32, %arg2: i32, %arg3: memref<2x192xbf16, #tpu.memory_space<vmem>>, %arg4: memref<6x192xbf16, #tpu.memory_space<vmem>>, %arg5: memref<1x6xf32, #tpu.memory_space<vmem>>, %arg6: memref<2x6xf32, #tpu.memory_space<vmem>>, %arg7: memref<2x6xf32, #tpu.memory_space<vmem>>) attributes {dimension_semantics = [#tpu.dimension_semantics<parallel>, #tpu.dimension_semantics<parallel>, #tpu.dimension_semantics<arbitrary>], iteration_bounds = array<i64: 1, 1, 1>, scalar_prefetch = 0 : i64, scratch_operands = 1 : i64, tpu.core_type = #tpu.core_type<tc>, window_params = [{transform_indices = @transform_0, window_bounds = array<i64: 2, 192>}, {transform_indices = @transform_1, window_bounds = array<i64: 6, 192>}, {transform_indices = @transform_2, window_bounds = array<i64: 1, 6>}, {transform_indices = @transform_3, window_bounds = array<i64: 2, 6>}]} {
    %c0_i32 = arith.constant 0 : i32
    %0 = arith.cmpi eq, %arg2, %c0_i32 : i32
    %1 = arith.extui %0 : i1 to i32
    %c0_i32_0 = arith.constant 0 : i32
    %2 = arith.cmpi ne, %1, %c0_i32_0 : i32
    scf.if %2 {
      %cst_10 = arith.constant 0.000000e+00 : f32
      %12 = vector.broadcast %cst_10 : f32 to vector<2x6xf32>
      %c0_11 = arith.constant 0 : index
      %c0_12 = arith.constant 0 : index
      %13 = vector.load %arg7[%c0_11, %c0_12] : memref<2x6xf32, #tpu.memory_space<vmem>>, vector<2x6xf32>
      tpu.vector_store %arg7[%c0_11, %c0_12], %12 {strides = array<i32>} : memref<2x6xf32, #tpu.memory_space<vmem>>, vector<2x6xf32>,
    } else {
    }
    %c0 = arith.constant 0 : index
    %c0_1 = arith.constant 0 : index
    %3 = vector.load %arg7[%c0, %c0_1] : memref<2x6xf32, #tpu.memory_space<vmem>>, vector<2x6xf32>
    %c0_2 = arith.constant 0 : index
    %c0_3 = arith.constant 0 : index
    %4 = vector.load %arg3[%c0_2, %c0_3] : memref<2x192xbf16, #tpu.memory_space<vmem>>, vector<2x192xbf16>
    %c0_4 = arith.constant 0 : index
    %c0_5 = arith.constant 0 : index
    %5 = vector.load %arg4[%c0_4, %c0_5] : memref<6x192xbf16, #tpu.memory_space<vmem>>, vector<6x192xbf16>
    %cst = arith.constant dense<0.000000e+00> : vector<2x6xf32>
    %6 = tpu.matmul %4, %5, %cst {dimension_numbers = #tpu.dot_dimension_numbers<[1], [1], [0], [0], [0, 0, 1, 0], [], []>} : vector<2x192xbf16>, vector<6x192xbf16>, vector<2x6xf32> -> vector<2x6xf32>
    %7 = arith.addf %3, %6 : vector<2x6xf32>
    %c0_6 = arith.constant 0 : index
    %c0_7 = arith.constant 0 : index
    %8 = vector.load %arg7[%c0_6, %c0_7] : memref<2x6xf32, #tpu.memory_space<vmem>>, vector<2x6xf32>
    tpu.vector_store %arg7[%c0_6, %c0_7], %7 {strides = array<i32>} : memref<2x6xf32, #tpu.memory_space<vmem>>, vector<2x6xf32>,
    %c0_i32_8 = arith.constant 0 : i32
    %9 = arith.cmpi eq, %arg2, %c0_i32_8 : i32
    %10 = arith.extui %9 : i1 to i32
    %c0_i32_9 = arith.constant 0 : i32
    %11 = arith.cmpi ne, %10, %c0_i32_9 : i32
    scf.if %11 {
      %c0_10 = arith.constant 0 : index
      %c0_11 = arith.constant 0 : index
      %12 = vector.load %arg7[%c0_10, %c0_11] : memref<2x6xf32, #tpu.memory_space<vmem>>, vector<2x6xf32>
      %c0_12 = arith.constant 0 : index
      %c0_13 = arith.constant 0 : index
      %13 = vector.load %arg5[%c0_12, %c0_13] : memref<1x6xf32, #tpu.memory_space<vmem>>, vector<1x6xf32>
      %14 = vector.broadcast %13 : vector<1x6xf32> to vector<2x6xf32>
      %15 = arith.addf %12, %14 : vector<2x6xf32>
      %c0_14 = arith.constant 0 : index
      %c0_15 = arith.constant 0 : index
      %16 = vector.load %arg6[%c0_14, %c0_15] : memref<2x6xf32, #tpu.memory_space<vmem>>, vector<2x6xf32>
      tpu.vector_store %arg6[%c0_14, %c0_15], %15 {strides = array<i32>} : memref<2x6xf32, #tpu.memory_space<vmem>>, vector<2x6xf32>,
    } else {
    }
    return
  }
  func.func @transform_0(%arg0: i32, %arg1: i32, %arg2: i32) -> (i32, i32) {
    %c0_i32 = arith.constant 0 : i32
    return %arg0, %arg2 : i32, i32
  }
  func.func @transform_1(%arg0: i32, %arg1: i32, %arg2: i32) -> (i32, i32) {
    %c0_i32 = arith.constant 0 : i32
    return %arg1, %arg2 : i32, i32
  }
  func.func @transform_2(%arg0: i32, %arg1: i32, %arg2: i32) -> (i32, i32) {
    %c0_i32 = arith.constant 0 : i32
    %c0_i32_0 = arith.constant 0 : i32
    return %c0_i32, %arg1 : i32, i32
  }
  func.func @transform_3(%arg0: i32, %arg1: i32, %arg2: i32) -> (i32, i32) {
    %c0_i32 = arith.constant 0 : i32
    return %arg0, %arg1 : i32, i32
  }
}

</mosaic_0001>

<bundles_post_ra>
// kernel: forward.20
= control target key start
LH: loop header
LB: loop body
LE: loop exit
PB: predicated region body
PF: predicated region fallthrough
CT: control target
= control target key end

     0   :  { %vm56_vm0 = vcmask 392192   ;;  %vm19_vm1 = vcmask 261120   ;;  %v204_v1 = vmov 0.0   ;;  %vm161_vm2 = vcmask 257024   ;;  %s266_s1 = inlined_call_operand.vmem [shape: bf16[32,48], index: 1, kind: input, shape index: {}]   ;;  %s267_s0 = inlined_call_operand.vmem [shape: bf16[32,48], index: 0, kind: input, shape index: {}]   ;;  %s268_s2 = inlined_call_operand.vmem [shape: f32[1,32], index: 2, kind: input, shape index: {}]   ;;  %s269_s3 = inlined_call_operand.vmem [shape: bf16[32,32], index: 3, kind: output, shape index: {}]  }
   0x1   :  { %v200_v0 = vld [vmem:[%s266_s1 + $0x8] sm:$0xff]   ;;  %22 = vst.msk [vmem:[#allocation2 + $0x10] sm:$0xff] %vm19_vm1, %v204_v1  ;;  %20 = vst.msk [vmem:[#allocation2] sm:$0xff] %vm19_vm1, %v204_v1  ;;  %v201_v2 = vld [vmem:[%s266_s1] sm:$0xff]  }
   0x2   :  { %21 = vst.msk [vmem:[#allocation2 + $0x8] sm:$0xff] %vm19_vm1, %v204_v1  ;;  %23 = vst.msk [vmem:[#allocation2 + $0x18] sm:$0xff] %vm19_vm1, %v204_v1  ;;  %197 = vmatprep.subr.msk.bf16.mxu0 %vm56_vm0, %v200_v0  ;;  %v67_v3 = vsel %vm56_vm0, %v200_v0, 0  ;;  %v202_v4 = vld [vmem:[%s267_s0] sm:$0xff]   ;;  %v64_v5 = vsel %vm56_vm0, %v201_v2, 0  ;;  %v203_v6 = vld [vmem:[%s267_s0 + $0x8] sm:$0xff]  }
   0x3   :  { %190 = vmatpush3.bf16.xpose.msra.mxu0 %v67_v3  ;;  %193 = vmatprep.mubr.msk.bf16.mxu0 %vm56_vm0, %v202_v4  ;;  %v176_v19 = vld [vmem:[%s268_s2] ss:$0 sm:$0xff] }
   0x4   :  { %198 = vmatprep.subr.msk.bf16.mxu0 %vm56_vm0, %v201_v2 }
   0x8   :  { %v26_v7 = vld [vmem:[#allocation2 + $0x10] sm:$0xff]  ;;  %v24_v9 = vld [vmem:[#allocation2] sm:$0xff] }
   0x9   :  { %v27_v12 = vld [vmem:[#allocation2 + $0x18] sm:$0xff]  ;;  %v25_v15 = vld [vmem:[#allocation2 + $0x8] sm:$0xff] }
   0xb   :  { %192 = vmatpush3.bf16.xpose.msra.mxu0 %v64_v5 }
  0x12   :  { %194 = vmatmul.mubr.msk.bf16.vlgmr.msra.gmra.mxu0 %vm56_vm0, %v203_v6 }
  0xd2   :  { %v195_v8 = vpop.f32.mrf.mxu0 }
  0xd3   :  { %v120_v10 = vadd.f32 %v195_v8, %v26_v7 }
  0xd4   :  { %v103_v11 = vpop.f32.mrf.mxu0 }
  0xd5   :  { %125 = vst.msk [vmem:[#allocation2 + $0x10] sm:$0xff] %vm19_vm1, %v120_v10  ;;  %v118_v13 = vadd.f32 %v103_v11, %v24_v9 }
  0xd6   :  { %v196_v14 = vpop.f32.mrf.mxu0 }
  0xd7   :  { %123 = vst.msk [vmem:[#allocation2] sm:$0xff] %vm19_vm1, %v118_v13  ;;  %v121_v16 = vadd.f32 %v196_v14, %v27_v12 }
  0xd8   :  { %v106_v17 = vpop.f32.mrf.mxu0 }
  0xd9   :  { %126 = vst.msk [vmem:[#allocation2 + $0x18] sm:$0xff] %vm19_vm1, %v121_v16  ;;  %v119_v18 = vadd.f32 %v106_v17, %v25_v15 }
  0xdb   :  { %124 = vst.msk [vmem:[#allocation2 + $0x8] sm:$0xff] %vm19_vm1, %v119_v18 }
  0xdc   :  { %v132_v20 = vld [vmem:[#allocation2 + $0x10] sm:$0xff] }
  0xdd   :  { %v143_v21 = vadd.f32 %v176_v19, %v132_v20 }
  0xde   :  { %v130_v22 = vld [vmem:[#allocation2] sm:$0xff] }
  0xdf   :  { %v183_v23 = vpack.c.bf16 %v143_v21, %v143_v21  ;;  %v141_v24 = vadd.f32 %v176_v19, %v130_v22 }
  0xe0   :  { %v133_v25 = vld [vmem:[#allocation2 + $0x18] sm:$0xff] }
  0xe1   :  { %164 = vst.msk [vmem:[%s269_s3 + $0x8] sm:$0xf] %vm161_vm2, %v183_v23  ;;  %v181_v26 = vpack.c.bf16 %v141_v24, %v141_v24  ;;  %v144_v27 = vadd.f32 %v176_v19, %v133_v25 }
  0xe2   :  { %v131_v28 = vld [vmem:[#allocation2 + $0x8] sm:$0xff] }
  0xe3   :  { %162 = vst.msk [vmem:[%s269_s3] sm:$0xf] %vm161_vm2, %v181_v26  ;;  %v184_v29 = vpack.c.bf16 %v144_v27, %v144_v27  ;;  %v142_v30 = vadd.f32 %v176_v19, %v131_v28 }
  0xe5   :  { %165 = vst.msk [vmem:[%s269_s3 + $0xc] sm:$0xf] %vm161_vm2, %v184_v29  ;;  %v182_v31 = vpack.c.bf16 %v142_v30, %v142_v30 }
  0xe7   :  { %163 = vst.msk [vmem:[%s269_s3 + $0x4] sm:$0xf] %vm161_vm2, %v182_v31 }

// kernel: forward.21
= control target key start
LH: loop header
LB: loop body
LE: loop exit
PB: predicated region body
PF: predicated region fallthrough
CT: control target
= control target key end

     0   :  { %vm19_vm0 = vcmask 261120   ;;  %v203_v1 = vmov 0.0   ;;  %vm160_vm1 = vcmask 257024   ;;  %s265_s1 = inlined_call_operand.vmem [shape: bf16[32,32], index: 1, kind: input, shape index: {}]   ;;  %s266_s0 = inlined_call_operand.vmem [shape: bf16[32,32], index: 0, kind: input, shape index: {}]   ;;  %s267_s2 = inlined_call_operand.vmem [shape: f32[1,32], index: 2, kind: input, shape index: {}]   ;;  %s268_s3 = inlined_call_operand.vmem [shape: bf16[32,32], index: 3, kind: output, shape index: {}]  }
   0x1   :  { %v199_v0 = vld [vmem:[%s265_s1 + $0x8] sm:$0xff]   ;;  %22 = vst.msk [vmem:[#allocation2 + $0x10] sm:$0xff] %vm19_vm0, %v203_v1  ;;  %20 = vst.msk [vmem:[#allocation2] sm:$0xff] %vm19_vm0, %v203_v1  ;;  %v200_v2 = vld [vmem:[%s265_s1] sm:$0xff]  }
   0x2   :  { %21 = vst.msk [vmem:[#allocation2 + $0x8] sm:$0xff] %vm19_vm0, %v203_v1  ;;  %23 = vst.msk [vmem:[#allocation2 + $0x18] sm:$0xff] %vm19_vm0, %v203_v1  ;;  %196 = vmatprep.subr.msk.bf16.mxu0 %vm19_vm0, %v199_v0  ;;  %v67_v3 = vsel %vm19_vm0, %v199_v0, 0  ;;  %v201_v4 = vld [vmem:[%s266_s0] sm:$0xff]   ;;  %v64_v5 = vsel %vm19_vm0, %v200_v2, 0  ;;  %v202_v6 = vld [vmem:[%s266_s0 + $0x8] sm:$0xff]  }
   0x3   :  { %189 = vmatpush3.bf16.xpose.msra.mxu0 %v67_v3  ;;  %192 = vmatprep.mubr.msk.bf16.mxu0 %vm19_vm0, %v201_v4  ;;  %v175_v19 = vld [vmem:[%s267_s2] ss:$0 sm:$0xff] }
   0x4   :  { %197 = vmatprep.subr.msk.bf16.mxu0 %vm19_vm0, %v200_v2 }
   0x8   :  { %v26_v7 = vld [vmem:[#allocation2 + $0x10] sm:$0xff]  ;;  %v24_v9 = vld [vmem:[#allocation2] sm:$0xff] }
   0x9   :  { %v27_v12 = vld [vmem:[#allocation2 + $0x18] sm:$0xff]  ;;  %v25_v15 = vld [vmem:[#allocation2 + $0x8] sm:$0xff] }
   0xb   :  { %191 = vmatpush3.bf16.xpose.msra.mxu0 %v64_v5 }
  0x12   :  { %193 = vmatmul.mubr.msk.bf16.vlgmr.msra.gmra.mxu0 %vm19_vm0, %v202_v6 }
  0xd2   :  { %v194_v8 = vpop.f32.mrf.mxu0 }
  0xd3   :  { %v120_v10 = vadd.f32 %v194_v8, %v26_v7 }
  0xd4   :  { %v103_v11 = vpop.f32.mrf.mxu0 }
  0xd5   :  { %124 = vst.msk [vmem:[#allocation2 + $0x10] sm:$0xff] %vm19_vm0, %v120_v10  ;;  %v118_v13 = vadd.f32 %v103_v11, %v24_v9 }
  0xd6   :  { %v195_v14 = vpop.f32.mrf.mxu0 }
  0xd7   :  { %122 = vst.msk [vmem:[#allocation2] sm:$0xff] %vm19_vm0, %v118_v13  ;;  %v121_v16 = vadd.f32 %v195_v14, %v27_v12 }
  0xd8   :  { %v106_v17 = vpop.f32.mrf.mxu0 }
  0xd9   :  { %125 = vst.msk [vmem:[#allocation2 + $0x18] sm:$0xff] %vm19_vm0, %v121_v16  ;;  %v119_v18 = vadd.f32 %v106_v17, %v25_v15 }
  0xdb   :  { %123 = vst.msk [vmem:[#allocation2 + $0x8] sm:$0xff] %vm19_vm0, %v119_v18 }
  0xdc   :  { %v131_v20 = vld [vmem:[#allocation2 + $0x10] sm:$0xff] }
  0xdd   :  { %v142_v21 = vadd.f32 %v175_v19, %v131_v20 }
  0xde   :  { %v129_v22 = vld [vmem:[#allocation2] sm:$0xff] }
  0xdf   :  { %v182_v23 = vpack.c.bf16 %v142_v21, %v142_v21  ;;  %v140_v24 = vadd.f32 %v175_v19, %v129_v22 }
  0xe0   :  { %v132_v25 = vld [vmem:[#allocation2 + $0x18] sm:$0xff] }
  0xe1   :  { %163 = vst.msk [vmem:[%s268_s3 + $0x8] sm:$0xf] %vm160_vm1, %v182_v23  ;;  %v180_v26 = vpack.c.bf16 %v140_v24, %v140_v24  ;;  %v143_v27 = vadd.f32 %v175_v19, %v132_v25 }
  0xe2   :  { %v130_v28 = vld [vmem:[#allocation2 + $0x8] sm:$0xff] }
  0xe3   :  { %161 = vst.msk [vmem:[%s268_s3] sm:$0xf] %vm160_vm1, %v180_v26  ;;  %v183_v29 = vpack.c.bf16 %v143_v27, %v143_v27  ;;  %v141_v30 = vadd.f32 %v175_v19, %v130_v28 }
  0xe5   :  { %164 = vst.msk [vmem:[%s268_s3 + $0xc] sm:$0xf] %vm160_vm1, %v183_v29  ;;  %v181_v31 = vpack.c.bf16 %v141_v30, %v141_v30 }
  0xe7   :  { %162 = vst.msk [vmem:[%s268_s3 + $0x4] sm:$0xf] %vm160_vm1, %v181_v31 }

// kernel: forward.22
= control target key start
LH: loop header
LB: loop body
LE: loop exit
PB: predicated region body
PF: predicated region fallthrough
CT: control target
= control target key end

     0   :  { %vm53_vm0 = vcmask 261120   ;;  %s437_s7 = smov 96   ;;  %s438_s8 = smov 64   ;;  %vm131_vm1 = vcmask 257024   ;;  %s562_s1 = inlined_call_operand.vmem [shape: bf16[96,32], index: 1, kind: input, shape index: {}]   ;;  %s563_s0 = inlined_call_operand.vmem [shape: bf16[32,32], index: 0, kind: input, shape index: {}]   ;;  %s564_s2 = inlined_call_operand.vmem [shape: f32[1,96], index: 2, kind: input, shape index: {}]   ;;  %s565_s3 = inlined_call_operand.vmem [shape: bf16[32,32], index: 3, kind: output, shape index: {0}]   ;;  %s566_s4 = inlined_call_operand.vmem [shape: bf16[32,32], index: 4, kind: output, shape index: {1}]   ;;  %s567_s5 = inlined_call_operand.vmem [shape: bf16[32,32], index: 5, kind: output, shape index: {2}]  }
   0x1   :  { %v429_v0 = vld [vmem:[%s562_s1 + $0x8] sm:$0xff]   ;;  %v430_v1 = vld [vmem:[%s562_s1] sm:$0xff]   ;;  %v431_v3 = vld [vmem:[%s562_s1 + $0x18] sm:$0xff]  }
   0x2   :  { %421 = vmatprep.subr.msk.bf16.mxu0 %vm53_vm0, %v429_v0  ;;  %v64_v2 = vsel %vm53_vm0, %v429_v0, 0  ;;  %v432_v4 = vld [vmem:[%s563_s0] sm:$0xff]   ;;  %423 = vmatprep.subr.msk.bf16.mxu1 %vm53_vm0, %v431_v3  ;;  %v163_v5 = vsel %vm53_vm0, %v431_v3, 0  ;;  %v435_v6 = vld [vmem:[%s562_s1 + $0x10] sm:$0xff]   ;;  %v61_v7 = vsel %vm53_vm0, %v430_v1, 0  ;;  %v434_v8 = vld [vmem:[%s562_s1 + $0x28] sm:$0xff]  }
   0x3   :  { %398 = vmatpush3.bf16.xpose.msra.mxu0 %v64_v2  ;;  %406 = vmatpush3.bf16.xpose.msra.mxu1 %v163_v5  ;;  %v355_v9 = vld [vmem:[%s564_s2] ss:$0 sm:$0xff]  ;;  %v160_v10 = vsel %vm53_vm0, %v435_v6, 0  ;;  %v433_v11 = vld [vmem:[%s563_s0 + $0x8] sm:$0xff]   ;;  %v261_v12 = vsel %vm53_vm0, %v434_v8, 0 }
   0x4   :  { %422 = vmatprep.subr.msk.bf16.mxu0 %vm53_vm0, %v430_v1  ;;  %401 = vmatprep.mubr.msk.bf16.mxu0 %vm53_vm0, %v432_v4  ;;  %v436_v13 = vld [vmem:[%s562_s1 + $0x20] sm:$0xff]  }
   0x5   :  { %409 = vmatprep.mubr.msk.bf16.mxu1 %vm53_vm0, %v432_v4  ;;  %424 = vmatprep.subr.msk.bf16.mxu1 %vm53_vm0, %v435_v6  ;;  %v258_v14 = vsel %vm53_vm0, %v436_v13, 0 }
   0x6   :  { %156 = vrot.lane.b32.xlu0 %v355_v9, %s437_s7 }
   0xa   :  { %254 = vrot.lane.b32.xlu0 %v355_v9, %s438_s8 }
   0xb   :  { %400 = vmatpush3.bf16.xpose.msra.mxu0 %v61_v7  ;;  %408 = vmatpush3.bf16.xpose.msra.mxu1 %v160_v10 }
   0xc   :  { %425 = vmatprep.subr.msk.bf16.mxu0 %vm53_vm0, %v434_v8 }
  0x12   :  { %402 = vmatmul.mubr.msk.bf16.vlgmr.msra.gmra.mxu0 %vm53_vm0, %v433_v11  ;;  %410 = vmatmul.mubr.msk.bf16.vlgmr.msra.gmra.mxu1 %vm53_vm0, %v433_v11 }
  0x13   :  { %414 = vmatpush3.bf16.xpose.msra.mxu0 %v261_v12  ;;  %417 = vmatprep.mubr.msk.bf16.mxu0 %vm53_vm0, %v432_v4 }
  0x14   :  { %426 = vmatprep.subr.msk.bf16.mxu0 %vm53_vm0, %v436_v13 }
  0x1b   :  { %416 = vmatpush3.bf16.xpose.msra.mxu0 %v258_v14 }
  0x22   :  { %418 = vmatmul.mubr.msk.bf16.vlgmr.msra.gmra.mxu0 %vm53_vm0, %v433_v11 }
  0x78   :  { %v157_v17 = vpop.permute.xlu0 %156 }
  0x7c   :  { %v255_v40 = vpop.permute.xlu0 %254 }
  0xd2   :  { %v403_v15 = vpop.f32.mrf.mxu0  ;;  %v411_v19 = vpop.f32.mrf.mxu1 }
  0xd3   :  { %v109_v16 = vadd.f32 %v403_v15, %v355_v9  ;;  %v208_v22 = vadd.f32 %v411_v19, %v157_v17 }
  0xd4   :  { %v100_v18 = vpop.f32.mrf.mxu0  ;;  %v199_v24 = vpop.f32.mrf.mxu1 }
  0xd5   :  { %v375_v20 = vpack.c.bf16 %v109_v16, %v109_v16  ;;  %v101_v21 = vadd.f32 %v355_v9, %v100_v18  ;;  %v379_v27 = vpack.c.bf16 %v208_v22, %v208_v22  ;;  %v200_v28 = vadd.f32 %v199_v24, %v157_v17 }
  0xd6   :  { %v404_v23 = vpop.f32.mrf.mxu0  ;;  %v412_v30 = vpop.f32.mrf.mxu1 }
  0xd7   :  { %134 = vst.msk [vmem:[%s565_s3 + $0x8] sm:$0xf] %vm131_vm1, %v375_v20  ;;  %v373_v25 = vpack.c.bf16 %v101_v21, %v101_v21  ;;  %v112_v26 = vadd.f32 %v404_v23, %v355_v9  ;;  %v377_v33 = vpack.c.bf16 %v200_v28, %v200_v28  ;;  %232 = vst.msk [vmem:[%s566_s4 + $0x8] sm:$0xf] %vm131_vm1, %v379_v27 }
  0xd8   :  { %v103_v29 = vpop.f32.mrf.mxu0  ;;  %v211_v34 = vadd.f32 %v412_v30, %v157_v17  ;;  %v202_v35 = vpop.f32.mrf.mxu1 }
  0xd9   :  { %132 = vst.msk [vmem:[%s565_s3] sm:$0xf] %vm131_vm1, %v373_v25  ;;  %v376_v31 = vpack.c.bf16 %v112_v26, %v112_v26  ;;  %v104_v32 = vadd.f32 %v355_v9, %v103_v29  ;;  %230 = vst.msk [vmem:[%s566_s4] sm:$0xf] %vm131_vm1, %v377_v33  ;;  %v203_v38 = vadd.f32 %v202_v35, %v157_v17 }
  0xda   :  { %v380_v37 = vpack.c.bf16 %v211_v34, %v211_v34 }
  0xdb   :  { %135 = vst.msk [vmem:[%s565_s3 + $0xc] sm:$0xf] %vm131_vm1, %v376_v31  ;;  %v374_v36 = vpack.c.bf16 %v104_v32, %v104_v32  ;;  %v378_v39 = vpack.c.bf16 %v203_v38, %v203_v38 }
  0xdc   :  { %233 = vst.msk [vmem:[%s566_s4 + $0xc] sm:$0xf] %vm131_vm1, %v380_v37 }
  0xdd   :  { %133 = vst.msk [vmem:[%s565_s3 + $0x4] sm:$0xf] %vm131_vm1, %v374_v36  ;;  %231 = vst.msk [vmem:[%s566_s4 + $0x4] sm:$0xf] %vm131_vm1, %v378_v39 }
  0xe2   :  { %v419_v41 = vpop.f32.mrf.mxu0 }
  0xe3   :  { %v306_v42 = vadd.f32 %v419_v41, %v255_v40 }
  0xe4   :  { %v297_v43 = vpop.f32.mrf.mxu0 }
  0xe5   :  { %v383_v44 = vpack.c.bf16 %v306_v42, %v306_v42  ;;  %v298_v45 = vadd.f32 %v297_v43, %v255_v40 }
  0xe6   :  { %v420_v46 = vpop.f32.mrf.mxu0 }
  0xe7   :  { %330 = vst.msk [vmem:[%s567_s5 + $0x8] sm:$0xf] %vm131_vm1, %v383_v44  ;;  %v381_v47 = vpack.c.bf16 %v298_v45, %v298_v45  ;;  %v309_v48 = vadd.f32 %v420_v46, %v255_v40 }
  0xe8   :  { %v300_v49 = vpop.f32.mrf.mxu0 }
  0xe9   :  { %328 = vst.msk [vmem:[%s567_s5] sm:$0xf] %vm131_vm1, %v381_v47  ;;  %v384_v50 = vpack.c.bf16 %v309_v48, %v309_v48  ;;  %v301_v51 = vadd.f32 %v300_v49, %v255_v40 }
  0xeb   :  { %331 = vst.msk [vmem:[%s567_s5 + $0xc] sm:$0xf] %vm131_vm1, %v384_v50  ;;  %v382_v52 = vpack.c.bf16 %v301_v51, %v301_v51 }
  0xed   :  { %329 = vst.msk [vmem:[%s567_s5 + $0x4] sm:$0xf] %vm131_vm1, %v382_v52 }

// kernel: forward.23
= control target key start
LH: loop header
LB: loop body
LE: loop exit
PB: predicated region body
PF: predicated region fallthrough
CT: control target
= control target key end

     0   :  { %s1543_s27 = smov 0   ;;  %s1732_s0 = inlined_call_operand.vmem [shape: bf16[2,16,32], index: 0, kind: input, shape index: {}]   ;;  %s1733_s1 = inlined_call_operand.vmem [shape: bf16[2,16,32], index: 1, kind: input, shape index: {}]   ;;  %s1734_s2 = inlined_call_operand.vmem [shape: bf16[2,16,32], index: 2, kind: input, shape index: {}]   ;;  %s1735_s3 = inlined_call_operand.vmem [shape: bf16[2,16,32], index: 3, kind: input, shape index: {}]   ;;  %s1736_s4 = inlined_call_operand.vmem [shape: bf16[32,32], index: 4, kind: input, shape index: {}]   ;;  %s1737_s5 = inlined_call_operand.vmem [shape: f32[1,32], index: 5, kind: input, shape index: {}]   ;;  %s1738_s6 = inlined_call_operand.vmem [shape: f32[1,32], index: 6, kind: input, shape index: {}]   ;;  %s1739_s7 = inlined_call_operand.vmem [shape: f32[1,32], index: 7, kind: input, shape index: {}]   ;;  %s1740_s8 = inlined_call_operand.vmem [shape: bf16[2,16,32], index: 8, kind: output, shape index: {}]  }
   0x1 LB: > { %s1273_s28 = sadd.s32 4294967295, %s1491_s27   ;;  %p1277_p0 = scmp.ge.s32.totalorder %s1491_s27, 1  ;;  %s1491_s27 = sphi %s1543_s27, %s18_s27  }
   0x2   : > { %p292_p1 = scmp.lt.s32.totalorder %s1491_s27, 3 }
   0x4   : > { %p293_p2 = pnand %p1277_p0, %p292_p1 }
   0x5   : > { %p341_p3 = scmp.lt.s32.totalorder (!%p293_p2), %s1273_s28, 1  ;;  %s1495_s14 = smov (!%p293_p2), 120  }
   0x6   : > { %296 = sbr.rel (%p293_p2) target bundleno = 2605 (0xa2d), region = 52  ;;  %s1496_s22 = smov (!%p293_p2), 112  }
   0x7   : > { %s1497_s23 = smov (!%p293_p2), 104  }
   0xb   : > { %v1493_v0 = vmov 0.0   ;;  %vm1494_vm0 = vmmov 0   ;;  %s1742_s28 = smov (!%p341_p3, %s1273_s28), 1  ;;  %vm383_vm1 = vcmask 64512   ;;  %vm433_vm2 = vcmask 130048   ;;  %v1608_v46 = vld [vmem:[%s1736_s4 + $0x8] sm:$0xff]  }
   0xc   : > { %1351 = vmatprep.subr.bf16.mxu0 %v1493_v0  ;;  %1353 = vmatprep.mubr.msk.bf16.mxu0 %vm1494_vm0, %v1493_v0  ;;  %s1557_s29 = sshll.u32 %s1742_s28, 3  ;;  %v1613_v47 = vld [vmem:[%s1736_s4] sm:$0xff]   ;;  %vm1125_vm3 = vcmask 261120   ;;  %vm1179_vm4 = vcmask 257024  }
   0xd   : > { %1363 = vmatprep.subr.bf16.mxu1 %v1493_v0  ;;  %1365 = vmatprep.mubr.msk.bf16.mxu1 %vm1494_vm0, %v1493_v0  ;;  %s350_s10 = scalar_lea.vmem %s1733_s1, %s1557_s29  ;;  %s345_s13 = scalar_lea.vmem %s1732_s0, %s1557_s29 }
   0xe   : > { %v1563_v1 = vld [vmem:[%s350_s10] sm:$0xff]   ;;  %s355_s17 = scalar_lea.vmem %s1734_s2, %s1557_s29  ;;  %s360_s26 = scalar_lea.vmem %s1735_s3, %s1557_s29 }
   0xf   : > { %514 = vrot.lane.b32.xlu0 %v1563_v1, %s1495_s14  ;;  %v388_v2 = vsel %vm383_vm1, %v1563_v1, 0  ;;  %v1573_v3 = vld [vmem:[%s345_s13] sm:$0xff]   ;;  %s365_s15 = scalar_lea.vmem %s1740_s8, %s1557_s29 }
  0x10   : > { %1352 = vmatpush3.bf16.xpose.msra.mxu0 %v388_v2  ;;  %v1597_v33 = vld [vmem:[%s355_s17] sm:$0xff]  }
  0x11   : > { %1357 = vmatprep.subr.bf16.mxu0 %v1493_v0 }
  0x13   : > { %512 = vrot.lane.b32.xlu0 %v1573_v3, %s1495_s14 }
  0x17   : > { %1354 = vmatmul.mubr.msk.bf16.vlgmr.msra.gmra.mxu0 %vm383_vm1, %v1573_v3 }
  0x18   : > { %1359 = vmatprep.mubr.msk.bf16.mxu0 %vm1494_vm0, %v1493_v0  ;;  %1358 = vmatpush3.bf16.msra.mxu0 %v1597_v33 }
  0x19   : > { %1369 = vmatprep.subr.bf16.mxu0 %v1493_v0 }
  0x81   : > { %v515_v4 = vpop.permute.xlu0 %514 }
  0x82   : > { %v520_v5 = vsel %vm383_vm1, %v515_v4, 0  ;;  %v707_v4 = vsel %vm383_vm1, %v1608_v46, 0 }
  0x83   : > { %1364 = vmatpush3.bf16.xpose.msra.mxu1 %v520_v5  ;;  %v704_v5 = vsel %vm383_vm1, %v1613_v47, 0 }
  0x84   : > { %1375 = vmatprep.subr.bf16.mxu1 %v1493_v0 }
  0x85   : > { %v513_v6 = vpop.permute.xlu0 %512 }
  0x8a   : > { %1366 = vmatmul.mubr.msk.bf16.vlgmr.msra.gmra.mxu1 %vm383_vm1, %v513_v6 }
  0x8b   : > { %1379 = vmatprep.mubr.msk.bf16.mxu1 %vm1494_vm0, %v1493_v0 }
  0xd7   : > { %v424_v7 = vpop.f32.mrf.mxu0 }
  0xd8   : > { %v431_v8 = vmul.f32 0.35355338, %v424_v7 }
  0xd9   : > { %v1355_v9 = vpop.f32.mrf.mxu0 }
  0xda   : > { %v434_v10 = vsel %vm433_vm2, %v431_v8, -inf }
  0xdb   : > { %435 = vmax.xlane.f32.xlu1 %v434_v10  ;;  %v427_v11 = vpop.f32.mrf.mxu0 }
  0xdc   : > { %v432_v12 = vmul.f32 0.35355338, %v427_v11 }
  0xdd   : > { %v1356_v13 = vpop.f32.mrf.mxu0 }
  0xde   : > { %v437_v14 = vsel %vm433_vm2, %v432_v12, -inf }
  0xdf   : > { %438 = vmax.xlane.f32.xlu1 %v437_v14 }
 0x14a   : > { %v556_v15 = vpop.f32.mrf.mxu1 }
 0x14b   : > { %v563_v16 = vmul.f32 0.35355338, %v556_v15 }
 0x14c   : > { %v1367_v17 = vpop.f32.mrf.mxu1 }
 0x14d   : > { %v565_v18 = vsel %vm433_vm2, %v563_v16, -inf }
 0x14e   : > { %566 = vmax.xlane.f32.xlu0 %v565_v18  ;;  %v559_v19 = vpop.f32.mrf.mxu1 }
 0x14f   : > { %v564_v20 = vmul.f32 0.35355338, %v559_v19 }
 0x150   : > { %v1368_v21 = vpop.f32.mrf.mxu1 }
 0x151   : > { %v568_v22 = vsel %vm433_vm2, %v564_v20, -inf }
 0x152   : > { %569 = vmax.xlane.f32.xlu1 %v568_v22 }
 0x164   : > { %v436_v23 = vpop.xlane.xlu1 %435  ;;  %648 = vrot.lane.b32.xlu0 %v1608_v46, %s1495_s14 }
 0x165   : > { %v440_v24 = vsub.f32 %v431_v8, %v436_v23 }
 0x167   : > { %v442_v25 = vmul.f32 1.442695, %v440_v24 }
 0x168   : > { %v439_v26 = vpop.xlane.xlu1 %438 }
 0x169   : > { %1449 = vpow2.f32 %v442_v25  ;;  %v441_v27 = vsub.f32 %v432_v12, %v439_v26 }
 0x16b   : > { %v444_v28 = vmul.f32 1.442695, %v441_v27 }
 0x16d   : > { %1451 = vpow2.f32 %v444_v28 }
 0x176   : > { %v1450_v29 = vpop.eup %1449 }
 0x177   : > { %v446_v30 = vsel %vm433_vm2, %v1450_v29, 0.0 }
 0x178   : > { %447 = vadd.xlane.f32.xlu1 %v446_v30 }
 0x17a   : > { %v1452_v31 = vpop.eup %1451 }
 0x17b   : > { %v449_v32 = vsel %vm433_vm2, %v1452_v31, 0.0 }
 0x17c   : > { %450 = vadd.xlane.f32.xlu1 %v449_v32 }
 0x1d7   : > { %v567_v34 = vpop.xlane.xlu0 %566 }
 0x1d8   : > { %v571_v35 = vsub.f32 %v563_v16, %v567_v34 }
 0x1da   : > { %v573_v36 = vmul.f32 1.442695, %v571_v35 }
 0x1db   : > { %v570_v37 = vpop.xlane.xlu1 %569  ;;  %v649_v56 = vpop.permute.xlu0 %648 }
 0x1dc   : > { %1453 = vpow2.f32 %v573_v36  ;;  %v572_v38 = vsub.f32 %v564_v20, %v570_v37  ;;  %v657_v57 = vsel %vm383_vm1, %v649_v56, 0 }
 0x1dd   : > { %1376 = vmatpush3.bf16.xpose.msra.mxu1 %v657_v57 }
 0x1de   : > { %v575_v39 = vmul.f32 1.442695, %v572_v38  ;;  %1377 = vmatprep.subr.bf16.mxu1 %v1493_v0 }
 0x1e0   : > { %1455 = vpow2.f32 %v575_v39 }
 0x1e9   : > { %v1454_v40 = vpop.eup %1453 }
 0x1ea   : > { %v577_v41 = vsel %vm433_vm2, %v1454_v40, 0.0 }
 0x1eb   : > { %578 = vadd.xlane.f32.xlu1 %v577_v41 }
 0x1ed   : > { %v1456_v42 = vpop.eup %1455 }
 0x1ee   : > { %v580_v43 = vsel %vm433_vm2, %v1456_v42, 0.0 }
 0x1ef   : > { %581 = vadd.xlane.f32.xlu1 %v580_v43 }
 0x200   : > { %588 = vrot.lane.b32.xlu1 %v1597_v33, %s1495_s14 }
 0x201   : > { %v448_v44 = vpop.xlane.xlu1 %447 }
 0x202   : > { %1457 = vrcp.f32 %v448_v44 }
 0x204   : > { %646 = vrot.lane.b32.xlu1 %v1613_v47, %s1495_s14 }
 0x205   : > { %v451_v45 = vpop.xlane.xlu1 %450 }
 0x206   : > { %1459 = vrcp.f32 %v451_v45 }
 0x208   : > { %752 = vrot.lane.b32.xlu1 %v1563_v1, %s1496_s22 }
 0x20c   : > { %750 = vrot.lane.b32.xlu1 %v1573_v3, %s1496_s22 }
 0x20f   : > { %v1458_v48 = vpop.eup %1457 }
 0x210   : > { %v454_v50 = vmul.f32 %v1458_v48, %v1450_v29 }
 0x213   : > { %v1460_v49 = vpop.eup %1459 }
 0x214   : > { %v455_v51 = vmul.f32 %v1460_v49, %v1452_v31 }
 0x216   : > { %v456_v52 = vpack.c.bf16 %v455_v51, %v454_v50 }
 0x218   : > { %1360 = vmatmul.mubr.msk.bf16.vlgmr.msra.gmra.mxu0 %vm433_vm2, %v456_v52 }
 0x219   : > { %1371 = vmatprep.mubr.msk.bf16.mxu0 %vm1494_vm0, %v1493_v0 }
 0x274   : > { %v579_v53 = vpop.xlane.xlu1 %578 }
 0x275   : > { %1461 = vrcp.f32 %v579_v53 }
 0x278   : > { %v582_v54 = vpop.xlane.xlu1 %581 }
 0x279   : > { %1463 = vrcp.f32 %v582_v54 }
 0x27c   : > { %v589_v55 = vpop.permute.xlu1 %588 }
 0x27d   : > { %1370 = vmatpush3.bf16.msra.mxu0 %v589_v55 }
 0x27e   : > { %1383 = vmatprep.subr.bf16.mxu0 %v1493_v0 }
 0x280   : > { %v647_v58 = vpop.permute.xlu1 %646 }
 0x281   : > { %v654_v61 = vsel %vm383_vm1, %v647_v58, 0 }
 0x282   : > { %v1462_v59 = vpop.eup %1461  ;;  %1378 = vmatpush3.bf16.xpose.msra.mxu1 %v654_v61 }
 0x283   : > { %v585_v62 = vmul.f32 %v1462_v59, %v1454_v40  ;;  %1391 = vmatprep.subr.bf16.mxu1 %v1493_v0 }
 0x284   : > { %v753_v13 = vpop.permute.xlu1 %752 }
 0x285   : > { %v758_v16 = vsel %vm383_vm1, %v753_v13, 0 }
 0x286   : > { %v1464_v60 = vpop.eup %1463 }
 0x287   : > { %v586_v63 = vmul.f32 %v1464_v60, %v1456_v42 }
 0x288   : > { %v751_v18 = vpop.permute.xlu1 %750 }
 0x289   : > { %v587_v2 = vpack.c.bf16 %v586_v63, %v585_v62 }
 0x28b   : > { %1372 = vmatmul.mubr.msk.bf16.vlgmr.msra.gmra.mxu0 %vm433_vm2, %v587_v2 }
 0x28c   : > { %1384 = vmatpush3.bf16.xpose.msra.mxu0 %v707_v4  ;;  %1387 = vmatprep.mubr.msk.bf16.mxu0 %vm1494_vm0, %v1493_v0 }
 0x28d   : > { %1385 = vmatprep.subr.bf16.mxu0 %v1493_v0 }
 0x294   : > { %1386 = vmatpush3.bf16.xpose.msra.mxu0 %v704_v5 }
 0x295   : > { %1397 = vmatprep.subr.bf16.mxu0 %v1493_v0 }
 0x2d8   : > { %v500_v6 = vpop.f32.mrf.mxu0 }
 0x2da   : > { %v1361_v7 = vpop.f32.mrf.mxu0 }
 0x2dc   : > { %v503_v8 = vpop.f32.mrf.mxu0 }
 0x2dd   : > { %v511_v9 = vpack.c.bf16 %v503_v8, %v500_v6 }
 0x2de   : > { %v1362_v10 = vpop.f32.mrf.mxu0 }
 0x2df   : > { %1388 = vmatmul.mubr.msk.bf16.vlgmr.msra.gmra.mxu0 %vm383_vm1, %v511_v9 }
 0x2e0   : > { %1399 = vmatprep.mubr.msk.bf16.mxu0 %vm1494_vm0, %v1493_v0 }
 0x34b   : > { %v628_v11 = vpop.f32.mrf.mxu0 }
 0x34d   : > { %v1373_v12 = vpop.f32.mrf.mxu0 }
 0x34f   : > { %v631_v14 = vpop.f32.mrf.mxu0 }
 0x350   : > { %v635_v15 = vpack.c.bf16 %v631_v14, %v628_v11 }
 0x351   : > { %v1374_v17 = vpop.f32.mrf.mxu0 }
 0x352   : > { %1380 = vmatmul.mubr.msk.bf16.vlgmr.msra.gmra.mxu1 %vm383_vm1, %v635_v15 }
 0x353   : > { %1392 = vmatpush3.bf16.xpose.msra.mxu1 %v758_v16  ;;  %1393 = vmatprep.mubr.msk.bf16.mxu1 %vm1494_vm0, %v1493_v0 }
 0x354   : > { %1403 = vmatprep.subr.bf16.mxu1 %v1493_v0 }
 0x35a   : > { %1394 = vmatmul.mubr.msk.bf16.vlgmr.msra.gmra.mxu1 %vm383_vm1, %v751_v18 }
 0x35b   : > { %1407 = vmatprep.mubr.msk.bf16.mxu1 %vm1494_vm0, %v1493_v0 }
 0x39f   : > { %v1651_v19 = vpop.f32.mrf.mxu0 }
 0x3a1   : > { %v1389_v20 = vpop.f32.mrf.mxu0 }
 0x3a3   : > { %v1653_v21 = vpop.f32.mrf.mxu0 }
 0x3a5   : > { %v1390_v22 = vpop.f32.mrf.mxu0 }
 0x412   : > { %v1655_v23 = vpop.f32.mrf.mxu1 }
 0x414   : > { %v1381_v24 = vpop.f32.mrf.mxu1 }
 0x416   : > { %v1657_v25 = vpop.f32.mrf.mxu1 }
 0x418   : > { %v1382_v26 = vpop.f32.mrf.mxu1 }
 0x41a   : > { %v794_v27 = vpop.f32.mrf.mxu1 }
 0x41b   : > { %v801_v28 = vmul.f32 0.35355338, %v794_v27 }
 0x41c   : > { %v1395_v29 = vpop.f32.mrf.mxu1 }
 0x41d   : > { %v803_v30 = vsel %vm433_vm2, %v801_v28, -inf }
 0x41e   : > { %804 = vmax.xlane.f32.xlu1 %v803_v30  ;;  %v797_v31 = vpop.f32.mrf.mxu1 }
 0x41f   : > { %v802_v32 = vmul.f32 0.35355338, %v797_v31 }
 0x420   : > { %v1396_v34 = vpop.f32.mrf.mxu1 }
 0x421   : > { %v806_v35 = vsel %vm433_vm2, %v802_v32, -inf }
 0x422   : > { %807 = vmax.xlane.f32.xlu0 %v806_v35 }
 0x4a7   : > { %v805_v36 = vpop.xlane.xlu1 %804 }
 0x4a8   : > { %v809_v37 = vsub.f32 %v801_v28, %v805_v36 }
 0x4aa   : > { %v811_v38 = vmul.f32 1.442695, %v809_v37 }
 0x4ab   : > { %v808_v39 = vpop.xlane.xlu0 %807 }
 0x4ac   : > { %1465 = vpow2.f32 %v811_v38  ;;  %v810_v40 = vsub.f32 %v802_v32, %v808_v39  ;;  %v744_v38 = vadd.f32 %v1651_v19, %v1655_v23  ;;  %v1320_v19 = vld [vmem:[%s360_s26] sm:$0xff]  }
 0x4ae   : > { %v813_v41 = vmul.f32 1.442695, %v810_v40 }
 0x4b0   : > { %1467 = vpow2.f32 %v813_v41 }
 0x4b9   : > { %v1466_v42 = vpop.eup %1465 }
 0x4ba   : > { %v815_v43 = vsel %vm433_vm2, %v1466_v42, 0.0 }
 0x4bb   : > { %816 = vadd.xlane.f32.xlu0 %v815_v43 }
 0x4bd   : > { %v1468_v44 = vpop.eup %1467 }
 0x4be   : > { %v818_v45 = vsel %vm433_vm2, %v1468_v44, 0.0 }
 0x4bf   : > { %819 = vadd.xlane.f32.xlu1 %v818_v45 }
 0x4d0   : > { %932 = vrot.lane.b32.xlu1 %v1563_v1, %s1497_s23 }
 0x4d1   : > { %826 = vrot.lane.b32.xlu0 %v1597_v33, %s1496_s22 }
 0x4d4   : > { %930 = vrot.lane.b32.xlu1 %v1573_v3, %s1497_s23 }
 0x544   : > { %v817_v48 = vpop.xlane.xlu0 %816 }
 0x545   : > { %1469 = vrcp.f32 %v817_v48 }
 0x548   : > { %v820_v49 = vpop.xlane.xlu1 %819  ;;  %v827_v50 = vpop.permute.xlu0 %826 }
 0x549   : > { %1471 = vrcp.f32 %v820_v49  ;;  %1398 = vmatpush3.bf16.msra.mxu0 %v827_v50 }
 0x54a   : > { %1411 = vmatprep.subr.bf16.mxu0 %v1493_v0 }
 0x54c   : > { %v933_v53 = vpop.permute.xlu1 %932 }
 0x54d   : > { %v938_v1 = vsel %vm383_vm1, %v933_v53, 0  ;;  %v1321_v53 = vunpack.c.l.bf16 %v1320_v19 }
 0x550   : > { %v931_v3 = vpop.permute.xlu1 %930 }
 0x552   : > { %v1470_v51 = vpop.eup %1469 }
 0x553   : > { %v823_v54 = vmul.f32 %v1470_v51, %v1466_v42  ;;  %v1305_v51 = vld [vmem:[%s1737_s5] ss:$0 sm:$0xff] }
 0x556   : > { %v1472_v52 = vpop.eup %1471 }
 0x557   : > { %v824_v55 = vmul.f32 %v1472_v52, %v1468_v44  ;;  %v747_v44 = vadd.f32 %v1653_v21, %v1657_v25 }
 0x559   : > { %v825_v56 = vpack.c.bf16 %v824_v55, %v823_v54 }
 0x55b   : > { %1400 = vmatmul.mubr.msk.bf16.vlgmr.msra.gmra.mxu0 %vm433_vm2, %v825_v56  ;;  %v1322_v56 = vunpack.c.h.bf16 %v1320_v19 }
 0x55c   : > { %1412 = vmatpush3.bf16.xpose.msra.mxu0 %v938_v1  ;;  %1413 = vmatprep.mubr.msk.bf16.mxu0 %vm1494_vm0, %v1493_v0 }
 0x55d   : > { %1417 = vmatprep.subr.bf16.mxu0 %v1493_v0 }
 0x563   : > { %1414 = vmatmul.mubr.msk.bf16.vlgmr.msra.gmra.mxu0 %vm383_vm1, %v931_v3 }
 0x564   : > { %1419 = vmatprep.mubr.msk.bf16.mxu0 %vm1494_vm0, %v1493_v0 }
 0x61b   : > { %v866_v57 = vpop.f32.mrf.mxu0 }
 0x61d   : > { %v1401_v58 = vpop.f32.mrf.mxu0 }
 0x61f   : > { %v869_v59 = vpop.f32.mrf.mxu0 }
 0x620   : > { %v873_v60 = vpack.c.bf16 %v869_v59, %v866_v57 }
 0x621   : > { %v1402_v61 = vpop.f32.mrf.mxu0 }
 0x623   : > { %v974_v62 = vpop.f32.mrf.mxu0 }
 0x624   : > { %v981_v63 = vmul.f32 0.35355338, %v974_v62 }
 0x625   : > { %v1415_v2 = vpop.f32.mrf.mxu0 }
 0x626   : > { %v983_v4 = vsel %vm433_vm2, %v981_v63, -inf }
 0x627   : > { %984 = vmax.xlane.f32.xlu0 %v983_v4  ;;  %v977_v5 = vpop.f32.mrf.mxu0 }
 0x628   : > { %v982_v6 = vmul.f32 0.35355338, %v977_v5 }
 0x629   : > { %v1416_v7 = vpop.f32.mrf.mxu0 }
 0x62a   : > { %v986_v8 = vsel %vm433_vm2, %v982_v6, -inf }
 0x62b   : > { %987 = vmax.xlane.f32.xlu1 %v986_v8 }
 0x63c   : > { %1006 = vrot.lane.b32.xlu1 %v1597_v33, %s1497_s23 }
 0x640   : > { %874 = vrot.lane.b32.xlu1 %v1613_v47, %s1496_s22 }
 0x644   : > { %1056 = vrot.lane.b32.xlu1 %v1608_v46, %s1497_s23 }
 0x6b0   : > { %v985_v9 = vpop.xlane.xlu0 %984 }
 0x6b1   : > { %v989_v10 = vsub.f32 %v981_v63, %v985_v9 }
 0x6b3   : > { %v991_v11 = vmul.f32 1.442695, %v989_v10 }
 0x6b4   : > { %v988_v12 = vpop.xlane.xlu1 %987 }
 0x6b5   : > { %1473 = vpow2.f32 %v991_v11  ;;  %v990_v13 = vsub.f32 %v982_v6, %v988_v12 }
 0x6b7   : > { %v993_v14 = vmul.f32 1.442695, %v990_v13 }
 0x6b8   : > { %v1007_v18 = vpop.permute.xlu1 %1006 }
 0x6b9   : > { %1475 = vpow2.f32 %v993_v14  ;;  %1418 = vmatpush3.bf16.msra.mxu0 %v1007_v18  ;;  %v1307_v18 = vld [vmem:[%s1739_s7] ss:$0 sm:$0xff] }
 0x6bc   : > { %v875_v27 = vpop.permute.xlu1 %874 }
 0x6bd   : > { %v882_v28 = vsel %vm383_vm1, %v875_v27, 0 }
 0x6c2   : > { %v1474_v15 = vpop.eup %1473 }
 0x6c3   : > { %v995_v16 = vsel %vm433_vm2, %v1474_v15, 0.0 }
 0x6c4   : > { %996 = vadd.xlane.f32.xlu0 %v995_v16 }
 0x6c6   : > { %v1476_v17 = vpop.eup %1475 }
 0x6c7   : > { %v998_v33 = vsel %vm433_vm2, %v1476_v17, 0.0 }
 0x6c8   : > { %999 = vadd.xlane.f32.xlu0 %v998_v33 }
 0x6de   : > { %876 = vrot.lane.b32.xlu0 %v1608_v46, %s1496_s22 }
 0x6e2   : > { %1054 = vrot.lane.b32.xlu0 %v1613_v47, %s1497_s23  ;;  %v1057_v47 = vpop.permute.xlu1 %1056 }
 0x6e3   : > { %v1065_v34 = vsel %vm383_vm1, %v1057_v47, 0 }
 0x74d   : > { %v997_v20 = vpop.xlane.xlu0 %996 }
 0x74e   : > { %1477 = vrcp.f32 %v997_v20 }
 0x751   : > { %v1000_v22 = vpop.xlane.xlu0 %999 }
 0x752   : > { %1479 = vrcp.f32 %v1000_v22 }
 0x755   : > { %v877_v24 = vpop.permute.xlu0 %876 }
 0x756   : > { %v885_v26 = vsel %vm383_vm1, %v877_v24, 0 }
 0x757   : > { %1404 = vmatpush3.bf16.xpose.msra.mxu1 %v885_v26 }
 0x758   : > { %1405 = vmatprep.subr.bf16.mxu1 %v1493_v0 }
 0x759   : > { %v1055_v35 = vpop.permute.xlu0 %1054 }
 0x75a   : > { %v1062_v36 = vsel %vm383_vm1, %v1055_v35, 0 }
 0x75b   : > { %v1478_v29 = vpop.eup %1477 }
 0x75c   : > { %v1003_v46 = vmul.f32 %v1478_v29, %v1474_v15 }
 0x75f   : > { %v1480_v30 = vpop.eup %1479  ;;  %1406 = vmatpush3.bf16.xpose.msra.mxu1 %v882_v28 }
 0x760   : > { %v1004_v31 = vmul.f32 %v1480_v30, %v1476_v17  ;;  %1423 = vmatprep.subr.bf16.mxu1 %v1493_v0  ;;  %v1306_v17 = vld [vmem:[%s1738_s6] ss:$0 sm:$0xff] }
 0x762   : > { %v1005_v32 = vpack.c.bf16 %v1004_v31, %v1003_v46 }
 0x764   : > { %1420 = vmatmul.mubr.msk.bf16.vlgmr.msra.gmra.mxu0 %vm433_vm2, %v1005_v32 }
 0x766   : > { %1408 = vmatmul.mubr.msk.bf16.vlgmr.msra.gmra.mxu1 %vm383_vm1, %v873_v60 }
 0x767   : > { %1424 = vmatpush3.bf16.xpose.msra.mxu1 %v1065_v34  ;;  %1427 = vmatprep.mubr.msk.bf16.mxu1 %vm1494_vm0, %v1493_v0 }
 0x768   : > { %1425 = vmatprep.subr.bf16.mxu1 %v1493_v0 }
 0x76f   : > { %1426 = vmatpush3.bf16.xpose.msra.mxu1 %v1062_v36 }
 0x824   : > { %v1046_v37 = vpop.f32.mrf.mxu0 }
 0x826   : > { %v921_v39 = vpop.f32.mrf.mxu1  ;;  %v1421_v40 = vpop.f32.mrf.mxu0 }
 0x827   : > { %v928_v41 = vadd.f32 %v921_v39, %v744_v38 }
 0x828   : > { %v1409_v42 = vpop.f32.mrf.mxu1  ;;  %v1049_v43 = vpop.f32.mrf.mxu0 }
 0x829   : > { %v1053_v45 = vpack.c.bf16 %v1049_v43, %v1046_v37 }
 0x82a   : > { %v924_v48 = vpop.f32.mrf.mxu1  ;;  %v1422_v0 = vpop.f32.mrf.mxu0 }
 0x82b   : > { %v929_v49 = vadd.f32 %v924_v48, %v747_v44  ;;  %1428 = vmatmul.mubr.msk.bf16.vlgmr.msra.gmra.mxu1 %vm383_vm1, %v1053_v45 }
 0x82c   : > { %v1410_v50 = vpop.f32.mrf.mxu1 }
 0x8eb   : > { %v1101_v23 = vpop.f32.mrf.mxu1 }
 0x8ec   : > { %v1108_v52 = vadd.f32 %v1101_v23, %v928_v41 }
 0x8ed   : > { %v1429_v21 = vpop.f32.mrf.mxu1 }
 0x8ee   : > { %v1117_v25 = vadd.f32 %v1305_v51, %v1108_v52 }
 0x8ef   : > { %v1104_v54 = vpop.f32.mrf.mxu1 }
 0x8f0   : > { %v1109_v55 = vadd.f32 %v1104_v54, %v929_v49  ;;  %v1123_v1 = vadd.f32 %v1321_v53, %v1117_v25 }
 0x8f1   : > { %v1430_v3 = vpop.f32.mrf.mxu1 }
 0x8f2   : > { %v1118_v57 = vadd.f32 %v1305_v51, %v1109_v55  ;;  %v1126_v58 = vsel %vm1125_vm3, %v1123_v1, 0.0 }
 0x8f3   : > { %1127 = vadd.xlane.f32.xlu1 %v1126_v58 }
 0x8f4   : > { %v1124_v59 = vadd.f32 %v1322_v56, %v1118_v57 }
 0x8f6   : > { %v1129_v60 = vsel %vm1125_vm3, %v1124_v59, 0.0 }
 0x8f7   : > { %1130 = vadd.xlane.f32.xlu0 %v1129_v60 }
 0x97c   : > { %v1128_v61 = vpop.xlane.xlu1 %1127 }
 0x97d   : > { %v1133_v62 = vmul.f32 0.03125, %v1128_v61 }
 0x97f   : > { %v1135_v63 = vsub.f32 %v1123_v1, %v1133_v62 }
 0x980   : > { %v1131_v2 = vpop.xlane.xlu0 %1130 }
 0x981   : > { %v1134_v4 = vmul.f32 0.03125, %v1131_v2  ;;  %v1137_v5 = vmul.f32 %v1135_v63, %v1135_v63 }
 0x983   : > { %v1136_v6 = vsub.f32 %v1124_v59, %v1134_v4  ;;  %v1139_v7 = vsel %vm1125_vm3, %v1137_v5, 0.0 }
 0x984   : > { %1140 = vadd.xlane.f32.xlu0 %v1139_v7 }
 0x985   : > { %v1138_v8 = vmul.f32 %v1136_v6, %v1136_v6 }
 0x987   : > { %v1142_v9 = vsel %vm1125_vm3, %v1138_v8, 0.0 }
 0x988   : > { %1143 = vadd.xlane.f32.xlu1 %v1142_v9 }
 0xa0d   : > { %v1141_v10 = vpop.xlane.xlu0 %1140 }
 0xa0e   : > { %v1145_v11 = vmul.f32 0.03125, %v1141_v10 }
 0xa10   : > { %v1147_v12 = vadd.f32 1e-05, %v1145_v11 }
 0xa11   : > { %v1144_v13 = vpop.xlane.xlu1 %1143 }
 0xa12   : > { %1481 = vrsqrt.f32 %v1147_v12  ;;  %v1146_v14 = vmul.f32 0.03125, %v1144_v13 }
 0xa14   : > { %v1148_v15 = vadd.f32 1e-05, %v1146_v14 }
 0xa16   : > { %1483 = vrsqrt.f32 %v1148_v15 }
 0xa1f   : > { %v1482_v16 = vpop.eup %1481 }
 0xa20   : > { %v1151_v33 = vmul.f32 %v1482_v16, %v1135_v63 }
 0xa22   : > { %v1160_v20 = vmul.f32 %v1306_v17, %v1151_v33 }
 0xa23   : > { %v1484_v22 = vpop.eup %1483 }
 0xa24   : > { %v1169_v24 = vadd.f32 %v1307_v18, %v1160_v20  ;;  %v1152_v26 = vmul.f32 %v1484_v22, %v1136_v6 }
 0xa26   : > { %v1317_v27 = vpack.c.bf16 %v1169_v24, %v1169_v24  ;;  %v1161_v28 = vmul.f32 %v1306_v17, %v1152_v26 }
 0xa28   : > { %1180 = vst.msk [vmem:[%s365_s15] sm:$0xf] %vm1179_vm4, %v1317_v27  ;;  %v1170_v29 = vadd.f32 %v1307_v18, %v1161_v28 }
 0xa2a   : > { %v1318_v30 = vpack.c.bf16 %v1170_v29, %v1170_v29 }
 0xa2c   : > { %1181 = vst.msk [vmem:[%s365_s15 + $0x4] sm:$0xf] %vm1179_vm4, %v1318_v30 }
 0xa2d PF: > { %s18_s27 = sadd.s32 1, %s1491_s27  }
 0xa2e   : > { %p15_p4 = scmp.ge.s32.totalorder %s18_s27, 4  }
 0xa30   :  { %17 = sbr.rel (!%p15_p4) target bundleno = 1 (0x1), region = 91 }

// kernel: forward.24
= control target key start
LH: loop header
LB: loop body
LE: loop exit
PB: predicated region body
PF: predicated region fallthrough
CT: control target
= control target key end

     0   :  { %vm76_vm0 = vcmask 261120   ;;  %vm171_vm1 = vcmask 523264   ;;  %vm332_vm2 = vcmask 257024   ;;  %s540_s1 = inlined_call_operand.vmem [shape: bf16[64,32], index: 1, kind: input, shape index: {}]   ;;  %s541_s0 = inlined_call_operand.vmem [shape: bf16[32,32], index: 0, kind: input, shape index: {}]   ;;  %s542_s3 = inlined_call_operand.vmem [shape: bf16[32,64], index: 3, kind: input, shape index: {}]   ;;  %s543_s2 = inlined_call_operand.vmem [shape: f32[1,64], index: 2, kind: input, shape index: {}]   ;;  %s544_s4 = inlined_call_operand.vmem [shape: f32[1,32], index: 4, kind: input, shape index: {}]   ;;  %s545_s5 = inlined_call_operand.vmem [shape: f32[1,32], index: 5, kind: input, shape index: {}]   ;;  %s546_s6 = inlined_call_operand.vmem [shape: f32[1,32], index: 6, kind: input, shape index: {}]   ;;  %s547_s7 = inlined_call_operand.vmem [shape: bf16[32,32], index: 7, kind: output, shape index: {}]  }
   0x1   :  { %v401_v0 = vld [vmem:[%s540_s1 + $0x18] sm:$0xff]   ;;  %v402_v1 = vld [vmem:[%s540_s1 + $0x10] sm:$0xff]   ;;  %v471_v3 = vld [vmem:[%s541_s0] sm:$0xff]  }
   0x2   :  { %395 = vmatprep.subr.msk.bf16.mxu0 %vm76_vm0, %v401_v0  ;;  %v93_v2 = vsel %vm76_vm0, %v401_v0, 0  ;;  %v407_v4 = vld [vmem:[%s542_s3 + $0x8] sm:$0xff]   ;;  %383 = vmatprep.mubr.msk.bf16.mxu0 %vm76_vm0, %v471_v3  ;;  %v90_v6 = vsel %vm76_vm0, %v402_v1, 0  ;;  %v404_v9 = vld [vmem:[%s540_s1] sm:$0xff]   ;;  %v233_v32 = vunpack.c.l.bf16 %v471_v3  ;;  %v234_v39 = vunpack.c.h.bf16 %v471_v3 }
   0x3   :  { %376 = vmatpush3.bf16.xpose.msra.mxu0 %v93_v2  ;;  %399 = vmatprep.subr.msk.bf16.mxu1 %vm171_vm1, %v407_v4  ;;  %v182_v5 = vsel %vm171_vm1, %v407_v4, 0  ;;  %v403_v7 = vld [vmem:[%s540_s1 + $0x8] sm:$0xff]   ;;  %v84_v10 = vsel %vm76_vm0, %v404_v9, 0  ;;  %v408_v12 = vld [vmem:[%s542_s3] sm:$0xff]  }
   0x4   :  { %396 = vmatprep.subr.msk.bf16.mxu0 %vm76_vm0, %v402_v1  ;;  %388 = vmatpush3.bf16.xpose.msra.mxu1 %v182_v5  ;;  %v87_v8 = vsel %vm76_vm0, %v403_v7, 0  ;;  %v29_v11 = vld [vmem:[%s541_s0 + $0x8] sm:$0xff]   ;;  %v179_v13 = vsel %vm171_vm1, %v408_v12, 0  ;;  %v341_v16 = vld [vmem:[%s543_s2] ss:$0 sm:$0xff] }
   0x5   :  { %400 = vmatprep.subr.msk.bf16.mxu1 %vm171_vm1, %v408_v12  ;;  %v350_v29 = vld [vmem:[%s544_s4] ss:$0 sm:$0xff]  ;;  %v235_v30 = vunpack.c.l.bf16 %v29_v11  ;;  %v236_v37 = vunpack.c.h.bf16 %v29_v11 }
   0xb   :  { %378 = vmatpush3.bf16.xpose.msra.mxu0 %v90_v6 }
   0xc   :  { %397 = vmatprep.subr.msk.bf16.mxu0 %vm76_vm0, %v403_v7  ;;  %390 = vmatpush3.bf16.xpose.msra.mxu1 %v179_v13 }
  0x13   :  { %380 = vmatpush3.bf16.xpose.msra.mxu0 %v87_v8 }
  0x14   :  { %398 = vmatprep.subr.msk.bf16.mxu0 %vm76_vm0, %v404_v9 }
  0x1b   :  { %382 = vmatpush3.bf16.xpose.msra.mxu0 %v84_v10 }
  0x22   :  { %384 = vmatmul.mubr.msk.bf16.vlgmr.msra.gmra.mxu0 %vm76_vm0, %v29_v11 }
  0xe2   :  { %v385_v14 = vpop.f32.mrf.mxu0 }
  0xe3   :  { %v138_v20 = vadd.f32 %v385_v14, %v341_v16 }
  0xe4   :  { %v129_v15 = vpop.f32.mrf.mxu0 }
  0xe5   :  { %v130_v18 = vadd.f32 %v341_v16, %v129_v15  ;;  %v146_v26 = vmax.f32 %v138_v20, 0.0 }
  0xe6   :  { %v386_v17 = vpop.f32.mrf.mxu0 }
  0xe7   :  { %v141_v19 = vadd.f32 %v386_v17, %v341_v16  ;;  %v144_v24 = vmax.f32 %v130_v18, 0.0 }
  0xe8   :  { %v132_v21 = vpop.f32.mrf.mxu0 }
  0xe9   :  { %v133_v22 = vadd.f32 %v341_v16, %v132_v21  ;;  %v147_v23 = vmax.f32 %v141_v19, 0.0  ;;  %v355_v19 = vld [vmem:[%s545_s5] ss:$0 sm:$0xff] }
  0xea   :  { %v356_v21 = vld [vmem:[%s546_s6] ss:$0 sm:$0xff] }
  0xeb   :  { %v145_v25 = vmax.f32 %v133_v22, 0.0  ;;  %v149_v28 = vpack.c.bf16 %v147_v23, %v146_v26 }
  0xed   :  { %v148_v27 = vpack.c.bf16 %v145_v25, %v144_v24 }
  0xef   :  { %391 = vmatprep.mubr.msk.bf16.mxu1 %vm171_vm1, %v148_v27 }
  0xf0   :  { %392 = vmatmul.mubr.msk.bf16.vlgmr.msra.gmra.mxu1 %vm171_vm1, %v149_v28 }
 0x1b0   :  { %v393_v31 = vpop.f32.mrf.mxu1 }
 0x1b1   :  { %v227_v33 = vadd.f32 %v393_v31, %v350_v29 }
 0x1b2   :  { %v218_v34 = vpop.f32.mrf.mxu1 }
 0x1b3   :  { %v219_v35 = vadd.f32 %v350_v29, %v218_v34  ;;  %v239_v36 = vadd.f32 %v235_v30, %v227_v33 }
 0x1b4   :  { %v394_v38 = vpop.f32.mrf.mxu1 }
 0x1b5   :  { %v230_v40 = vadd.f32 %v394_v38, %v350_v29  ;;  %v247_v41 = vsel %vm76_vm0, %v239_v36, 0.0  ;;  %v237_v42 = vadd.f32 %v233_v32, %v219_v35 }
 0x1b6   :  { %248 = vadd.xlane.f32.xlu1 %v247_v41  ;;  %v221_v43 = vpop.f32.mrf.mxu1 }
 0x1b7   :  { %v222_v44 = vadd.f32 %v350_v29, %v221_v43  ;;  %v241_v45 = vsel %vm76_vm0, %v237_v42, 0.0  ;;  %v240_v46 = vadd.f32 %v236_v37, %v230_v40 }
 0x1b8   :  { %242 = vadd.xlane.f32.xlu0 %v241_v45 }
 0x1b9   :  { %v250_v47 = vsel %vm76_vm0, %v240_v46, 0.0  ;;  %v238_v48 = vadd.f32 %v234_v39, %v222_v44 }
 0x1ba   :  { %251 = vadd.xlane.f32.xlu1 %v250_v47 }
 0x1bb   :  { %v244_v49 = vsel %vm76_vm0, %v238_v48, 0.0 }
 0x1bc   :  { %245 = vadd.xlane.f32.xlu0 %v244_v49 }
 0x23f   :  { %v249_v50 = vpop.xlane.xlu1 %248 }
 0x240   :  { %v256_v51 = vmul.f32 0.03125, %v249_v50 }
 0x241   :  { %v243_v52 = vpop.xlane.xlu0 %242 }
 0x242   :  { %v254_v53 = vmul.f32 0.03125, %v243_v52  ;;  %v260_v55 = vsub.f32 %v239_v36, %v256_v51 }
 0x243   :  { %v252_v54 = vpop.xlane.xlu1 %251 }
 0x244   :  { %v258_v56 = vsub.f32 %v237_v42, %v254_v53  ;;  %v257_v57 = vmul.f32 0.03125, %v252_v54  ;;  %v264_v0 = vmul.f32 %v260_v55, %v260_v55 }
 0x245   :  { %v246_v58 = vpop.xlane.xlu0 %245 }
 0x246   :  { %v255_v59 = vmul.f32 0.03125, %v246_v58  ;;  %v262_v60 = vmul.f32 %v258_v56, %v258_v56  ;;  %v261_v61 = vsub.f32 %v240_v46, %v257_v57  ;;  %v272_v2 = vsel %vm76_vm0, %v264_v0, 0.0 }
 0x248   :  { %v259_v62 = vsub.f32 %v238_v48, %v255_v59  ;;  %v266_v63 = vsel %vm76_vm0, %v262_v60, 0.0  ;;  %v265_v4 = vmul.f32 %v261_v61, %v261_v61 }
 0x249   :  { %267 = vadd.xlane.f32.xlu0 %v266_v63 }
 0x24a   :  { %v263_v1 = vmul.f32 %v259_v62, %v259_v62  ;;  %v275_v5 = vsel %vm76_vm0, %v265_v4, 0.0 }
 0x24c   :  { %v269_v3 = vsel %vm76_vm0, %v263_v1, 0.0 }
 0x24d   :  { %273 = vadd.xlane.f32.xlu0 %v272_v2  ;;  %270 = vadd.xlane.f32.xlu1 %v269_v3 }
 0x251   :  { %276 = vadd.xlane.f32.xlu1 %v275_v5 }
 0x2d2   :  { %v268_v6 = vpop.xlane.xlu0 %267 }
 0x2d3   :  { %v278_v7 = vmul.f32 0.03125, %v268_v6 }
 0x2d5   :  { %v282_v8 = vadd.f32 1e-05, %v278_v7 }
 0x2d6   :  { %v271_v9 = vpop.xlane.xlu1 %270  ;;  %v274_v10 = vpop.xlane.xlu0 %273 }
 0x2d7   :  { %411 = vrsqrt.f32 %v282_v8  ;;  %v279_v11 = vmul.f32 0.03125, %v271_v9  ;;  %v280_v12 = vmul.f32 0.03125, %v274_v10 }
 0x2d9   :  { %v283_v13 = vadd.f32 1e-05, %v279_v11  ;;  %v284_v14 = vadd.f32 1e-05, %v280_v12 }
 0x2da   :  { %v277_v15 = vpop.xlane.xlu1 %276 }
 0x2db   :  { %413 = vrsqrt.f32 %v283_v13  ;;  %v281_v16 = vmul.f32 0.03125, %v277_v15 }
 0x2dc   :  { %415 = vrsqrt.f32 %v284_v14 }
 0x2dd   :  { %v285_v17 = vadd.f32 1e-05, %v281_v16 }
 0x2df   :  { %417 = vrsqrt.f32 %v285_v17 }
 0x2e4   :  { %v412_v18 = vpop.eup %411 }
 0x2e5   :  { %v290_v20 = vmul.f32 %v412_v18, %v258_v56 }
 0x2e7   :  { %v301_v22 = vmul.f32 %v355_v19, %v290_v20 }
 0x2e8   :  { %v414_v23 = vpop.eup %413 }
 0x2e9   :  { %v416_v24 = vpop.eup %415  ;;  %v312_v25 = vadd.f32 %v356_v21, %v301_v22  ;;  %v291_v26 = vmul.f32 %v414_v23, %v259_v62 }
 0x2ea   :  { %v292_v27 = vmul.f32 %v416_v24, %v260_v55 }
 0x2eb   :  { %v361_v28 = vpack.c.bf16 %v312_v25, %v312_v25  ;;  %v302_v29 = vmul.f32 %v355_v19, %v291_v26 }
 0x2ec   :  { %v418_v30 = vpop.eup %417  ;;  %v303_v31 = vmul.f32 %v355_v19, %v292_v27 }
 0x2ed   :  { %333 = vst.msk [vmem:[%s547_s7] sm:$0xf] %vm332_vm2, %v361_v28  ;;  %v313_v32 = vadd.f32 %v356_v21, %v302_v29  ;;  %v293_v33 = vmul.f32 %v418_v30, %v261_v61 }
 0x2ee   :  { %v314_v34 = vadd.f32 %v356_v21, %v303_v31 }
 0x2ef   :  { %v362_v35 = vpack.c.bf16 %v313_v32, %v313_v32  ;;  %v304_v36 = vmul.f32 %v355_v19, %v293_v33 }
 0x2f0   :  { %v363_v37 = vpack.c.bf16 %v314_v34, %v314_v34 }
 0x2f1   :  { %334 = vst.msk [vmem:[%s547_s7 + $0x4] sm:$0xf] %vm332_vm2, %v362_v35  ;;  %v315_v38 = vadd.f32 %v356_v21, %v304_v36 }
 0x2f2   :  { %335 = vst.msk [vmem:[%s547_s7 + $0x8] sm:$0xf] %vm332_vm2, %v363_v37 }
 0x2f3   :  { %v364_v39 = vpack.c.bf16 %v315_v38, %v315_v38 }
 0x2f5   :  { %336 = vst.msk [vmem:[%s547_s7 + $0xc] sm:$0xf] %vm332_vm2, %v364_v39 }

// kernel: forward.25
= control target key start
LH: loop header
LB: loop body
LE: loop exit
PB: predicated region body
PF: predicated region fallthrough
CT: control target
= control target key end

     0   :  { %vm22_vm0 = vcmask 261120   ;;  %vm114_vm1 = vcmask 257024   ;;  %s206_s0 = inlined_call_operand.vmem [shape: bf16[32,32], index: 0, kind: input, shape index: {}]   ;;  %s207_s1 = inlined_call_operand.vmem [shape: f32[1,32], index: 1, kind: input, shape index: {}]   ;;  %s208_s2 = inlined_call_operand.vmem [shape: f32[1,32], index: 2, kind: input, shape index: {}]   ;;  %s209_s3 = inlined_call_operand.vmem [shape: bf16[32,32], index: 3, kind: output, shape index: {}]  }
   0x1   :  { %v134_v0 = vld [vmem:[%s206_s0] sm:$0xff]   ;;  %v141_v1 = vld [vmem:[%s206_s0 + $0x8] sm:$0xff]  }
   0x2   :  { %v135_v2 = vunpack.c.l.bf16 %v134_v0  ;;  %v139_v3 = vunpack.c.l.bf16 %v141_v1  ;;  %v136_v4 = vunpack.c.h.bf16 %v134_v0  ;;  %v140_v5 = vunpack.c.h.bf16 %v141_v1  ;;  %v123_v43 = vld [vmem:[%s207_s1] ss:$0 sm:$0xff] }
   0x3   :  { %v124_v45 = vld [vmem:[%s208_s2] ss:$0 sm:$0xff] }
   0x4   :  { %v23_v6 = vsel %vm22_vm0, %v135_v2, 0.0  ;;  %v29_v7 = vsel %vm22_vm0, %v139_v3, 0.0  ;;  %v26_v8 = vsel %vm22_vm0, %v136_v4, 0.0  ;;  %v32_v9 = vsel %vm22_vm0, %v140_v5, 0.0 }
   0x5   :  { %24 = vadd.xlane.f32.xlu0 %v23_v6  ;;  %30 = vadd.xlane.f32.xlu1 %v29_v7 }
   0x9   :  { %27 = vadd.xlane.f32.xlu0 %v26_v8  ;;  %33 = vadd.xlane.f32.xlu1 %v32_v9 }
  0x8e   :  { %v25_v10 = vpop.xlane.xlu0 %24  ;;  %v31_v11 = vpop.xlane.xlu1 %30 }
  0x8f   :  { %v36_v12 = vmul.f32 0.03125, %v25_v10  ;;  %v38_v13 = vmul.f32 0.03125, %v31_v11 }
  0x91   :  { %v40_v14 = vsub.f32 %v135_v2, %v36_v12  ;;  %v42_v15 = vsub.f32 %v139_v3, %v38_v13 }
  0x92   :  { %v28_v16 = vpop.xlane.xlu0 %27  ;;  %v34_v17 = vpop.xlane.xlu1 %33 }
  0x93   :  { %v37_v18 = vmul.f32 0.03125, %v28_v16  ;;  %v39_v19 = vmul.f32 0.03125, %v34_v17  ;;  %v44_v20 = vmul.f32 %v40_v14, %v40_v14  ;;  %v46_v21 = vmul.f32 %v42_v15, %v42_v15 }
  0x95   :  { %v41_v22 = vsub.f32 %v136_v4, %v37_v18  ;;  %v43_v23 = vsub.f32 %v140_v5, %v39_v19  ;;  %v48_v24 = vsel %vm22_vm0, %v44_v20, 0.0  ;;  %v54_v25 = vsel %vm22_vm0, %v46_v21, 0.0 }
  0x96   :  { %49 = vadd.xlane.f32.xlu0 %v48_v24 }
  0x97   :  { %v45_v26 = vmul.f32 %v41_v22, %v41_v22  ;;  %v47_v27 = vmul.f32 %v43_v23, %v43_v23 }
  0x99   :  { %v51_v28 = vsel %vm22_vm0, %v45_v26, 0.0  ;;  %v57_v29 = vsel %vm22_vm0, %v47_v27, 0.0 }
  0x9a   :  { %55 = vadd.xlane.f32.xlu0 %v54_v25  ;;  %52 = vadd.xlane.f32.xlu1 %v51_v28 }
  0x9e   :  { %58 = vadd.xlane.f32.xlu1 %v57_v29 }
 0x11f   :  { %v50_v30 = vpop.xlane.xlu0 %49 }
 0x120   :  { %v60_v31 = vmul.f32 0.03125, %v50_v30 }
 0x122   :  { %v64_v32 = vadd.f32 1e-05, %v60_v31 }
 0x123   :  { %v53_v33 = vpop.xlane.xlu1 %52  ;;  %v56_v34 = vpop.xlane.xlu0 %55 }
 0x124   :  { %142 = vrsqrt.f32 %v64_v32  ;;  %v61_v35 = vmul.f32 0.03125, %v53_v33  ;;  %v62_v36 = vmul.f32 0.03125, %v56_v34 }
 0x126   :  { %v65_v37 = vadd.f32 1e-05, %v61_v35  ;;  %v66_v38 = vadd.f32 1e-05, %v62_v36 }
 0x127   :  { %v59_v39 = vpop.xlane.xlu1 %58 }
 0x128   :  { %144 = vrsqrt.f32 %v65_v37  ;;  %v63_v40 = vmul.f32 0.03125, %v59_v39 }
 0x129   :  { %146 = vrsqrt.f32 %v66_v38 }
 0x12a   :  { %v67_v41 = vadd.f32 1e-05, %v63_v40 }
 0x12c   :  { %148 = vrsqrt.f32 %v67_v41 }
 0x131   :  { %v143_v42 = vpop.eup %142 }
 0x132   :  { %v72_v44 = vmul.f32 %v143_v42, %v40_v14 }
 0x134   :  { %v83_v46 = vmul.f32 %v123_v43, %v72_v44 }
 0x135   :  { %v145_v47 = vpop.eup %144 }
 0x136   :  { %v147_v48 = vpop.eup %146  ;;  %v94_v49 = vadd.f32 %v124_v45, %v83_v46  ;;  %v73_v50 = vmul.f32 %v145_v47, %v41_v22 }
 0x137   :  { %v74_v51 = vmul.f32 %v147_v48, %v42_v15 }
 0x138   :  { %v129_v52 = vpack.c.bf16 %v94_v49, %v94_v49  ;;  %v84_v53 = vmul.f32 %v123_v43, %v73_v50 }
 0x139   :  { %v149_v54 = vpop.eup %148  ;;  %v85_v55 = vmul.f32 %v123_v43, %v74_v51 }
 0x13a   :  { %115 = vst.msk [vmem:[%s209_s3] sm:$0xf] %vm114_vm1, %v129_v52  ;;  %v95_v56 = vadd.f32 %v124_v45, %v84_v53  ;;  %v75_v57 = vmul.f32 %v149_v54, %v43_v23 }
 0x13b   :  { %v96_v58 = vadd.f32 %v124_v45, %v85_v55 }
 0x13c   :  { %v130_v59 = vpack.c.bf16 %v95_v56, %v95_v56  ;;  %v86_v60 = vmul.f32 %v123_v43, %v75_v57 }
 0x13d   :  { %v131_v61 = vpack.c.bf16 %v96_v58, %v96_v58 }
 0x13e   :  { %116 = vst.msk [vmem:[%s209_s3 + $0x4] sm:$0xf] %vm114_vm1, %v130_v59  ;;  %v97_v62 = vadd.f32 %v124_v45, %v86_v60 }
 0x13f   :  { %117 = vst.msk [vmem:[%s209_s3 + $0x8] sm:$0xf] %vm114_vm1, %v131_v61 }
 0x140   :  { %v132_v63 = vpack.c.bf16 %v97_v62, %v97_v62 }
 0x142   :  { %118 = vst.msk [vmem:[%s209_s3 + $0xc] sm:$0xf] %vm114_vm1, %v132_v63 }

// kernel: forward.29
= control target key start
LH: loop header
LB: loop body
LE: loop exit
PB: predicated region body
PF: predicated region fallthrough
CT: control target
= control target key end

     0   :  { %vm52_vm0 = vcmask 261120   ;;  %s304_s27 = smov 96   ;;  %vm130_vm1 = vcmask 257024   ;;  %s395_s1 = inlined_call_operand.vmem [shape: bf16[64,32], index: 1, kind: input, shape index: {}]   ;;  %s396_s0 = inlined_call_operand.vmem [shape: bf16[32,32], index: 0, kind: input, shape index: {}]   ;;  %s397_s2 = inlined_call_operand.vmem [shape: f32[1,64], index: 2, kind: input, shape index: {}]   ;;  %s398_s3 = inlined_call_operand.vmem [shape: bf16[32,32], index: 3, kind: output, shape index: {0}]   ;;  %s399_s4 = inlined_call_operand.vmem [shape: bf16[32,32], index: 4, kind: output, shape index: {1}]  }
   0x1   :  { %v298_v0 = vld [vmem:[%s395_s1 + $0x8] sm:$0xff]   ;;  %v299_v1 = vld [vmem:[%s395_s1 + $0x18] sm:$0xff]   ;;  %v300_v3 = vld [vmem:[%s395_s1] sm:$0xff]  }
   0x2   :  { %293 = vmatprep.subr.msk.bf16.mxu0 %vm52_vm0, %v298_v0  ;;  %v63_v2 = vsel %vm52_vm0, %v298_v0, 0  ;;  %295 = vmatprep.subr.msk.bf16.mxu1 %vm52_vm0, %v299_v1  ;;  %v162_v4 = vsel %vm52_vm0, %v299_v1, 0  ;;  %v301_v5 = vld [vmem:[%s395_s1 + $0x10] sm:$0xff]   ;;  %v302_v6 = vld [vmem:[%s396_s0] sm:$0xff]   ;;  %v60_v8 = vsel %vm52_vm0, %v300_v3, 0  ;;  %v303_v10 = vld [vmem:[%s396_s0 + $0x8] sm:$0xff]  }
   0x3   :  { %278 = vmatpush3.bf16.xpose.msra.mxu0 %v63_v2  ;;  %286 = vmatpush3.bf16.xpose.msra.mxu1 %v162_v4  ;;  %v241_v7 = vld [vmem:[%s397_s2] ss:$0 sm:$0xff]  ;;  %v159_v9 = vsel %vm52_vm0, %v301_v5, 0 }
   0x4   :  { %294 = vmatprep.subr.msk.bf16.mxu0 %vm52_vm0, %v300_v3  ;;  %296 = vmatprep.subr.msk.bf16.mxu1 %vm52_vm0, %v301_v5 }
   0x5   :  { %281 = vmatprep.mubr.msk.bf16.mxu0 %vm52_vm0, %v302_v6  ;;  %289 = vmatprep.mubr.msk.bf16.mxu1 %vm52_vm0, %v302_v6 }
   0x6   :  { %155 = vrot.lane.b32.xlu0 %v241_v7, %s304_s27 }
   0xb   :  { %280 = vmatpush3.bf16.xpose.msra.mxu0 %v60_v8  ;;  %288 = vmatpush3.bf16.xpose.msra.mxu1 %v159_v9 }
  0x12   :  { %282 = vmatmul.mubr.msk.bf16.vlgmr.msra.gmra.mxu0 %vm52_vm0, %v303_v10  ;;  %290 = vmatmul.mubr.msk.bf16.vlgmr.msra.gmra.mxu1 %vm52_vm0, %v303_v10 }
  0x78   :  { %v156_v11 = vpop.permute.xlu0 %155 }
  0xd2   :  { %v283_v12 = vpop.f32.mrf.mxu0  ;;  %v291_v14 = vpop.f32.mrf.mxu1 }
  0xd3   :  { %v108_v13 = vadd.f32 %v283_v12, %v241_v7  ;;  %v207_v15 = vadd.f32 %v291_v14, %v156_v11 }
  0xd4   :  { %v99_v16 = vpop.f32.mrf.mxu0  ;;  %v198_v19 = vpop.f32.mrf.mxu1 }
  0xd5   :  { %v263_v17 = vpack.c.bf16 %v108_v13, %v108_v13  ;;  %v100_v18 = vadd.f32 %v241_v7, %v99_v16  ;;  %v267_v20 = vpack.c.bf16 %v207_v15, %v207_v15  ;;  %v199_v21 = vadd.f32 %v198_v19, %v156_v11 }
  0xd6   :  { %v284_v22 = vpop.f32.mrf.mxu0  ;;  %v292_v25 = vpop.f32.mrf.mxu1 }
  0xd7   :  { %133 = vst.msk [vmem:[%s398_s3 + $0x8] sm:$0xf] %vm130_vm1, %v263_v17  ;;  %v261_v23 = vpack.c.bf16 %v100_v18, %v100_v18  ;;  %v111_v24 = vadd.f32 %v284_v22, %v241_v7  ;;  %231 = vst.msk [vmem:[%s399_s4 + $0x8] sm:$0xf] %vm130_vm1, %v267_v20  ;;  %v265_v26 = vpack.c.bf16 %v199_v21, %v199_v21 }
  0xd8   :  { %v210_v27 = vadd.f32 %v292_v25, %v156_v11  ;;  %v102_v28 = vpop.f32.mrf.mxu0  ;;  %v201_v31 = vpop.f32.mrf.mxu1 }
  0xd9   :  { %131 = vst.msk [vmem:[%s398_s3] sm:$0xf] %vm130_vm1, %v261_v23  ;;  %v264_v29 = vpack.c.bf16 %v111_v24, %v111_v24  ;;  %v103_v30 = vadd.f32 %v241_v7, %v102_v28  ;;  %229 = vst.msk [vmem:[%s399_s4] sm:$0xf] %vm130_vm1, %v265_v26  ;;  %v202_v33 = vadd.f32 %v201_v31, %v156_v11 }
  0xda   :  { %v268_v32 = vpack.c.bf16 %v210_v27, %v210_v27 }
  0xdb   :  { %134 = vst.msk [vmem:[%s398_s3 + $0xc] sm:$0xf] %vm130_vm1, %v264_v29  ;;  %v262_v34 = vpack.c.bf16 %v103_v30, %v103_v30  ;;  %v266_v35 = vpack.c.bf16 %v202_v33, %v202_v33 }
  0xdc   :  { %232 = vst.msk [vmem:[%s399_s4 + $0xc] sm:$0xf] %vm130_vm1, %v268_v32 }
  0xdd   :  { %132 = vst.msk [vmem:[%s398_s3 + $0x4] sm:$0xf] %vm130_vm1, %v262_v34  ;;  %230 = vst.msk [vmem:[%s399_s4 + $0x4] sm:$0xf] %vm130_vm1, %v266_v35 }

// kernel: forward.28
= control target key start
LH: loop header
LB: loop body
LE: loop exit
PB: predicated region body
PF: predicated region fallthrough
CT: control target
= control target key end

     0   :  { %vm43_vm0 = vcmask 261120   ;;  %v135_v0 = vmov 0.0   ;;  %vm136_vm1 = vmmov 0   ;;  %vm102_vm2 = vcmask 257024   ;;  %s175_s1 = inlined_call_operand.vmem [shape: bf16[32,32], index: 1, kind: input, shape index: {}]   ;;  %s176_s0 = inlined_call_operand.vmem [shape: bf16[12,32], index: 0, kind: input, shape index: {}]   ;;  %s177_s2 = inlined_call_operand.vmem [shape: f32[1,32], index: 2, kind: input, shape index: {}]   ;;  %s178_s3 = inlined_call_operand.vmem [shape: bf16[12,32], index: 3, kind: output, shape index: {}]  }
   0x1   :  { %122 = vmatprep.subr.bf16.mxu0 %v135_v0  ;;  %v132_v1 = vld [vmem:[%s175_s1 + $0x8] sm:$0xff]   ;;  %126 = vmatprep.mubr.msk.bf16.mxu0 %vm136_vm1, %v135_v0  ;;  %v133_v3 = vld [vmem:[%s175_s1] sm:$0xff]   ;;  %vm104_vm3 = vcmask 254976  }
   0x2   :  { %v51_v2 = vsel %vm43_vm0, %v132_v1, 0  ;;  %v48_v4 = vsel %vm43_vm0, %v133_v3, 0  ;;  %v134_v5 = vld [vmem:[%s176_s0] sm:$0x3f]  }
   0x3   :  { %123 = vmatpush3.bf16.xpose.msra.mxu0 %v51_v2  ;;  %v110_v6 = vld [vmem:[%s177_s2] ss:$0 sm:$0xff] }
   0x4   :  { %124 = vmatprep.subr.bf16.mxu0 %v135_v0 }
   0xb   :  { %125 = vmatpush3.bf16.xpose.msra.mxu0 %v48_v4 }
  0x12   :  { %127 = vmatmul.mubr.msk.bf16.vlgmr.msra.gmra.mxu0 %vm43_vm0, %v134_v5 }
  0xd2   :  { %v87_v7 = vpop.f32.mrf.mxu0 }
  0xd3   :  { %v88_v8 = vadd.f32 %v110_v6, %v87_v7 }
  0xd4   :  { %v128_v9 = vpop.f32.mrf.mxu0 }
  0xd5   :  { %v117_v10 = vpack.c.bf16 %v88_v8, %v88_v8 }
  0xd6   :  { %v90_v11 = vpop.f32.mrf.mxu0 }
  0xd7   :  { %103 = vst.msk [vmem:[%s178_s3] sm:$0xf] %vm102_vm2, %v117_v10  ;;  %v91_v12 = vadd.f32 %v110_v6, %v90_v11 }
  0xd8   :  { %v129_v13 = vpop.f32.mrf.mxu0 }
  0xd9   :  { %v118_v14 = vpack.c.bf16 %v91_v12, %v91_v12 }
  0xdb   :  { %105 = vst.msk [vmem:[%s178_s3 + $0x4] sm:$0x3] %vm104_vm3, %v118_v14 }

// kernel: forward.26
= control target key start
LH: loop header
LB: loop body
LE: loop exit
PB: predicated region body
PF: predicated region fallthrough
CT: control target
= control target key end

     0   :  { %vm46_vm0 = vcmask 261120   ;;  %v350_v0 = vmov 0.0   ;;  %vm351_vm1 = vmmov 0   ;;  %s352_s28 = smov 96   ;;  %s353_s6 = smov 64   ;;  %vm105_vm2 = vcmask 257024   ;;  %s444_s1 = inlined_call_operand.vmem [shape: bf16[96,32], index: 1, kind: input, shape index: {}]   ;;  %s445_s0 = inlined_call_operand.vmem [shape: bf16[12,32], index: 0, kind: input, shape index: {}]   ;;  %s446_s2 = inlined_call_operand.vmem [shape: f32[1,96], index: 2, kind: input, shape index: {}]   ;;  %s447_s3 = inlined_call_operand.vmem [shape: bf16[12,32], index: 3, kind: output, shape index: {0}]   ;;  %s448_s4 = inlined_call_operand.vmem [shape: bf16[12,32], index: 4, kind: output, shape index: {1}]   ;;  %s449_s5 = inlined_call_operand.vmem [shape: bf16[12,32], index: 5, kind: output, shape index: {2}]  }
   0x1   :  { %315 = vmatprep.subr.bf16.mxu0 %v350_v0  ;;  %v343_v1 = vld [vmem:[%s444_s1 + $0x8] sm:$0xff]   ;;  %323 = vmatprep.subr.bf16.mxu1 %v350_v0  ;;  %v345_v3 = vld [vmem:[%s444_s1 + $0x18] sm:$0xff]   ;;  %v344_v4 = vld [vmem:[%s444_s1] sm:$0xff]   ;;  %vm107_vm3 = vcmask 254976  }
   0x2   :  { %319 = vmatprep.mubr.msk.bf16.mxu0 %vm351_vm1, %v350_v0  ;;  %327 = vmatprep.mubr.msk.bf16.mxu1 %vm351_vm1, %v350_v0  ;;  %v54_v2 = vsel %vm46_vm0, %v343_v1, 0  ;;  %v136_v5 = vsel %vm46_vm0, %v345_v3, 0  ;;  %v348_v6 = vld [vmem:[%s444_s1 + $0x10] sm:$0xff]   ;;  %v288_v7 = vld [vmem:[%s446_s2] ss:$0 sm:$0xff]  ;;  %v51_v8 = vsel %vm46_vm0, %v344_v4, 0 }
   0x3   :  { %316 = vmatpush3.bf16.xpose.msra.mxu0 %v54_v2  ;;  %324 = vmatpush3.bf16.xpose.msra.mxu1 %v136_v5  ;;  %v133_v9 = vsel %vm46_vm0, %v348_v6, 0  ;;  %v347_v10 = vld [vmem:[%s444_s1 + $0x28] sm:$0xff]   ;;  %v346_v11 = vld [vmem:[%s445_s0] sm:$0x3f]  }
   0x4   :  { %317 = vmatprep.subr.bf16.mxu0 %v350_v0  ;;  %325 = vmatprep.subr.bf16.mxu1 %v350_v0  ;;  %v216_v12 = vsel %vm46_vm0, %v347_v10, 0  ;;  %v349_v13 = vld [vmem:[%s444_s1 + $0x20] sm:$0xff]  }
   0x5   :  { %129 = vrot.lane.b32.xlu0 %v288_v7, %s352_s28  ;;  %v213_v14 = vsel %vm46_vm0, %v349_v13, 0 }
   0x9   :  { %209 = vrot.lane.b32.xlu0 %v288_v7, %s353_s6 }
   0xb   :  { %318 = vmatpush3.bf16.xpose.msra.mxu0 %v51_v8  ;;  %326 = vmatpush3.bf16.xpose.msra.mxu1 %v133_v9 }
   0xc   :  { %331 = vmatprep.subr.bf16.mxu0 %v350_v0 }
  0x12   :  { %320 = vmatmul.mubr.msk.bf16.vlgmr.msra.gmra.mxu0 %vm46_vm0, %v346_v11  ;;  %328 = vmatmul.mubr.msk.bf16.vlgmr.msra.gmra.mxu1 %vm46_vm0, %v346_v11 }
  0x13   :  { %332 = vmatpush3.bf16.xpose.msra.mxu0 %v216_v12  ;;  %335 = vmatprep.mubr.msk.bf16.mxu0 %vm351_vm1, %v350_v0 }
  0x14   :  { %333 = vmatprep.subr.bf16.mxu0 %v350_v0 }
  0x1b   :  { %334 = vmatpush3.bf16.xpose.msra.mxu0 %v213_v14 }
  0x22   :  { %336 = vmatmul.mubr.msk.bf16.vlgmr.msra.gmra.mxu0 %vm46_vm0, %v346_v11 }
  0x77   :  { %v130_v17 = vpop.permute.xlu0 %129 }
  0x7b   :  { %v210_v32 = vpop.permute.xlu0 %209 }
  0xd2   :  { %v90_v15 = vpop.f32.mrf.mxu0  ;;  %v172_v19 = vpop.f32.mrf.mxu1 }
  0xd3   :  { %v91_v16 = vadd.f32 %v288_v7, %v90_v15  ;;  %v173_v21 = vadd.f32 %v172_v19, %v130_v17 }
  0xd4   :  { %v321_v18 = vpop.f32.mrf.mxu0  ;;  %v329_v23 = vpop.f32.mrf.mxu1 }
  0xd5   :  { %v300_v20 = vpack.c.bf16 %v91_v16, %v91_v16  ;;  %v302_v25 = vpack.c.bf16 %v173_v21, %v173_v21 }
  0xd6   :  { %v93_v22 = vpop.f32.mrf.mxu0  ;;  %v175_v27 = vpop.f32.mrf.mxu1 }
  0xd7   :  { %106 = vst.msk [vmem:[%s447_s3] sm:$0xf] %vm105_vm2, %v300_v20  ;;  %v94_v24 = vadd.f32 %v288_v7, %v93_v22  ;;  %187 = vst.msk [vmem:[%s448_s4] sm:$0xf] %vm105_vm2, %v302_v25  ;;  %v176_v29 = vadd.f32 %v175_v27, %v130_v17 }
  0xd8   :  { %v322_v26 = vpop.f32.mrf.mxu0  ;;  %v330_v30 = vpop.f32.mrf.mxu1 }
  0xd9   :  { %v301_v28 = vpack.c.bf16 %v94_v24, %v94_v24  ;;  %v303_v31 = vpack.c.bf16 %v176_v29, %v176_v29 }
  0xdb   :  { %108 = vst.msk [vmem:[%s447_s3 + $0x4] sm:$0x3] %vm107_vm3, %v301_v28  ;;  %188 = vst.msk [vmem:[%s448_s4 + $0x4] sm:$0x3] %vm107_vm3, %v303_v31 }
  0xe2   :  { %v252_v33 = vpop.f32.mrf.mxu0 }
  0xe3   :  { %v253_v34 = vadd.f32 %v252_v33, %v210_v32 }
  0xe4   :  { %v337_v35 = vpop.f32.mrf.mxu0 }
  0xe5   :  { %v304_v36 = vpack.c.bf16 %v253_v34, %v253_v34 }
  0xe6   :  { %v255_v37 = vpop.f32.mrf.mxu0 }
  0xe7   :  { %267 = vst.msk [vmem:[%s449_s5] sm:$0xf] %vm105_vm2, %v304_v36  ;;  %v256_v38 = vadd.f32 %v255_v37, %v210_v32 }
  0xe8   :  { %v338_v39 = vpop.f32.mrf.mxu0 }
  0xe9   :  { %v305_v40 = vpack.c.bf16 %v256_v38, %v256_v38 }
  0xeb   :  { %268 = vst.msk [vmem:[%s449_s5 + $0x4] sm:$0x3] %vm107_vm3, %v305_v40 }

// kernel: forward.27
= control target key start
LH: loop header
LB: loop body
LE: loop exit
PB: predicated region body
PF: predicated region fallthrough
CT: control target
= control target key end

     0   :  { %s1403_s27 = smov 0   ;;  %s1575_s0 = inlined_call_operand.vmem [shape: bf16[2,6,32], index: 0, kind: input, shape index: {}]   ;;  %s1576_s1 = inlined_call_operand.vmem [shape: bf16[2,6,32], index: 1, kind: input, shape index: {}]   ;;  %s1577_s2 = inlined_call_operand.vmem [shape: bf16[2,6,32], index: 2, kind: input, shape index: {}]   ;;  %s1578_s3 = inlined_call_operand.vmem [shape: bf16[2,6,32], index: 3, kind: input, shape index: {}]   ;;  %s1579_s4 = inlined_call_operand.vmem [shape: bf16[32,32], index: 4, kind: input, shape index: {}]   ;;  %s1580_s5 = inlined_call_operand.vmem [shape: f32[1,32], index: 5, kind: input, shape index: {}]   ;;  %s1581_s6 = inlined_call_operand.vmem [shape: f32[1,32], index: 6, kind: input, shape index: {}]   ;;  %s1582_s7 = inlined_call_operand.vmem [shape: f32[1,32], index: 7, kind: input, shape index: {}]   ;;  %s1583_s8 = inlined_call_operand.vmem [shape: bf16[2,6,32], index: 8, kind: output, shape index: {}]  }
   0x1 LB: > { %s1169_s28 = sadd.s32 4294967295, %s1351_s27   ;;  %p1173_p0 = scmp.ge.s32.totalorder %s1351_s27, 1  ;;  %s1351_s27 = sphi %s1403_s27, %s18_s27  }
   0x2   : > { %p288_p1 = scmp.lt.s32.totalorder %s1351_s27, 3 }
   0x4   : > { %p289_p2 = pnand %p1173_p0, %p288_p1 }
   0x5   : > { %p332_p3 = scmp.lt.s32.totalorder (!%p289_p2), %s1169_s28, 1  ;;  %s1355_s14 = smov (!%p289_p2), 120  }
   0x6   : > { %292 = sbr.rel (%p289_p2) target bundleno = 2583 (0xa17), region = 52  ;;  %s1356_s22 = smov (!%p289_p2), 112  }
   0x7   : > { %s1357_s23 = smov (!%p289_p2), 104  }
   0xb   : > { %v1353_v0 = vmov 0.0   ;;  %vm1354_vm0 = vmmov 0   ;;  %s1585_s28 = smov (!%p332_p3, %s1169_s28), 1  ;;  %vm356_vm1 = vcmask 64512   ;;  %vm404_vm2 = vcmask 46080   ;;  %v1462_v35 = vld [vmem:[%s1579_s4 + $0x8] sm:$0xff]  }
   0xc   : > { %1229 = vmatprep.subr.bf16.mxu0 %v1353_v0  ;;  %1231 = vmatprep.mubr.msk.bf16.mxu0 %vm1354_vm0, %v1353_v0  ;;  %s1417_s29 = sshll.u32 %s1585_s28, 2  ;;  %vm421_vm3 = vcmask 1042432   ;;  %v1469_v36 = vld [vmem:[%s1579_s4] sm:$0xff]   ;;  %vm417_vm4 = vcmask 48128   ;;  %v661_v50 = vsel %vm356_vm1, %v1462_v35, 0  ;;  %vm1046_vm5 = vcmask 259072  }
   0xd   : > { %1241 = vmatprep.subr.bf16.mxu1 %v1353_v0  ;;  %1243 = vmatprep.mubr.msk.bf16.mxu1 %vm1354_vm0, %v1353_v0  ;;  %s339_s10 = scalar_lea.vmem %s1576_s1, %s1417_s29  ;;  %s335_s13 = scalar_lea.vmem %s1575_s0, %s1417_s29  ;;  %v658_v51 = vsel %vm356_vm1, %v1469_v36, 0  ;;  %vm1078_vm6 = vcmask 256000  }
   0xe   : > { %v354_v1 = vld [vmem:[%s339_s10] sm:$0x7]  ;;  %s343_s17 = scalar_lea.vmem %s1577_s2, %s1417_s29  ;;  %s347_s26 = scalar_lea.vmem %s1578_s3, %s1417_s29 }
   0xf   : > { %v361_v2 = vsel %vm356_vm1, %v354_v1, 0  ;;  %v1428_v3 = vcombine.low %v354_v1, %v354_v1  ;;  %v353_v4 = vld [vmem:[%s335_s13] sm:$0x7]  ;;  %s351_s15 = scalar_lea.vmem %s1583_s8, %s1417_s29 }
  0x10   : > { %1230 = vmatpush3.bf16.xpose.msra.mxu0 %v361_v2  ;;  %v1432_v5 = vcombine.low %v353_v4, %v353_v4  ;;  %v355_v26 = vld [vmem:[%s343_s17] sm:$0x7] }
  0x11   : > { %478 = vrot.lane.b32.xlu0 %v1428_v3, %s1355_s14  ;;  %1235 = vmatprep.subr.bf16.mxu0 %v1353_v0  ;;  %v423_v27 = vsel %vm421_vm3, %v355_v26, 0  ;;  %v1455_v33 = vcombine.low %v355_v26, %v355_v26 }
  0x15   : > { %473 = vrot.lane.b32.xlu0 %v1432_v5, %s1355_s14 }
  0x17   : > { %1232 = vmatmul.mubr.msk.bf16.vlgmr.msra.gmra.mxu0 %vm356_vm1, %v353_v4 }
  0x18   : > { %1237 = vmatprep.mubr.msk.bf16.mxu0 %vm1354_vm0, %v1353_v0  ;;  %1236 = vmatpush3.bf16.msra.mxu0 %v423_v27 }
  0x19   : > { %1247 = vmatprep.subr.bf16.mxu0 %v1353_v0 }
  0x83   : > { %v479_v6 = vpop.permute.xlu0 %478 }
  0x84   : > { %v484_v7 = vsel %vm356_vm1, %v479_v6, 0 }
  0x85   : > { %1242 = vmatpush3.bf16.xpose.msra.mxu1 %v484_v7 }
  0x86   : > { %1253 = vmatprep.subr.bf16.mxu1 %v1353_v0 }
  0x87   : > { %v474_v8 = vpop.permute.xlu0 %473 }
  0x8c   : > { %1244 = vmatmul.mubr.msk.bf16.vlgmr.msra.gmra.mxu1 %vm356_vm1, %v474_v8 }
  0x8d   : > { %1257 = vmatprep.mubr.msk.bf16.mxu1 %vm1354_vm0, %v1353_v0 }
  0xd7   : > { %v397_v9 = vpop.f32.mrf.mxu0 }
  0xd8   : > { %v403_v10 = vmul.f32 0.35355338, %v397_v9 }
  0xd9   : > { %v1233_v11 = vpop.f32.mrf.mxu0 }
  0xda   : > { %v405_v12 = vsel %vm404_vm2, %v403_v10, -inf }
  0xdb   : > { %406 = vmax.xlane.f32.xlu1 %v405_v12  ;;  %v400_v13 = vpop.f32.mrf.mxu0 }
  0xdd   : > { %v1234_v14 = vpop.f32.mrf.mxu0 }
 0x14c   : > { %v520_v15 = vpop.f32.mrf.mxu1 }
 0x14d   : > { %v526_v16 = vmul.f32 0.35355338, %v520_v15 }
 0x14e   : > { %v1245_v17 = vpop.f32.mrf.mxu1 }
 0x14f   : > { %v527_v18 = vsel %vm404_vm2, %v526_v16, -inf }
 0x150   : > { %v523_v19 = vpop.f32.mrf.mxu1  ;;  %528 = vmax.xlane.f32.xlu1 %v527_v18 }
 0x152   : > { %v1246_v20 = vpop.f32.mrf.mxu1 }
 0x164   : > { %v407_v21 = vpop.xlane.xlu1 %406 }
 0x165   : > { %v408_v22 = vsub.f32 %v403_v10, %v407_v21 }
 0x167   : > { %v409_v23 = vmul.f32 1.442695, %v408_v22 }
 0x169   : > { %1327 = vpow2.f32 %v409_v23 }
 0x176   : > { %v1328_v24 = vpop.eup %1327 }
 0x177   : > { %v411_v25 = vsel %vm404_vm2, %v1328_v24, 0.0 }
 0x178   : > { %412 = vadd.xlane.f32.xlu0 %v411_v25 }
 0x18e   : > { %703 = vrot.lane.b32.xlu0 %v1432_v5, %s1356_s22 }
 0x1d9   : > { %v529_v28 = vpop.xlane.xlu1 %528 }
 0x1da   : > { %v530_v29 = vsub.f32 %v526_v16, %v529_v28 }
 0x1dc   : > { %v531_v30 = vmul.f32 1.442695, %v530_v29 }
 0x1de   : > { %1329 = vpow2.f32 %v531_v30 }
 0x1eb   : > { %v1330_v31 = vpop.eup %1329 }
 0x1ec   : > { %v533_v32 = vsel %vm404_vm2, %v1330_v31, 0.0 }
 0x1ed   : > { %534 = vadd.xlane.f32.xlu1 %v533_v32 }
 0x1fe   : > { %542 = vrot.lane.b32.xlu1 %v1455_v33, %s1355_s14 }
 0x201   : > { %v413_v34 = vpop.xlane.xlu0 %412 }
 0x202   : > { %1331 = vrcp.f32 %v413_v34  ;;  %603 = vrot.lane.b32.xlu1 %v1462_v35, %s1355_s14 }
 0x205   : > { %v704_v1 = vpop.permute.xlu0 %703 }
 0x206   : > { %601 = vrot.lane.b32.xlu1 %v1469_v36, %s1355_s14 }
 0x20a   : > { %705 = vrot.lane.b32.xlu1 %v1428_v3, %s1356_s22 }
 0x20f   : > { %v1332_v37 = vpop.eup %1331 }
 0x210   : > { %v415_v38 = vmul.f32 %v1332_v37, %v1328_v24 }
 0x212   : > { %v416_v39 = vpack.c.bf16 %v415_v38, %v415_v38 }
 0x214   : > { %1238 = vmatmul.mubr.msk.bf16.vlgmr.msra.gmra.mxu0 %vm417_vm4, %v416_v39 }
 0x215   : > { %1249 = vmatprep.mubr.msk.bf16.mxu0 %vm1354_vm0, %v1353_v0 }
 0x276   : > { %v535_v40 = vpop.xlane.xlu1 %534 }
 0x277   : > { %1333 = vrcp.f32 %v535_v40 }
 0x27a   : > { %v543_v41 = vpop.permute.xlu1 %542 }
 0x27b   : > { %v548_v42 = vsel %vm421_vm3, %v543_v41, 0 }
 0x27c   : > { %1248 = vmatpush3.bf16.msra.mxu0 %v548_v42 }
 0x27d   : > { %1261 = vmatprep.subr.bf16.mxu0 %v1353_v0 }
 0x27e   : > { %v604_v43 = vpop.permute.xlu1 %603 }
 0x27f   : > { %v612_v44 = vsel %vm356_vm1, %v604_v43, 0 }
 0x280   : > { %1254 = vmatpush3.bf16.xpose.msra.mxu1 %v612_v44 }
 0x281   : > { %1255 = vmatprep.subr.bf16.mxu1 %v1353_v0 }
 0x282   : > { %v602_v45 = vpop.permute.xlu1 %601 }
 0x283   : > { %v609_v48 = vsel %vm356_vm1, %v602_v45, 0 }
 0x284   : > { %v1334_v46 = vpop.eup %1333 }
 0x285   : > { %v537_v47 = vmul.f32 %v1334_v46, %v1330_v31 }
 0x286   : > { %v706_v57 = vpop.permute.xlu1 %705 }
 0x287   : > { %v538_v49 = vpack.c.bf16 %v537_v47, %v537_v47  ;;  %v711_v60 = vsel %vm356_vm1, %v706_v57, 0 }
 0x288   : > { %1256 = vmatpush3.bf16.xpose.msra.mxu1 %v609_v48 }
 0x289   : > { %1250 = vmatmul.mubr.msk.bf16.vlgmr.msra.gmra.mxu0 %vm417_vm4, %v538_v49  ;;  %1269 = vmatprep.subr.bf16.mxu1 %v1353_v0 }
 0x28a   : > { %1262 = vmatpush3.bf16.xpose.msra.mxu0 %v661_v50  ;;  %1265 = vmatprep.mubr.msk.bf16.mxu0 %vm1354_vm0, %v1353_v0 }
 0x28b   : > { %1263 = vmatprep.subr.bf16.mxu0 %v1353_v0 }
 0x292   : > { %1264 = vmatpush3.bf16.xpose.msra.mxu0 %v658_v51 }
 0x293   : > { %1275 = vmatprep.subr.bf16.mxu0 %v1353_v0 }
 0x2d4   : > { %v459_v52 = vpop.f32.mrf.mxu0 }
 0x2d5   : > { %v469_v53 = vpack.c.bf16 %v459_v52, %v459_v52 }
 0x2d6   : > { %v1239_v54 = vpop.f32.mrf.mxu0 }
 0x2d7   : > { %1266 = vmatmul.mubr.msk.bf16.vlgmr.msra.gmra.mxu0 %vm356_vm1, %v469_v53 }
 0x2d8   : > { %v462_v55 = vpop.f32.mrf.mxu0  ;;  %1277 = vmatprep.mubr.msk.bf16.mxu0 %vm1354_vm0, %v1353_v0 }
 0x2da   : > { %v1240_v56 = vpop.f32.mrf.mxu0 }
 0x349   : > { %v584_v58 = vpop.f32.mrf.mxu0 }
 0x34a   : > { %v590_v59 = vpack.c.bf16 %v584_v58, %v584_v58 }
 0x34b   : > { %v1251_v61 = vpop.f32.mrf.mxu0 }
 0x34c   : > { %1258 = vmatmul.mubr.msk.bf16.vlgmr.msra.gmra.mxu1 %vm356_vm1, %v590_v59 }
 0x34d   : > { %1270 = vmatpush3.bf16.xpose.msra.mxu1 %v711_v60  ;;  %v587_v62 = vpop.f32.mrf.mxu0  ;;  %1271 = vmatprep.mubr.msk.bf16.mxu1 %vm1354_vm0, %v1353_v0 }
 0x34e   : > { %1281 = vmatprep.subr.bf16.mxu1 %v1353_v0 }
 0x34f   : > { %v1252_v63 = vpop.f32.mrf.mxu0 }
 0x354   : > { %1272 = vmatmul.mubr.msk.bf16.vlgmr.msra.gmra.mxu1 %vm356_vm1, %v704_v1 }
 0x355   : > { %1285 = vmatprep.mubr.msk.bf16.mxu1 %vm1354_vm0, %v1353_v0 }
 0x397   : > { %v1506_v2 = vpop.f32.mrf.mxu0 }
 0x399   : > { %v1267_v4 = vpop.f32.mrf.mxu0 }
 0x39b   : > { %v700_v6 = vpop.f32.mrf.mxu0 }
 0x39d   : > { %v1268_v7 = vpop.f32.mrf.mxu0 }
 0x40c   : > { %v1508_v8 = vpop.f32.mrf.mxu1 }
 0x40d   : > { %v698_v61 = vadd.f32 %v1506_v2, %v1508_v8  ;;  %v1196_v2 = vld [vmem:[%s1580_s5] ss:$0 sm:$0xff] }
 0x40e   : > { %v1259_v9 = vpop.f32.mrf.mxu1 }
 0x410   : > { %v651_v10 = vpop.f32.mrf.mxu1 }
 0x412   : > { %v1260_v11 = vpop.f32.mrf.mxu1 }
 0x413   : > { %v1043_v11 = vld [vmem:[%s347_s26] sm:$0x7] }
 0x414   : > { %v747_v12 = vpop.f32.mrf.mxu1 }
 0x415   : > { %v753_v13 = vmul.f32 0.35355338, %v747_v12 }
 0x416   : > { %v1273_v14 = vpop.f32.mrf.mxu1 }
 0x417   : > { %v754_v15 = vsel %vm404_vm2, %v753_v13, -inf }
 0x418   : > { %755 = vmax.xlane.f32.xlu1 %v754_v15  ;;  %v750_v16 = vpop.f32.mrf.mxu1 }
 0x41a   : > { %v1274_v17 = vpop.f32.mrf.mxu1 }
 0x429   : > { %766 = vrot.lane.b32.xlu1 %v1455_v33, %s1356_s22 }
 0x42d   : > { %869 = vrot.lane.b32.xlu1 %v1432_v5, %s1357_s23 }
 0x4a1   : > { %v756_v18 = vpop.xlane.xlu1 %755 }
 0x4a2   : > { %v757_v19 = vsub.f32 %v753_v13, %v756_v18  ;;  %v1044_v13 = vunpack.c.l.bf16 %v1043_v11 }
 0x4a4   : > { %v758_v20 = vmul.f32 1.442695, %v757_v19 }
 0x4a5   : > { %v767_v23 = vpop.permute.xlu1 %766 }
 0x4a6   : > { %1335 = vpow2.f32 %v758_v20  ;;  %v772_v24 = vsel %vm421_vm3, %v767_v23, 0 }
 0x4a7   : > { %1276 = vmatpush3.bf16.msra.mxu0 %v772_v24 }
 0x4a8   : > { %1289 = vmatprep.subr.bf16.mxu0 %v1353_v0 }
 0x4a9   : > { %v870_v30 = vpop.permute.xlu1 %869 }
 0x4b3   : > { %v1336_v21 = vpop.eup %1335 }
 0x4b4   : > { %v760_v22 = vsel %vm404_vm2, %v1336_v21, 0.0 }
 0x4b5   : > { %761 = vadd.xlane.f32.xlu0 %v760_v22 }
 0x4cb   : > { %871 = vrot.lane.b32.xlu0 %v1428_v3, %s1357_s23 }
 0x53e   : > { %v762_v25 = vpop.xlane.xlu0 %761 }
 0x53f   : > { %1337 = vrcp.f32 %v762_v25 }
 0x542   : > { %v872_v26 = vpop.permute.xlu0 %871 }
 0x543   : > { %v877_v28 = vsel %vm356_vm1, %v872_v26, 0 }
 0x54c   : > { %v1338_v5 = vpop.eup %1337 }
 0x54d   : > { %v764_v27 = vmul.f32 %v1338_v5, %v1336_v21 }
 0x54f   : > { %v765_v29 = vpack.c.bf16 %v764_v27, %v764_v27 }
 0x551   : > { %1278 = vmatmul.mubr.msk.bf16.vlgmr.msra.gmra.mxu0 %vm417_vm4, %v765_v29 }
 0x552   : > { %1290 = vmatpush3.bf16.xpose.msra.mxu0 %v877_v28  ;;  %1291 = vmatprep.mubr.msk.bf16.mxu0 %vm1354_vm0, %v1353_v0  ;;  %v1197_v28 = vld [vmem:[%s1581_s6] ss:$0 sm:$0xff] }
 0x553   : > { %1295 = vmatprep.subr.bf16.mxu0 %v1353_v0 }
 0x559   : > { %1292 = vmatmul.mubr.msk.bf16.vlgmr.msra.gmra.mxu0 %vm356_vm1, %v870_v30  ;;  %v1198_v30 = vld [vmem:[%s1582_s7] ss:$0 sm:$0xff] }
 0x55a   : > { %1297 = vmatprep.mubr.msk.bf16.mxu0 %vm1354_vm0, %v1353_v0 }
 0x611   : > { %v808_v3 = vpop.f32.mrf.mxu0 }
 0x612   : > { %v814_v57 = vpack.c.bf16 %v808_v3, %v808_v3 }
 0x613   : > { %v1279_v31 = vpop.f32.mrf.mxu0 }
 0x615   : > { %v811_v32 = vpop.f32.mrf.mxu0 }
 0x617   : > { %v1280_v34 = vpop.f32.mrf.mxu0 }
 0x619   : > { %v913_v37 = vpop.f32.mrf.mxu0 }
 0x61a   : > { %v919_v38 = vmul.f32 0.35355338, %v913_v37 }
 0x61b   : > { %v1293_v39 = vpop.f32.mrf.mxu0 }
 0x61c   : > { %v920_v40 = vsel %vm404_vm2, %v919_v38, -inf }
 0x61d   : > { %921 = vmax.xlane.f32.xlu1 %v920_v40  ;;  %v916_v41 = vpop.f32.mrf.mxu0 }
 0x61f   : > { %v1294_v42 = vpop.f32.mrf.mxu0 }
 0x62e   : > { %932 = vrot.lane.b32.xlu1 %v1455_v33, %s1357_s23 }
 0x632   : > { %815 = vrot.lane.b32.xlu1 %v1469_v36, %s1356_s22 }
 0x636   : > { %983 = vrot.lane.b32.xlu1 %v1462_v35, %s1357_s23 }
 0x63a   : > { %981 = vrot.lane.b32.xlu1 %v1469_v36, %s1357_s23 }
 0x6a6   : > { %v922_v43 = vpop.xlane.xlu1 %921 }
 0x6a7   : > { %v923_v44 = vsub.f32 %v919_v38, %v922_v43 }
 0x6a9   : > { %v924_v45 = vmul.f32 1.442695, %v923_v44 }
 0x6aa   : > { %v933_v48 = vpop.permute.xlu1 %932 }
 0x6ab   : > { %1339 = vpow2.f32 %v924_v45  ;;  %v938_v33 = vsel %vm421_vm3, %v933_v48, 0 }
 0x6ac   : > { %1296 = vmatpush3.bf16.msra.mxu0 %v938_v33 }
 0x6ae   : > { %v816_v51 = vpop.permute.xlu1 %815 }
 0x6af   : > { %v823_v52 = vsel %vm356_vm1, %v816_v51, 0 }
 0x6b2   : > { %v984_v55 = vpop.permute.xlu1 %983 }
 0x6b6   : > { %v982_v58 = vpop.permute.xlu1 %981 }
 0x6b7   : > { %v989_v59 = vsel %vm356_vm1, %v982_v58, 0 }
 0x6b8   : > { %v1340_v46 = vpop.eup %1339 }
 0x6b9   : > { %v926_v47 = vsel %vm404_vm2, %v1340_v46, 0.0 }
 0x6ba   : > { %927 = vadd.xlane.f32.xlu0 %v926_v47 }
 0x6d0   : > { %817 = vrot.lane.b32.xlu0 %v1462_v35, %s1356_s22  ;;  %v992_v35 = vsel %vm356_vm1, %v984_v55, 0 }
 0x743   : > { %v928_v49 = vpop.xlane.xlu0 %927 }
 0x744   : > { %1341 = vrcp.f32 %v928_v49 }
 0x747   : > { %v818_v50 = vpop.permute.xlu0 %817 }
 0x748   : > { %v826_v36 = vsel %vm356_vm1, %v818_v50, 0 }
 0x749   : > { %1282 = vmatpush3.bf16.xpose.msra.mxu1 %v826_v36 }
 0x74a   : > { %1283 = vmatprep.subr.bf16.mxu1 %v1353_v0 }
 0x751   : > { %v1342_v53 = vpop.eup %1341  ;;  %1284 = vmatpush3.bf16.xpose.msra.mxu1 %v823_v52 }
 0x752   : > { %v930_v54 = vmul.f32 %v1342_v53, %v1340_v46  ;;  %1301 = vmatprep.subr.bf16.mxu1 %v1353_v0 }
 0x754   : > { %v931_v56 = vpack.c.bf16 %v930_v54, %v930_v54 }
 0x756   : > { %1298 = vmatmul.mubr.msk.bf16.vlgmr.msra.gmra.mxu0 %vm417_vm4, %v931_v56 }
 0x758   : > { %1286 = vmatmul.mubr.msk.bf16.vlgmr.msra.gmra.mxu1 %vm356_vm1, %v814_v57 }
 0x759   : > { %1302 = vmatpush3.bf16.xpose.msra.mxu1 %v992_v35  ;;  %1305 = vmatprep.mubr.msk.bf16.mxu1 %vm1354_vm0, %v1353_v0 }
 0x75a   : > { %1303 = vmatprep.subr.bf16.mxu1 %v1353_v0 }
 0x761   : > { %1304 = vmatpush3.bf16.xpose.msra.mxu1 %v989_v59 }
 0x816   : > { %v974_v60 = vpop.f32.mrf.mxu0 }
 0x817   : > { %v980_v62 = vpack.c.bf16 %v974_v60, %v974_v60 }
 0x818   : > { %v862_v63 = vpop.f32.mrf.mxu1  ;;  %v1299_v1 = vpop.f32.mrf.mxu0 }
 0x819   : > { %v868_v4 = vadd.f32 %v862_v63, %v698_v61  ;;  %1306 = vmatmul.mubr.msk.bf16.vlgmr.msra.gmra.mxu1 %vm356_vm1, %v980_v62 }
 0x81a   : > { %v1287_v6 = vpop.f32.mrf.mxu1  ;;  %v977_v7 = vpop.f32.mrf.mxu0 }
 0x81c   : > { %v865_v9 = vpop.f32.mrf.mxu1  ;;  %v1300_v10 = vpop.f32.mrf.mxu0 }
 0x81e   : > { %v1288_v0 = vpop.f32.mrf.mxu1 }
 0x8d9   : > { %v1028_v12 = vpop.f32.mrf.mxu1 }
 0x8da   : > { %v1034_v8 = vadd.f32 %v1028_v12, %v868_v4 }
 0x8db   : > { %v1307_v14 = vpop.f32.mrf.mxu1 }
 0x8dc   : > { %v1042_v15 = vadd.f32 %v1196_v2, %v1034_v8 }
 0x8dd   : > { %v1031_v16 = vpop.f32.mrf.mxu1 }
 0x8de   : > { %v1045_v17 = vadd.f32 %v1044_v13, %v1042_v15 }
 0x8df   : > { %v1308_v18 = vpop.f32.mrf.mxu1 }
 0x8e0   : > { %v1047_v19 = vsel %vm1046_vm5, %v1045_v17, 0.0 }
 0x8e1   : > { %1048 = vadd.xlane.f32.xlu1 %v1047_v19 }
 0x96a   : > { %v1049_v20 = vpop.xlane.xlu1 %1048 }
 0x96b   : > { %v1051_v21 = vmul.f32 0.03125, %v1049_v20 }
 0x96d   : > { %v1052_v22 = vsub.f32 %v1045_v17, %v1051_v21 }
 0x96f   : > { %v1053_v23 = vmul.f32 %v1052_v22, %v1052_v22 }
 0x971   : > { %v1054_v24 = vsel %vm1046_vm5, %v1053_v23, 0.0 }
 0x972   : > { %1055 = vadd.xlane.f32.xlu0 %v1054_v24 }
 0x9fb   : > { %v1056_v25 = vpop.xlane.xlu0 %1055 }
 0x9fc   : > { %v1057_v5 = vmul.f32 0.03125, %v1056_v25 }
 0x9fe   : > { %v1058_v26 = vadd.f32 1e-05, %v1057_v5 }
 0xa00   : > { %1343 = vrsqrt.f32 %v1058_v26 }
 0xa0d   : > { %v1344_v27 = vpop.eup %1343 }
 0xa0e   : > { %v1060_v29 = vmul.f32 %v1344_v27, %v1052_v22 }
 0xa10   : > { %v1068_v3 = vmul.f32 %v1197_v28, %v1060_v29 }
 0xa12   : > { %v1076_v31 = vadd.f32 %v1198_v30, %v1068_v3 }
 0xa14   : > { %v1077_v32 = vpack.c.bf16 %v1076_v31, %v1076_v31 }
 0xa16   : > { %1079 = vst.msk [vmem:[%s351_s15] sm:$0x7] %vm1078_vm6, %v1077_v32 }
 0xa17 PF: > { %s18_s27 = sadd.s32 1, %s1351_s27  }
 0xa18   : > { %p15_p4 = scmp.ge.s32.totalorder %s18_s27, 4  }
 0xa1a   :  { %17 = sbr.rel (!%p15_p4) target bundleno = 1 (0x1), region = 91 }

// kernel: forward.38
= control target key start
LH: loop header
LB: loop body
LE: loop exit
PB: predicated region body
PF: predicated region fallthrough
CT: control target
= control target key end

     0   :  { %vm18_vm0 = vcmask 261120   ;;  %vm22_vm1 = vcmask 257024   ;;  %vm74_vm2 = vcmask 254976   ;;  %s133_s0 = inlined_call_operand.vmem [shape: bf16[12,32], index: 0, kind: input, shape index: {}]   ;;  %s134_s1 = inlined_call_operand.vmem [shape: f32[1,32], index: 1, kind: input, shape index: {}]   ;;  %s135_s2 = inlined_call_operand.vmem [shape: f32[1,32], index: 2, kind: input, shape index: {}]   ;;  %s136_s3 = inlined_call_operand.vmem [shape: bf16[12,32], index: 3, kind: output, shape index: {}]  }
   0x1   :  { %v14_v0 = vld [vmem:[%s133_s0] sm:$0xf]  ;;  %v15_v1 = vld [vmem:[%s133_s0 + $0x4] sm:$0x3] }
   0x2   :  { %v16_v2 = vunpack.c.l.bf16 %v14_v0  ;;  %v17_v3 = vunpack.c.l.bf16 %v15_v1  ;;  %v80_v23 = vld [vmem:[%s134_s1] ss:$0 sm:$0xff] }
   0x3   :  { %v81_v25 = vld [vmem:[%s135_s2] ss:$0 sm:$0xff] }
   0x4   :  { %v19_v4 = vsel %vm18_vm0, %v16_v2, 0.0  ;;  %v23_v5 = vsel %vm22_vm1, %v17_v3, 0.0 }
   0x5   :  { %20 = vadd.xlane.f32.xlu0 %v19_v4 }
   0x9   :  { %24 = vadd.xlane.f32.xlu0 %v23_v5 }
  0x8e   :  { %v21_v6 = vpop.xlane.xlu0 %20 }
  0x8f   :  { %v27_v7 = vmul.f32 0.03125, %v21_v6 }
  0x91   :  { %v29_v8 = vsub.f32 %v16_v2, %v27_v7 }
  0x92   :  { %v25_v9 = vpop.xlane.xlu0 %24 }
  0x93   :  { %v28_v10 = vmul.f32 0.03125, %v25_v9  ;;  %v31_v11 = vmul.f32 %v29_v8, %v29_v8 }
  0x95   :  { %v30_v12 = vsub.f32 %v17_v3, %v28_v10  ;;  %v33_v13 = vsel %vm18_vm0, %v31_v11, 0.0 }
  0x96   :  { %34 = vadd.xlane.f32.xlu1 %v33_v13 }
  0x97   :  { %v32_v14 = vmul.f32 %v30_v12, %v30_v12 }
  0x99   :  { %v36_v15 = vsel %vm22_vm1, %v32_v14, 0.0 }
  0x9a   :  { %37 = vadd.xlane.f32.xlu1 %v36_v15 }
 0x11f   :  { %v35_v16 = vpop.xlane.xlu1 %34 }
 0x120   :  { %v39_v17 = vmul.f32 0.03125, %v35_v16 }
 0x122   :  { %v41_v18 = vadd.f32 1e-05, %v39_v17 }
 0x123   :  { %v38_v19 = vpop.xlane.xlu1 %37 }
 0x124   :  { %86 = vrsqrt.f32 %v41_v18  ;;  %v40_v20 = vmul.f32 0.03125, %v38_v19 }
 0x126   :  { %v42_v21 = vadd.f32 1e-05, %v40_v20 }
 0x128   :  { %88 = vrsqrt.f32 %v42_v21 }
 0x131   :  { %v87_v22 = vpop.eup %86 }
 0x132   :  { %v45_v24 = vmul.f32 %v87_v22, %v29_v8 }
 0x134   :  { %v54_v26 = vmul.f32 %v80_v23, %v45_v24 }
 0x135   :  { %v89_v27 = vpop.eup %88 }
 0x136   :  { %v63_v28 = vadd.f32 %v81_v25, %v54_v26  ;;  %v46_v29 = vmul.f32 %v89_v27, %v30_v12 }
 0x138   :  { %v84_v30 = vpack.c.bf16 %v63_v28, %v63_v28  ;;  %v55_v31 = vmul.f32 %v80_v23, %v46_v29 }
 0x13a   :  { %73 = vst.msk [vmem:[%s136_s3] sm:$0xf] %vm22_vm1, %v84_v30  ;;  %v64_v32 = vadd.f32 %v81_v25, %v55_v31 }
 0x13c   :  { %v85_v33 = vpack.c.bf16 %v64_v32, %v64_v32 }
 0x13e   :  { %75 = vst.msk [vmem:[%s136_s3 + $0x4] sm:$0x3] %vm74_vm2, %v85_v33 }

// kernel: forward.31
= control target key start
LH: loop header
LB: loop body
LE: loop exit
PB: predicated region body
PF: predicated region fallthrough
CT: control target
= control target key end

     0   :  { %vm69_vm0 = vcmask 261120   ;;  %v324_v0 = vmov 0.0   ;;  %vm325_vm1 = vmmov 0   ;;  %vm150_vm2 = vcmask 523264   ;;  %s421_s1 = inlined_call_operand.vmem [shape: bf16[64,32], index: 1, kind: input, shape index: {}]   ;;  %s422_s3 = inlined_call_operand.vmem [shape: bf16[32,64], index: 3, kind: input, shape index: {}]   ;;  %s423_s0 = inlined_call_operand.vmem [shape: bf16[12,32], index: 0, kind: input, shape index: {}]   ;;  %s424_s2 = inlined_call_operand.vmem [shape: f32[1,64], index: 2, kind: input, shape index: {}]   ;;  %s425_s4 = inlined_call_operand.vmem [shape: f32[1,32], index: 4, kind: input, shape index: {}]   ;;  %s426_s5 = inlined_call_operand.vmem [shape: f32[1,32], index: 5, kind: input, shape index: {}]   ;;  %s427_s6 = inlined_call_operand.vmem [shape: f32[1,32], index: 6, kind: input, shape index: {}]   ;;  %s428_s7 = inlined_call_operand.vmem [shape: bf16[12,32], index: 7, kind: output, shape index: {}]  }
   0x1   :  { %291 = vmatprep.subr.bf16.mxu0 %v324_v0  ;;  %v313_v1 = vld [vmem:[%s421_s1 + $0x18] sm:$0xff]   ;;  %299 = vmatprep.mubr.msk.bf16.mxu0 %vm325_vm1, %v324_v0  ;;  %v314_v3 = vld [vmem:[%s421_s1 + $0x10] sm:$0xff]   ;;  %v318_v4 = vld [vmem:[%s422_s3 + $0x8] sm:$0xff]   ;;  %vm208_vm3 = vcmask 257024   ;;  %vm260_vm4 = vcmask 254976  }
   0x2   :  { %303 = vmatprep.subr.bf16.mxu1 %v324_v0  ;;  %307 = vmatprep.mubr.msk.bf16.mxu1 %vm325_vm1, %v324_v0  ;;  %v83_v2 = vsel %vm69_vm0, %v313_v1, 0  ;;  %v158_v5 = vsel %vm150_vm2, %v318_v4, 0  ;;  %v80_v6 = vsel %vm69_vm0, %v314_v3, 0  ;;  %v315_v7 = vld [vmem:[%s421_s1 + $0x8] sm:$0xff]   ;;  %v316_v9 = vld [vmem:[%s421_s1] sm:$0xff]  }
   0x3   :  { %292 = vmatpush3.bf16.xpose.msra.mxu0 %v83_v2  ;;  %304 = vmatpush3.bf16.xpose.msra.mxu1 %v158_v5  ;;  %v77_v8 = vsel %vm69_vm0, %v315_v7, 0  ;;  %v74_v10 = vsel %vm69_vm0, %v316_v9, 0  ;;  %v27_v11 = vld [vmem:[%s423_s0] sm:$0xf]  ;;  %v28_v12 = vld [vmem:[%s423_s0 + $0x4] sm:$0x3] }
   0x4   :  { %293 = vmatprep.subr.bf16.mxu0 %v324_v0  ;;  %305 = vmatprep.subr.bf16.mxu1 %v324_v0  ;;  %v267_v13 = vcombine.low %v27_v11, %v28_v12  ;;  %v319_v14 = vld [vmem:[%s422_s3] sm:$0xff]   ;;  %v201_v27 = vunpack.c.l.bf16 %v27_v11  ;;  %v202_v32 = vunpack.c.l.bf16 %v28_v12 }
   0x5   :  { %v155_v15 = vsel %vm150_vm2, %v319_v14, 0  ;;  %v266_v16 = vld [vmem:[%s424_s2] ss:$0 sm:$0xff] }
   0x6   :  { %v273_v26 = vld [vmem:[%s425_s4] ss:$0 sm:$0xff] }
   0x7   :  { %v277_v56 = vld [vmem:[%s426_s5] ss:$0 sm:$0xff] }
   0x8   :  { %v278_v58 = vld [vmem:[%s427_s6] ss:$0 sm:$0xff] }
   0xb   :  { %294 = vmatpush3.bf16.xpose.msra.mxu0 %v80_v6  ;;  %306 = vmatpush3.bf16.xpose.msra.mxu1 %v155_v15 }
   0xc   :  { %295 = vmatprep.subr.bf16.mxu0 %v324_v0 }
  0x13   :  { %296 = vmatpush3.bf16.xpose.msra.mxu0 %v77_v8 }
  0x14   :  { %297 = vmatprep.subr.bf16.mxu0 %v324_v0 }
  0x1b   :  { %298 = vmatpush3.bf16.xpose.msra.mxu0 %v74_v10 }
  0x22   :  { %300 = vmatmul.mubr.msk.bf16.vlgmr.msra.gmra.mxu0 %vm69_vm0, %v267_v13 }
  0xe2   :  { %v119_v17 = vpop.f32.mrf.mxu0 }
  0xe3   :  { %v120_v19 = vadd.f32 %v266_v16, %v119_v17 }
  0xe4   :  { %v301_v18 = vpop.f32.mrf.mxu0 }
  0xe5   :  { %v126_v23 = vmax.f32 %v120_v19, 0.0 }
  0xe6   :  { %v122_v20 = vpop.f32.mrf.mxu0 }
  0xe7   :  { %v123_v21 = vadd.f32 %v266_v16, %v122_v20 }
  0xe8   :  { %v302_v22 = vpop.f32.mrf.mxu0 }
  0xe9   :  { %v127_v24 = vmax.f32 %v123_v21, 0.0 }
  0xeb   :  { %v128_v25 = vpack.c.bf16 %v127_v24, %v126_v23 }
  0xed   :  { %308 = vmatmul.mubr.msk.bf16.vlgmr.msra.gmra.mxu1 %vm150_vm2, %v128_v25 }
 0x1ad   :  { %v194_v28 = vpop.f32.mrf.mxu1 }
 0x1ae   :  { %v195_v29 = vadd.f32 %v273_v26, %v194_v28 }
 0x1af   :  { %v309_v30 = vpop.f32.mrf.mxu1 }
 0x1b0   :  { %v203_v31 = vadd.f32 %v201_v27, %v195_v29 }
 0x1b1   :  { %v197_v33 = vpop.f32.mrf.mxu1 }
 0x1b2   :  { %v198_v34 = vadd.f32 %v273_v26, %v197_v33  ;;  %v205_v35 = vsel %vm69_vm0, %v203_v31, 0.0 }
 0x1b3   :  { %206 = vadd.xlane.f32.xlu0 %v205_v35  ;;  %v310_v36 = vpop.f32.mrf.mxu1 }
 0x1b4   :  { %v204_v37 = vadd.f32 %v202_v32, %v198_v34 }
 0x1b6   :  { %v209_v38 = vsel %vm208_vm3, %v204_v37, 0.0 }
 0x1b7   :  { %210 = vadd.xlane.f32.xlu0 %v209_v38 }
 0x23c   :  { %v207_v39 = vpop.xlane.xlu0 %206 }
 0x23d   :  { %v213_v40 = vmul.f32 0.03125, %v207_v39 }
 0x23f   :  { %v215_v41 = vsub.f32 %v203_v31, %v213_v40 }
 0x240   :  { %v211_v42 = vpop.xlane.xlu0 %210 }
 0x241   :  { %v214_v43 = vmul.f32 0.03125, %v211_v42  ;;  %v217_v44 = vmul.f32 %v215_v41, %v215_v41 }
 0x243   :  { %v216_v45 = vsub.f32 %v204_v37, %v214_v43  ;;  %v219_v46 = vsel %vm69_vm0, %v217_v44, 0.0 }
 0x244   :  { %220 = vadd.xlane.f32.xlu1 %v219_v46 }
 0x245   :  { %v218_v47 = vmul.f32 %v216_v45, %v216_v45 }
 0x247   :  { %v222_v48 = vsel %vm208_vm3, %v218_v47, 0.0 }
 0x248   :  { %223 = vadd.xlane.f32.xlu1 %v222_v48 }
 0x2cd   :  { %v221_v49 = vpop.xlane.xlu1 %220 }
 0x2ce   :  { %v225_v50 = vmul.f32 0.03125, %v221_v49 }
 0x2d0   :  { %v227_v51 = vadd.f32 1e-05, %v225_v50 }
 0x2d1   :  { %v224_v52 = vpop.xlane.xlu1 %223 }
 0x2d2   :  { %320 = vrsqrt.f32 %v227_v51  ;;  %v226_v53 = vmul.f32 0.03125, %v224_v52 }
 0x2d4   :  { %v228_v54 = vadd.f32 1e-05, %v226_v53 }
 0x2d6   :  { %322 = vrsqrt.f32 %v228_v54 }
 0x2df   :  { %v321_v55 = vpop.eup %320 }
 0x2e0   :  { %v231_v57 = vmul.f32 %v321_v55, %v215_v41 }
 0x2e2   :  { %v240_v59 = vmul.f32 %v277_v56, %v231_v57 }
 0x2e3   :  { %v323_v60 = vpop.eup %322 }
 0x2e4   :  { %v249_v61 = vadd.f32 %v278_v58, %v240_v59  ;;  %v232_v62 = vmul.f32 %v323_v60, %v216_v45 }
 0x2e6   :  { %v281_v63 = vpack.c.bf16 %v249_v61, %v249_v61  ;;  %v241_v0 = vmul.f32 %v277_v56, %v232_v62 }
 0x2e8   :  { %259 = vst.msk [vmem:[%s428_s7] sm:$0xf] %vm208_vm3, %v281_v63  ;;  %v250_v1 = vadd.f32 %v278_v58, %v241_v0 }
 0x2ea   :  { %v282_v2 = vpack.c.bf16 %v250_v1, %v250_v1 }
 0x2ec   :  { %261 = vst.msk [vmem:[%s428_s7 + $0x4] sm:$0x3] %vm260_vm4, %v282_v2 }

// kernel: forward.30
= control target key start
LH: loop header
LB: loop body
LE: loop exit
PB: predicated region body
PF: predicated region fallthrough
CT: control target
= control target key end

     0   :  { %s1410_s27 = smov 0   ;;  %s1586_s0 = inlined_call_operand.vmem [shape: bf16[2,6,32], index: 0, kind: input, shape index: {}]   ;;  %s1587_s1 = inlined_call_operand.vmem [shape: bf16[2,16,32], index: 1, kind: input, shape index: {}]   ;;  %s1588_s2 = inlined_call_operand.vmem [shape: bf16[2,16,32], index: 2, kind: input, shape index: {}]   ;;  %s1589_s3 = inlined_call_operand.vmem [shape: bf16[2,6,32], index: 3, kind: input, shape index: {}]   ;;  %s1590_s4 = inlined_call_operand.vmem [shape: bf16[32,32], index: 4, kind: input, shape index: {}]   ;;  %s1591_s5 = inlined_call_operand.vmem [shape: f32[1,32], index: 5, kind: input, shape index: {}]   ;;  %s1592_s6 = inlined_call_operand.vmem [shape: f32[1,32], index: 6, kind: input, shape index: {}]   ;;  %s1593_s7 = inlined_call_operand.vmem [shape: f32[1,32], index: 7, kind: input, shape index: {}]   ;;  %s1594_s8 = inlined_call_operand.vmem [shape: bf16[2,6,32], index: 8, kind: output, shape index: {}]  }
   0x1 LB: > { %s1172_s28 = sadd.s32 4294967295, %s1358_s27   ;;  %p1176_p0 = scmp.ge.s32.totalorder %s1358_s27, 1  ;;  %s1358_s27 = sphi %s1410_s27, %s18_s27  }
   0x2   : > { %p290_p1 = scmp.lt.s32.totalorder %s1358_s27, 3 }
   0x4   : > { %p291_p2 = pnand %p1176_p0, %p290_p1 }
   0x5   : > { %p336_p3 = scmp.lt.s32.totalorder (!%p291_p2), %s1172_s28, 1  ;;  %s1362_s15 = smov (!%p291_p2), 120  }
   0x6   : > { %294 = sbr.rel (%p291_p2) target bundleno = 2581 (0xa15), region = 52  ;;  %s1363_s23 = smov (!%p291_p2), 112  }
   0x7   : > { %s1364_s24 = smov (!%p291_p2), 104  }
   0xb   : > { %v1360_v0 = vmov 0.0   ;;  %vm1361_vm0 = vmmov 0   ;;  %s1596_s28 = smov (!%p336_p3, %s1172_s28), 1  ;;  %vm369_vm1 = vcmask 64512   ;;  %vm417_vm2 = vcmask 128000   ;;  %v1476_v32 = vld [vmem:[%s1590_s4 + $0x8] sm:$0xff]  }
   0xc   : > { %1236 = vmatprep.subr.bf16.mxu0 %v1360_v0  ;;  %1238 = vmatprep.mubr.msk.bf16.mxu0 %vm1361_vm0, %v1360_v0  ;;  %s1206_s29 = sshll.u32 %s1596_s28, 3  ;;  %s1428_s30 = sshll.u32 %s1596_s28, 2  ;;  %v1483_v33 = vld [vmem:[%s1590_s4] sm:$0xff]   ;;  %vm436_vm3 = vcmask 130048   ;;  %v668_v46 = vsel %vm369_vm1, %v1476_v32, 0  ;;  %vm1049_vm4 = vcmask 259072  }
   0xd   : > { %1248 = vmatprep.subr.bf16.mxu1 %v1360_v0  ;;  %1250 = vmatprep.mubr.msk.bf16.mxu1 %vm1361_vm0, %v1360_v0  ;;  %s344_s11 = scalar_lea.vmem %s1587_s1, %s1206_s29  ;;  %s339_s14 = scalar_lea.vmem %s1586_s0, %s1428_s30  ;;  %v665_v47 = vsel %vm369_vm1, %v1483_v33, 0  ;;  %vm1081_vm5 = vcmask 256000  }
   0xe   : > { %v1439_v1 = vld [vmem:[%s344_s11] sm:$0xff]   ;;  %s349_s18 = scalar_lea.vmem %s1588_s2, %s1206_s29  ;;  %s353_s28 = scalar_lea.vmem %s1589_s3, %s1428_s30 }
   0xf   : > { %v359_v2 = vld [vmem:[%s339_s14] sm:$0x7]  ;;  %490 = vrot.lane.b32.xlu0 %v1439_v1, %s1362_s15  ;;  %v374_v3 = vsel %vm369_vm1, %v1439_v1, 0  ;;  %s357_s16 = scalar_lea.vmem %s1594_s8, %s1428_s30 }
  0x10   : > { %v1445_v4 = vcombine.low %v359_v2, %v359_v2  ;;  %1237 = vmatpush3.bf16.xpose.msra.mxu0 %v374_v3  ;;  %v1466_v25 = vld [vmem:[%s349_s18] sm:$0xff]  }
  0x11   : > { %1242 = vmatprep.subr.bf16.mxu0 %v1360_v0 }
  0x13   : > { %488 = vrot.lane.b32.xlu0 %v1445_v4, %s1362_s15 }
  0x17   : > { %1239 = vmatmul.mubr.msk.bf16.vlgmr.msra.gmra.mxu0 %vm369_vm1, %v359_v2 }
  0x18   : > { %1244 = vmatprep.mubr.msk.bf16.mxu0 %vm1361_vm0, %v1360_v0  ;;  %1243 = vmatpush3.bf16.msra.mxu0 %v1466_v25 }
  0x19   : > { %1254 = vmatprep.subr.bf16.mxu0 %v1360_v0 }
  0x81   : > { %v491_v5 = vpop.permute.xlu0 %490 }
  0x82   : > { %v496_v6 = vsel %vm369_vm1, %v491_v5, 0 }
  0x83   : > { %1249 = vmatpush3.bf16.xpose.msra.mxu1 %v496_v6 }
  0x84   : > { %1260 = vmatprep.subr.bf16.mxu1 %v1360_v0 }
  0x85   : > { %v489_v7 = vpop.permute.xlu0 %488 }
  0x8a   : > { %1251 = vmatmul.mubr.msk.bf16.vlgmr.msra.gmra.mxu1 %vm369_vm1, %v489_v7 }
  0x8b   : > { %1264 = vmatprep.mubr.msk.bf16.mxu1 %vm1361_vm0, %v1360_v0 }
  0xd7   : > { %v410_v8 = vpop.f32.mrf.mxu0 }
  0xd8   : > { %v416_v9 = vmul.f32 0.35355338, %v410_v8 }
  0xd9   : > { %v1240_v10 = vpop.f32.mrf.mxu0 }
  0xda   : > { %v418_v11 = vsel %vm417_vm2, %v416_v9, -inf }
  0xdb   : > { %419 = vmax.xlane.f32.xlu1 %v418_v11  ;;  %v413_v12 = vpop.f32.mrf.mxu0 }
  0xdd   : > { %v1241_v13 = vpop.f32.mrf.mxu0 }
 0x14a   : > { %v532_v14 = vpop.f32.mrf.mxu1 }
 0x14b   : > { %v538_v15 = vmul.f32 0.35355338, %v532_v14 }
 0x14c   : > { %v1252_v16 = vpop.f32.mrf.mxu1 }
 0x14d   : > { %v539_v17 = vsel %vm417_vm2, %v538_v15, -inf }
 0x14e   : > { %v535_v18 = vpop.f32.mrf.mxu1  ;;  %540 = vmax.xlane.f32.xlu1 %v539_v17 }
 0x150   : > { %v1253_v19 = vpop.f32.mrf.mxu1 }
 0x164   : > { %v420_v20 = vpop.xlane.xlu1 %419 }
 0x165   : > { %v421_v21 = vsub.f32 %v416_v9, %v420_v20 }
 0x167   : > { %v422_v22 = vmul.f32 1.442695, %v421_v21 }
 0x169   : > { %1334 = vpow2.f32 %v422_v22 }
 0x176   : > { %v1335_v23 = vpop.eup %1334 }
 0x177   : > { %v424_v24 = vsel %vm417_vm2, %v1335_v23, 0.0 }
 0x178   : > { %425 = vadd.xlane.f32.xlu0 %v424_v24 }
 0x18e   : > { %710 = vrot.lane.b32.xlu0 %v1445_v4, %s1363_s23 }
 0x1d7   : > { %v541_v26 = vpop.xlane.xlu1 %540 }
 0x1d8   : > { %v542_v27 = vsub.f32 %v538_v15, %v541_v26 }
 0x1da   : > { %v543_v28 = vmul.f32 1.442695, %v542_v27 }
 0x1dc   : > { %1336 = vpow2.f32 %v543_v28 }
 0x1e9   : > { %v1337_v29 = vpop.eup %1336 }
 0x1ea   : > { %v545_v30 = vsel %vm417_vm2, %v1337_v29, 0.0 }
 0x1eb   : > { %546 = vadd.xlane.f32.xlu1 %v545_v30 }
 0x1fc   : > { %551 = vrot.lane.b32.xlu1 %v1466_v25, %s1362_s15 }
 0x200   : > { %610 = vrot.lane.b32.xlu1 %v1476_v32, %s1362_s15 }
 0x201   : > { %v426_v31 = vpop.xlane.xlu0 %425 }
 0x202   : > { %1338 = vrcp.f32 %v426_v31 }
 0x204   : > { %608 = vrot.lane.b32.xlu1 %v1483_v33, %s1362_s15 }
 0x205   : > { %v711_v60 = vpop.permute.xlu0 %710 }
 0x208   : > { %712 = vrot.lane.b32.xlu1 %v1439_v1, %s1363_s23 }
 0x20f   : > { %v1339_v34 = vpop.eup %1338 }
 0x210   : > { %v428_v35 = vmul.f32 %v1339_v34, %v1335_v23 }
 0x212   : > { %v429_v36 = vpack.c.bf16 %v428_v35, %v428_v35 }
 0x214   : > { %1245 = vmatmul.mubr.msk.bf16.vlgmr.msra.gmra.mxu0 %vm436_vm3, %v429_v36 }
 0x215   : > { %1256 = vmatprep.mubr.msk.bf16.mxu0 %vm1361_vm0, %v1360_v0 }
 0x274   : > { %v547_v37 = vpop.xlane.xlu1 %546 }
 0x275   : > { %1340 = vrcp.f32 %v547_v37 }
 0x278   : > { %v552_v38 = vpop.permute.xlu1 %551 }
 0x279   : > { %1255 = vmatpush3.bf16.msra.mxu0 %v552_v38 }
 0x27a   : > { %1268 = vmatprep.subr.bf16.mxu0 %v1360_v0 }
 0x27c   : > { %v611_v39 = vpop.permute.xlu1 %610 }
 0x27d   : > { %v619_v40 = vsel %vm369_vm1, %v611_v39, 0 }
 0x27e   : > { %1261 = vmatpush3.bf16.xpose.msra.mxu1 %v619_v40 }
 0x27f   : > { %1262 = vmatprep.subr.bf16.mxu1 %v1360_v0 }
 0x280   : > { %v609_v41 = vpop.permute.xlu1 %608 }
 0x281   : > { %v616_v44 = vsel %vm369_vm1, %v609_v41, 0 }
 0x282   : > { %v1341_v42 = vpop.eup %1340 }
 0x283   : > { %v549_v43 = vmul.f32 %v1341_v42, %v1337_v29 }
 0x284   : > { %v713_v53 = vpop.permute.xlu1 %712 }
 0x285   : > { %v550_v45 = vpack.c.bf16 %v549_v43, %v549_v43  ;;  %v718_v56 = vsel %vm369_vm1, %v713_v53, 0 }
 0x286   : > { %1263 = vmatpush3.bf16.xpose.msra.mxu1 %v616_v44 }
 0x287   : > { %1257 = vmatmul.mubr.msk.bf16.vlgmr.msra.gmra.mxu0 %vm436_vm3, %v550_v45  ;;  %1276 = vmatprep.subr.bf16.mxu1 %v1360_v0 }
 0x288   : > { %1269 = vmatpush3.bf16.xpose.msra.mxu0 %v668_v46  ;;  %1272 = vmatprep.mubr.msk.bf16.mxu0 %vm1361_vm0, %v1360_v0 }
 0x289   : > { %1270 = vmatprep.subr.bf16.mxu0 %v1360_v0 }
 0x290   : > { %1271 = vmatpush3.bf16.xpose.msra.mxu0 %v665_v47 }
 0x291   : > { %1282 = vmatprep.subr.bf16.mxu0 %v1360_v0 }
 0x2d4   : > { %v474_v48 = vpop.f32.mrf.mxu0 }
 0x2d5   : > { %v484_v49 = vpack.c.bf16 %v474_v48, %v474_v48 }
 0x2d6   : > { %v1246_v50 = vpop.f32.mrf.mxu0 }
 0x2d7   : > { %1273 = vmatmul.mubr.msk.bf16.vlgmr.msra.gmra.mxu0 %vm369_vm1, %v484_v49 }
 0x2d8   : > { %v477_v51 = vpop.f32.mrf.mxu0  ;;  %1284 = vmatprep.mubr.msk.bf16.mxu0 %vm1361_vm0, %v1360_v0 }
 0x2da   : > { %v1247_v52 = vpop.f32.mrf.mxu0 }
 0x347   : > { %v591_v54 = vpop.f32.mrf.mxu0 }
 0x348   : > { %v597_v55 = vpack.c.bf16 %v591_v54, %v591_v54 }
 0x349   : > { %v1258_v57 = vpop.f32.mrf.mxu0 }
 0x34a   : > { %1265 = vmatmul.mubr.msk.bf16.vlgmr.msra.gmra.mxu1 %vm369_vm1, %v597_v55 }
 0x34b   : > { %1277 = vmatpush3.bf16.xpose.msra.mxu1 %v718_v56  ;;  %v594_v58 = vpop.f32.mrf.mxu0  ;;  %1278 = vmatprep.mubr.msk.bf16.mxu1 %vm1361_vm0, %v1360_v0 }
 0x34c   : > { %1288 = vmatprep.subr.bf16.mxu1 %v1360_v0 }
 0x34d   : > { %v1259_v59 = vpop.f32.mrf.mxu0 }
 0x352   : > { %1279 = vmatmul.mubr.msk.bf16.vlgmr.msra.gmra.mxu1 %vm369_vm1, %v711_v60 }
 0x353   : > { %1292 = vmatprep.mubr.msk.bf16.mxu1 %vm1361_vm0, %v1360_v0 }
 0x397   : > { %v1519_v61 = vpop.f32.mrf.mxu0 }
 0x399   : > { %v1274_v62 = vpop.f32.mrf.mxu0 }
 0x39b   : > { %v707_v63 = vpop.f32.mrf.mxu0 }
 0x39d   : > { %v1275_v2 = vpop.f32.mrf.mxu0 }
 0x40a   : > { %v1521_v3 = vpop.f32.mrf.mxu1 }
 0x40b   : > { %v705_v55 = vadd.f32 %v1519_v61, %v1521_v3  ;;  %v1201_v61 = vld [vmem:[%s1591_s5] ss:$0 sm:$0xff] }
 0x40c   : > { %v1266_v5 = vpop.f32.mrf.mxu1 }
 0x40d   : > { %v1046_v5 = vld [vmem:[%s353_s28] sm:$0x7] }
 0x40e   : > { %v658_v6 = vpop.f32.mrf.mxu1 }
 0x410   : > { %v1267_v7 = vpop.f32.mrf.mxu1 }
 0x411   : > { %v1047_v7 = vunpack.c.l.bf16 %v1046_v5 }
 0x412   : > { %v754_v8 = vpop.f32.mrf.mxu1 }
 0x413   : > { %v760_v9 = vmul.f32 0.35355338, %v754_v8 }
 0x414   : > { %v1280_v10 = vpop.f32.mrf.mxu1 }
 0x415   : > { %v761_v11 = vsel %vm417_vm2, %v760_v9, -inf }
 0x416   : > { %762 = vmax.xlane.f32.xlu1 %v761_v11  ;;  %v757_v12 = vpop.f32.mrf.mxu1 }
 0x418   : > { %v1281_v13 = vpop.f32.mrf.mxu1 }
 0x427   : > { %773 = vrot.lane.b32.xlu1 %v1466_v25, %s1363_s23 }
 0x42b   : > { %874 = vrot.lane.b32.xlu1 %v1445_v4, %s1364_s24 }
 0x49f   : > { %v763_v14 = vpop.xlane.xlu1 %762 }
 0x4a0   : > { %v764_v15 = vsub.f32 %v760_v9, %v763_v14 }
 0x4a2   : > { %v765_v16 = vmul.f32 1.442695, %v764_v15 }
 0x4a3   : > { %v774_v19 = vpop.permute.xlu1 %773 }
 0x4a4   : > { %1342 = vpow2.f32 %v765_v16  ;;  %1283 = vmatpush3.bf16.msra.mxu0 %v774_v19 }
 0x4a5   : > { %1296 = vmatprep.subr.bf16.mxu0 %v1360_v0 }
 0x4a7   : > { %v875_v26 = vpop.permute.xlu1 %874 }
 0x4b1   : > { %v1343_v17 = vpop.eup %1342 }
 0x4b2   : > { %v767_v18 = vsel %vm417_vm2, %v1343_v17, 0.0 }
 0x4b3   : > { %768 = vadd.xlane.f32.xlu0 %v767_v18 }
 0x4c9   : > { %876 = vrot.lane.b32.xlu0 %v1439_v1, %s1364_s24 }
 0x53c   : > { %v769_v20 = vpop.xlane.xlu0 %768 }
 0x53d   : > { %1344 = vrcp.f32 %v769_v20 }
 0x540   : > { %v877_v22 = vpop.permute.xlu0 %876 }
 0x541   : > { %v882_v23 = vsel %vm369_vm1, %v877_v22, 0 }
 0x54a   : > { %v1345_v21 = vpop.eup %1344 }
 0x54b   : > { %v771_v4 = vmul.f32 %v1345_v21, %v1343_v17 }
 0x54d   : > { %v772_v24 = vpack.c.bf16 %v771_v4, %v771_v4  ;;  %v1202_v4 = vld [vmem:[%s1592_s6] ss:$0 sm:$0xff] }
 0x54f   : > { %1285 = vmatmul.mubr.msk.bf16.vlgmr.msra.gmra.mxu0 %vm436_vm3, %v772_v24  ;;  %v1203_v24 = vld [vmem:[%s1593_s7] ss:$0 sm:$0xff] }
 0x550   : > { %1297 = vmatpush3.bf16.xpose.msra.mxu0 %v882_v23  ;;  %1298 = vmatprep.mubr.msk.bf16.mxu0 %vm1361_vm0, %v1360_v0 }
 0x551   : > { %1302 = vmatprep.subr.bf16.mxu0 %v1360_v0 }
 0x557   : > { %1299 = vmatmul.mubr.msk.bf16.vlgmr.msra.gmra.mxu0 %vm369_vm1, %v875_v26 }
 0x558   : > { %1304 = vmatprep.mubr.msk.bf16.mxu0 %vm1361_vm0, %v1360_v0 }
 0x60f   : > { %v813_v1 = vpop.f32.mrf.mxu0 }
 0x610   : > { %v819_v51 = vpack.c.bf16 %v813_v1, %v813_v1 }
 0x611   : > { %v1286_v27 = vpop.f32.mrf.mxu0 }
 0x613   : > { %v816_v28 = vpop.f32.mrf.mxu0 }
 0x615   : > { %v1287_v29 = vpop.f32.mrf.mxu0 }
 0x617   : > { %v918_v30 = vpop.f32.mrf.mxu0 }
 0x618   : > { %v924_v31 = vmul.f32 0.35355338, %v918_v30 }
 0x619   : > { %v1300_v34 = vpop.f32.mrf.mxu0 }
 0x61a   : > { %v925_v35 = vsel %vm417_vm2, %v924_v31, -inf }
 0x61b   : > { %926 = vmax.xlane.f32.xlu1 %v925_v35  ;;  %v921_v36 = vpop.f32.mrf.mxu0 }
 0x61d   : > { %v1301_v37 = vpop.f32.mrf.mxu0 }
 0x62c   : > { %937 = vrot.lane.b32.xlu1 %v1466_v25, %s1364_s24 }
 0x630   : > { %820 = vrot.lane.b32.xlu1 %v1483_v33, %s1363_s23 }
 0x634   : > { %986 = vrot.lane.b32.xlu1 %v1476_v32, %s1364_s24 }
 0x638   : > { %984 = vrot.lane.b32.xlu1 %v1483_v33, %s1364_s24 }
 0x6a4   : > { %v927_v38 = vpop.xlane.xlu1 %926 }
 0x6a5   : > { %v928_v39 = vsub.f32 %v924_v31, %v927_v38 }
 0x6a7   : > { %v929_v40 = vmul.f32 1.442695, %v928_v39 }
 0x6a8   : > { %v938_v43 = vpop.permute.xlu1 %937 }
 0x6a9   : > { %1346 = vpow2.f32 %v929_v40  ;;  %1303 = vmatpush3.bf16.msra.mxu0 %v938_v43 }
 0x6ac   : > { %v821_v33 = vpop.permute.xlu1 %820 }
 0x6ad   : > { %v828_v46 = vsel %vm369_vm1, %v821_v33, 0 }
 0x6b0   : > { %v987_v49 = vpop.permute.xlu1 %986 }
 0x6b4   : > { %v985_v52 = vpop.permute.xlu1 %984 }
 0x6b5   : > { %v992_v53 = vsel %vm369_vm1, %v985_v52, 0 }
 0x6b6   : > { %v1347_v41 = vpop.eup %1346 }
 0x6b7   : > { %v931_v42 = vsel %vm417_vm2, %v1347_v41, 0.0 }
 0x6b8   : > { %932 = vadd.xlane.f32.xlu0 %v931_v42 }
 0x6ce   : > { %822 = vrot.lane.b32.xlu0 %v1476_v32, %s1363_s23  ;;  %v995_v32 = vsel %vm369_vm1, %v987_v49, 0 }
 0x741   : > { %v933_v25 = vpop.xlane.xlu0 %932 }
 0x742   : > { %1348 = vrcp.f32 %v933_v25 }
 0x745   : > { %v823_v44 = vpop.permute.xlu0 %822 }
 0x746   : > { %v831_v45 = vsel %vm369_vm1, %v823_v44, 0 }
 0x747   : > { %1289 = vmatpush3.bf16.xpose.msra.mxu1 %v831_v45 }
 0x748   : > { %1290 = vmatprep.subr.bf16.mxu1 %v1360_v0 }
 0x74f   : > { %v1349_v47 = vpop.eup %1348  ;;  %1291 = vmatpush3.bf16.xpose.msra.mxu1 %v828_v46 }
 0x750   : > { %v935_v48 = vmul.f32 %v1349_v47, %v1347_v41  ;;  %1308 = vmatprep.subr.bf16.mxu1 %v1360_v0 }
 0x752   : > { %v936_v50 = vpack.c.bf16 %v935_v48, %v935_v48 }
 0x754   : > { %1305 = vmatmul.mubr.msk.bf16.vlgmr.msra.gmra.mxu0 %vm436_vm3, %v936_v50 }
 0x756   : > { %1293 = vmatmul.mubr.msk.bf16.vlgmr.msra.gmra.mxu1 %vm369_vm1, %v819_v51 }
 0x757   : > { %1309 = vmatpush3.bf16.xpose.msra.mxu1 %v995_v32  ;;  %1312 = vmatprep.mubr.msk.bf16.mxu1 %vm1361_vm0, %v1360_v0 }
 0x758   : > { %1310 = vmatprep.subr.bf16.mxu1 %v1360_v0 }
 0x75f   : > { %1311 = vmatpush3.bf16.xpose.msra.mxu1 %v992_v53 }
 0x814   : > { %v977_v54 = vpop.f32.mrf.mxu0 }
 0x815   : > { %v983_v56 = vpack.c.bf16 %v977_v54, %v977_v54 }
 0x816   : > { %v867_v57 = vpop.f32.mrf.mxu1  ;;  %v1306_v58 = vpop.f32.mrf.mxu0 }
 0x817   : > { %v873_v59 = vadd.f32 %v867_v57, %v705_v55  ;;  %1313 = vmatmul.mubr.msk.bf16.vlgmr.msra.gmra.mxu1 %vm369_vm1, %v983_v56 }
 0x818   : > { %v1294_v60 = vpop.f32.mrf.mxu1  ;;  %v980_v62 = vpop.f32.mrf.mxu0 }
 0x81a   : > { %v870_v63 = vpop.f32.mrf.mxu1  ;;  %v1307_v2 = vpop.f32.mrf.mxu0 }
 0x81c   : > { %v1295_v0 = vpop.f32.mrf.mxu1 }
 0x8d7   : > { %v1031_v6 = vpop.f32.mrf.mxu1 }
 0x8d8   : > { %v1037_v3 = vadd.f32 %v1031_v6, %v873_v59 }
 0x8d9   : > { %v1314_v8 = vpop.f32.mrf.mxu1 }
 0x8da   : > { %v1045_v9 = vadd.f32 %v1201_v61, %v1037_v3 }
 0x8db   : > { %v1034_v10 = vpop.f32.mrf.mxu1 }
 0x8dc   : > { %v1048_v11 = vadd.f32 %v1047_v7, %v1045_v9 }
 0x8dd   : > { %v1315_v12 = vpop.f32.mrf.mxu1 }
 0x8de   : > { %v1050_v13 = vsel %vm1049_vm4, %v1048_v11, 0.0 }
 0x8df   : > { %1051 = vadd.xlane.f32.xlu1 %v1050_v13 }
 0x968   : > { %v1052_v14 = vpop.xlane.xlu1 %1051 }
 0x969   : > { %v1054_v15 = vmul.f32 0.03125, %v1052_v14 }
 0x96b   : > { %v1055_v16 = vsub.f32 %v1048_v11, %v1054_v15 }
 0x96d   : > { %v1056_v17 = vmul.f32 %v1055_v16, %v1055_v16 }
 0x96f   : > { %v1057_v18 = vsel %vm1049_vm4, %v1056_v17, 0.0 }
 0x970   : > { %1058 = vadd.xlane.f32.xlu0 %v1057_v18 }
 0x9f9   : > { %v1059_v19 = vpop.xlane.xlu0 %1058 }
 0x9fa   : > { %v1060_v20 = vmul.f32 0.03125, %v1059_v19 }
 0x9fc   : > { %v1061_v21 = vadd.f32 1e-05, %v1060_v20 }
 0x9fe   : > { %1350 = vrsqrt.f32 %v1061_v21 }
 0xa0b   : > { %v1351_v22 = vpop.eup %1350 }
 0xa0c   : > { %v1063_v23 = vmul.f32 %v1351_v22, %v1055_v16 }
 0xa0e   : > { %v1071_v26 = vmul.f32 %v1202_v4, %v1063_v23 }
 0xa10   : > { %v1079_v1 = vadd.f32 %v1203_v24, %v1071_v26 }
 0xa12   : > { %v1080_v27 = vpack.c.bf16 %v1079_v1, %v1079_v1 }
 0xa14   : > { %1082 = vst.msk [vmem:[%s357_s16] sm:$0x7] %vm1081_vm5, %v1080_v27 }
 0xa15 PF: > { %s18_s27 = sadd.s32 1, %s1358_s27  }
 0xa16   : > { %p15_p4 = scmp.ge.s32.totalorder %s18_s27, 4  }
 0xa18   :  { %17 = sbr.rel (!%p15_p4) target bundleno = 1 (0x1), region = 91 }

// kernel: forward.39
= control target key start
LH: loop header
LB: loop body
LE: loop exit
PB: predicated region body
PF: predicated region fallthrough
CT: control target
= control target key end

     0   :  { %vm55_vm0 = vcmask 523264   ;;  %v37_v1 = vlaneseq  ;;  %vm20_vm1 = vcmask 41984   ;;  %v165_v5 = vmov 1966171168   ;;  %s205_s0 = inlined_call_operand.vmem [shape: bf16[2,192], index: 0, kind: input, shape index: {}]   ;;  %s206_s1 = inlined_call_operand.vmem [shape: bf16[6,192], index: 1, kind: input, shape index: {}]   ;;  %s207_s2 = inlined_call_operand.vmem [shape: f32[1,6], index: 2, kind: input, shape index: {}]   ;;  %s208_s3 = inlined_call_operand.hbm [shape: f32[2,6], index: 3, kind: output, shape index: {}]  }
   0x1   :  { %v24_v0 = vld [vmem:[%s206_s1] sm:$0x77]  ;;  %v35_v6 = vunpack.c.l.s4 %v165_v5  ;;  %v166_v8 = vmov 0.0  }
   0x2   :  { %v134_v2 = vcombine.high %v24_v0, %v24_v0  ;;  %v133_v3 = vcombine.low %v24_v0, %v24_v0  ;;  %v132_v4 = vld.sshfl [vmem:[%s205_s0] sm:$0x11 pattern:$0x75316420]  ;;  %v38_v7 = vshrl.u32 %v37_v1, 7 }
   0x3   :  { %21 = vst.msk [vmem:[#allocation2] sm:$0x3] %vm20_vm1, %v166_v8 }
   0x4   :  { %8 = vsyncpa [#allocation4], 0  ;;  %135 = vmatprep.subr.msk.bf16.mxu0 %vm55_vm0, %v134_v2  ;;  %v33_v9 = vcombine.high %v132_v4, %v132_v4  ;;  %v36_v10 = vunpack.c.0.s8 %v35_v6  ;;  %v137_v20 = vld [vmem:[%s207_s2] ss:$0 sm:$0xff]  ;;  %s167_s16 = smov [#allocation3]  }
   0x5   :  { %77 = vmatpush1.bf16.xpose.msra.mxu0 %v133_v3  ;;  %s124_s17 = sshll.u32 %s167_s16, 4  ;;  %s125_s17 = int_to_ptr.vmem [resolvable:$true] %s124_s17 }
   0x6   :  { %v39_v11 = vsub.s32 %v36_v10, %v38_v7  ;;  %s143_s18 = scalar_lea.vmem %s125_s17, 32  ;;  %p148_p1 = scmp.lt.s32.totalorder %s125_s17, %s125_s17 }
   0x7   :  { %p144_p0 = scmp.ne.s32.totalorder %s125_s17, %s143_s18  ;;  %p149_p2 = scmp.lt.s32.totalorder %s143_s18, %s143_s18 }
   0x8   :  { %v47_v12 = vrot.slane %v33_v9, %v39_v11  ;;  %v40_v13 = vrot.slane %v132_v4, %v39_v11 }
   0x9   :  { %p150_p3 = por %p149_p2, %p148_p1 }
   0xa   :  { %136 = vmatprep.mubr.msk.bf16.mxu0 %vm55_vm0, %v47_v12  ;;  %v22_v14 = vld [vmem:[#allocation2] sm:$0x3] }
   0xb   :  { %p151_p4 = pnand %p150_p3, %p144_p0 }
   0xc   :  { %95 = vmatmul.mubr.bf16.vlgmr.msra.gmra.mxu0 %v40_v13 }
  0xcc   :  { %v96_v15 = vpop.f32.mrf.mxu0 }
  0xcd   :  { %v102_v16 = vadd.f32 %v96_v15, %v22_v14 }
  0xce   :  { %v98_v17 = vpop.f32.mrf.mxu0 }
  0xcf   :  { %104 = vst.msk [vmem:[#allocation2] sm:$0x3] %vm20_vm1, %v102_v16 }
  0xd0   :  { %v99_v18 = vpop.f32.mrf.mxu0 }
  0xd2   :  { %v100_v19 = vpop.f32.mrf.mxu0 }
  0xd6   :  { %v108_v21 = vld [vmem:[#allocation2] sm:$0x3] }
  0xd7   :  { %v116_v22 = vadd.f32 %v137_v20, %v108_v21 }
  0xd9   :  { %117 = vst.msk [vmem:[#allocation3] sm:$0x3] %vm20_vm1, %v116_v22 }
  0xda   :  { %154 = shalt.err (!%p151_p4)
}
  0xdb   :  { %127 = dma.vmem_to_hbm [thread:$0]  %s125_s17, 32, %s208_s3, [#allocation4]  }
  0xdc   :  { %163 = dma.done.wait [#allocation4], 32  }
  0xdd   :  { %164 = vsyncadd [#allocation4], 4294967264 }
  0xde   :  { %131 = vsyncpa [#allocation4], 1 }

</bundles_post_ra>
